<compile_context>
chip_gen: v7x
topology: tpu7x:2x2x1
jax: 0.10.0
libtpu: 0.0.40
codegen_flags: <defaults>
</compile_context>

<pallas_src>
import jax
import jax.numpy as jnp
from jax.experimental import pallas as pl
from jax.experimental.pallas import tpu as pltpu


# ----------------------------------------------------------------------------
# Fused kernel: 3 residual folding blocks + global max over L + our_end head.
#   grid = (B // Bt, L // TL); the L axis is an "arbitrary" reduction axis,
#   the running max lives in a VMEM scratch, and the head runs only at the
#   last L step of each batch-tile.
# ----------------------------------------------------------------------------
def _decoder_kernel(x_ref,
                    fw1_ref, fb1_ref, fw2_ref, fb2_ref, fw3_ref, fb3_ref,
                    hwa_ref, hba_ref, hwb_ref, hbb_ref,
                    out_ref, max_sc):
    cdt = fw1_ref.dtype                        # compute dtype (bf16 by default)
    bt, tl, c = x_ref.shape
    # (Bt, TL, C) -> (Bt*TL, C): batch folded into the matmul row dimension.
    x = x_ref[...].astype(jnp.float32).reshape(bt * tl, c)

    # Three folding blocks (statically unrolled).
    for i in range(3):
        h = jnp.dot(x.astype(cdt), fw1_ref[i],
                    preferred_element_type=jnp.float32) + fb1_ref[i]
        h = jnp.maximum(h, 0.0)
        h = jnp.dot(h.astype(cdt), fw2_ref[i],
                    preferred_element_type=jnp.float32) + fb2_ref[i]
        h = jnp.maximum(h, 0.0)
        x = x + jnp.dot(h.astype(cdt), fw3_ref[i],
                        preferred_element_type=jnp.float32) + fb3_ref[i]

    # Running per-batch max over the L axis.
    tile_max = jnp.max(x.reshape(bt, tl, c), axis=1)          # (Bt, C)
    l = pl.program_id(1)
    prev = jnp.where(l == 0, jnp.float32(-jnp.inf), max_sc[...])
    max_sc[...] = jnp.maximum(prev, tile_max)

    # Fused "our_end" head on the pooled features at the final L step.
    @pl.when(l == pl.num_programs(1) - 1)
    def _():
        m = jnp.maximum(max_sc[...], 0.0)                     # ReLU, (Bt, C)
        h = jnp.dot(m.astype(cdt), hwa_ref[...],
                    preferred_element_type=jnp.float32) + hba_ref[...]
        h = jnp.maximum(h, 0.0)                               # ReLU
        o = jnp.dot(h.astype(cdt), hwb_ref[...],
                    preferred_element_type=jnp.float32) + hbb_ref[...]
        out_ref[...] = o[:, None, :]                          # (Bt, 1, Fout)


# ----------------------------------------------------------------------------
# Parameter construction (deterministic) + BN folding (eval mode)
# ----------------------------------------------------------------------------
def _dense(key, fan_in, fan_out):
    kw, kb = jax.random.split(key)
    w = jax.random.normal(kw, (fan_in, fan_out), jnp.float32) / jnp.sqrt(
        jnp.float32(fan_in))
    b = 0.02 * jax.random.normal(kb, (fan_out,), jnp.float32)
    return w, b


def _bn(key, n):
    k1, k2, k3, k4 = jax.random.split(key, 4)
    gamma = 1.0 + 0.1 * jax.random.normal(k1, (n,), jnp.float32)
    beta = 0.1 * jax.random.normal(k2, (n,), jnp.float32)
    mean = 0.1 * jax.random.normal(k3, (n,), jnp.float32)
    var = 1.0 + 0.1 * jax.random.uniform(k4, (n,), jnp.float32)
    return gamma, beta, mean, var


def _fold_bn(w, b, gamma, beta, mean, var, eps=1e-5):
    scale = gamma / jnp.sqrt(var + eps)
    return w * scale[None, :], (b - mean) * scale + beta


def init_params(key, dim, final_dim, compute_dtype=jnp.bfloat16):
    keys = jax.random.split(key, 32)
    ki = iter(keys)
    w1s, b1s, w2s, b2s, w3s, b3s = [], [], [], [], [], []
    for _ in range(3):
        w1, b1 = _dense(next(ki), dim, 4 * dim)
        w1, b1 = _fold_bn(w1, b1, *_bn(next(ki), 4 * dim))
        w2, b2 = _dense(next(ki), 4 * dim, 4 * dim)
        w2, b2 = _fold_bn(w2, b2, *_bn(next(ki), 4 * dim))
        w3, b3 = _dense(next(ki), 4 * dim, dim)   # last conv: bias only, no BN
        w1s.append(w1); b1s.append(b1)
        w2s.append(w2); b2s.append(b2)
        w3s.append(w3); b3s.append(b3)
    wa, ba = _dense(next(ki), dim, 1024)
    wa, ba = _fold_bn(wa, ba, *_bn(next(ki), 1024))
    wb, bb = _dense(next(ki), 1024, 3 * final_dim)
    return {
        # stacked fold weights (bf16) and biases (fp32)
        "fw1": jnp.stack(w1s).astype(compute_dtype),     # (3, C, 4C)
        "fb1": jnp.stack(b1s)[:, None, :],               # (3, 1, 4C)
        "fw2": jnp.stack(w2s).astype(compute_dtype),     # (3, 4C, 4C)
        "fb2": jnp.stack(b2s)[:, None, :],               # (3, 1, 4C)
        "fw3": jnp.stack(w3s).astype(compute_dtype),     # (3, 4C, C)
        "fb3": jnp.stack(b3s)[:, None, :],               # (3, 1, C)
        # head
        "hwa": wa.astype(compute_dtype),                 # (C, 1024)
        "hba": ba[None, :],                              # (1, 1024)
        "hwb": wb.astype(compute_dtype),                 # (1024, 3*final_dim)
        "hbb": bb[None, :],                              # (1, 3*final_dim)
    }


# ----------------------------------------------------------------------------
# Wrapper
# ----------------------------------------------------------------------------
def _pick_bt(B, tl, max_rows=1024):
    """Largest batch tile with Bt*TL <= max_rows that (a) divides B and
    (b) is either B itself or a multiple of 8 (output-block constraint)."""
    cap = max(1, max_rows // tl)
    if B <= cap:
        return B
    bt = (cap // 8) * 8
    while bt >= 8 and B % bt:
        bt -= 8
    return bt if bt >= 8 and B % bt == 0 else (B if B <= cap else 1)


def vqvae_decoder_depth3(x_ncw, params, *, bt=None, tl=None):
    B, C, L = x_ncw.shape
    if tl is None:
        tl = L if L <= 512 else 512          # biggest L tile that fits VMEM
    if bt is None:
        bt = _pick_bt(B, tl)
    assert L % tl == 0 and tl % 8 == 0 and C % 128 == 0
    assert B % bt == 0 and (bt == B or bt % 8 == 0)
    x = jnp.transpose(x_ncw, (0, 2, 1))      # (B, L, C) channels-last

    weights = [params[k] for k in
               ("fw1", "fb1", "fw2", "fb2", "fw3", "fb3",
                "hwa", "hba", "hwb", "hbb")]
    fout = params["hwb"].shape[-1]

    # Grid-invariant full-block specs (constant index_map -> DMA'd once and
    # kept VMEM-resident across the grid).
    w_specs = [pl.BlockSpec(w.shape, lambda b, l, nd=w.ndim: (0,) * nd)
               for w in weights]

    out = pl.pallas_call(
        _decoder_kernel,
        out_shape=jax.ShapeDtypeStruct((B, 1, fout), jnp.float32),
        grid_spec=pltpu.PrefetchScalarGridSpec(
            num_scalar_prefetch=0,
            grid=(B // bt, L // tl),
            in_specs=[pl.BlockSpec((bt, tl, C), lambda b, l: (b, l, 0))]
                     + w_specs,
            out_specs=pl.BlockSpec((bt, 1, fout), lambda b, l: (b, 0, 0)),
            scratch_shapes=[pltpu.VMEM((bt, C), jnp.float32)],
        ),
        compiler_params=pltpu.CompilerParams(
            dimension_semantics=("parallel", "arbitrary"),
            vmem_limit_bytes=48 * 1024 * 1024),
    )(x, *weights)

    # back to PyTorch layout: (B, final_dim*3, 1)
    return jnp.transpose(out, (0, 2, 1))


# ----------------------------------------------------------------------------
# Pure-JAX reference with the same (folded-BN, bf16-cast) params and the same
# mixed-precision math, for a tight correctness check.
# ----------------------------------------------------------------------------
def reference(x_ncw, params):
    cdt = params["fw1"].dtype
    x = jnp.transpose(x_ncw, (0, 2, 1)).astype(jnp.float32)   # (B, L, C)
    for i in range(3):
        h = jnp.dot(x.astype(cdt), params["fw1"][i],
                    preferred_element_type=jnp.float32) + params["fb1"][i]
        h = jnp.maximum(h, 0.0)
        h = jnp.dot(h.astype(cdt), params["fw2"][i],
                    preferred_element_type=jnp.float32) + params["fb2"][i]
        h = jnp.maximum(h, 0.0)
        x = x + jnp.dot(h.astype(cdt), params["fw3"][i],
                        preferred_element_type=jnp.float32) + params["fb3"][i]
    m = jnp.max(x, axis=1)                                    # (B, C)
    h = jnp.maximum(m, 0.0)
    h = jnp.dot(h.astype(cdt), params["hwa"],
                preferred_element_type=jnp.float32) + params["hba"]
    h = jnp.maximum(h, 0.0)
    out = jnp.dot(h.astype(cdt), params["hwb"],
                  preferred_element_type=jnp.float32) + params["hbb"]
    return out[:, :, None]


if __name__ == "__main__":
    # Small shapes consistent with the module: codebook_dim=128, final_dim=128
    B, C, L, FINAL = 2, 128, 16, 128
    key = jax.random.PRNGKey(0)
    kx, kp = jax.random.split(key)
    x = jax.random.normal(kx, (B, C, L), jnp.float32)     # PyTorch NCW input
    params = init_params(kp, C, FINAL)

    out = jax.block_until_ready(vqvae_decoder_depth3(x, params))
    assert out.shape == (B, 3 * FINAL, 1), out.shape

    ref = jax.block_until_ready(reference(x, params))
    err = float(jnp.max(jnp.abs(out - ref)))
    assert err < 1e-2, f"mismatch vs reference: max abs err {err}"

    print("KERNEL_OK")
</pallas_src>

<mosaic_0001>
module attributes {stable_mosaic.version = 11 : i64} {
  func.func @_decoder_kernel(%arg0: i32, %arg1: i32, %arg2: memref<2x16x128xf32, #tpu.memory_space<vmem>>, %arg3: memref<3x128x512xbf16, #tpu.memory_space<vmem>>, %arg4: memref<3x1x512xf32, #tpu.memory_space<vmem>>, %arg5: memref<3x512x512xbf16, #tpu.memory_space<vmem>>, %arg6: memref<3x1x512xf32, #tpu.memory_space<vmem>>, %arg7: memref<3x512x128xbf16, #tpu.memory_space<vmem>>, %arg8: memref<3x1x128xf32, #tpu.memory_space<vmem>>, %arg9: memref<128x1024xbf16, #tpu.memory_space<vmem>>, %arg10: memref<1x1024xf32, #tpu.memory_space<vmem>>, %arg11: memref<1024x384xbf16, #tpu.memory_space<vmem>>, %arg12: memref<1x384xf32, #tpu.memory_space<vmem>>, %arg13: memref<2x1x384xf32, #tpu.memory_space<vmem>>, %arg14: memref<2x128xf32, #tpu.memory_space<vmem>>) attributes {dimension_semantics = [#tpu.dimension_semantics<parallel>, #tpu.dimension_semantics<arbitrary>], iteration_bounds = array<i64: 1, 1>, scalar_prefetch = 0 : i64, scratch_operands = 1 : i64, tpu.core_type = #tpu.core_type<tc>, window_params = [{transform_indices = @transform_0, window_bounds = array<i64: 2, 16, 128>}, {pipeline_mode = #tpu.pipeline_mode<synchronous>, transform_indices = @transform_1, window_bounds = array<i64: 3, 128, 512>}, {pipeline_mode = #tpu.pipeline_mode<synchronous>, transform_indices = @transform_2, window_bounds = array<i64: 3, 1, 512>}, {pipeline_mode = #tpu.pipeline_mode<synchronous>, transform_indices = @transform_3, window_bounds = array<i64: 3, 512, 512>}, {pipeline_mode = #tpu.pipeline_mode<synchronous>, transform_indices = @transform_4, window_bounds = array<i64: 3, 1, 512>}, {pipeline_mode = #tpu.pipeline_mode<synchronous>, transform_indices = @transform_5, window_bounds = array<i64: 3, 512, 128>}, {pipeline_mode = #tpu.pipeline_mode<synchronous>, transform_indices = @transform_6, window_bounds = array<i64: 3, 1, 128>}, {pipeline_mode = #tpu.pipeline_mode<synchronous>, transform_indices = @transform_7, window_bounds = array<i64: 128, 1024>}, {pipeline_mode = #tpu.pipeline_mode<synchronous>, transform_indices = @transform_8, window_bounds = array<i64: 1, 1024>}, {pipeline_mode = #tpu.pipeline_mode<synchronous>, transform_indices = @transform_9, window_bounds = array<i64: 1024, 384>}, {pipeline_mode = #tpu.pipeline_mode<synchronous>, transform_indices = @transform_10, window_bounds = array<i64: 1, 384>}, {transform_indices = @transform_11, window_bounds = array<i64: 2, 1, 384>}]} {
    %c0 = arith.constant 0 : index
    %c0_0 = arith.constant 0 : index
    %c0_1 = arith.constant 0 : index
    %0 = vector.load %arg2[%c0, %c0_0, %c0_1] : memref<2x16x128xf32, #tpu.memory_space<vmem>>, vector<2x16x128xf32>
    %1 = vector.shape_cast %0 : vector<2x16x128xf32> to vector<32x128xf32>
    %2 = arith.truncf %1 : vector<32x128xf32> to vector<32x128xbf16>
    %c0_2 = arith.constant 0 : index
    %c0_3 = arith.constant 0 : index
    %c0_4 = arith.constant 0 : index
    %3 = vector.load %arg3[%c0_2, %c0_3, %c0_4] : memref<3x128x512xbf16, #tpu.memory_space<vmem>>, vector<1x128x512xbf16>
    %4 = vector.shape_cast %3 : vector<1x128x512xbf16> to vector<128x512xbf16>
    %cst = arith.constant dense<0.000000e+00> : vector<32x512xf32>
    %5 = tpu.matmul %2, %4, %cst {dimension_numbers = #tpu.dot_dimension_numbers<[1], [0], [0], [1], [0, 0, 1, 1], [], []>} : vector<32x128xbf16>, vector<128x512xbf16>, vector<32x512xf32> -> vector<32x512xf32>
    %c0_5 = arith.constant 0 : index
    %c0_6 = arith.constant 0 : index
    %c0_7 = arith.constant 0 : index
    %6 = vector.load %arg4[%c0_5, %c0_6, %c0_7] : memref<3x1x512xf32, #tpu.memory_space<vmem>>, vector<1x1x512xf32>
    %7 = vector.shape_cast %6 : vector<1x1x512xf32> to vector<1x512xf32>
    %8 = vector.broadcast %7 : vector<1x512xf32> to vector<32x512xf32>
    %9 = arith.addf %5, %8 : vector<32x512xf32>
    %cst_8 = arith.constant 0.000000e+00 : f32
    %10 = vector.broadcast %cst_8 : f32 to vector<32x512xf32>
    %11 = arith.maximumf %9, %10 : vector<32x512xf32>
    %12 = arith.truncf %11 : vector<32x512xf32> to vector<32x512xbf16>
    %c0_9 = arith.constant 0 : index
    %c0_10 = arith.constant 0 : index
    %c0_11 = arith.constant 0 : index
    %13 = vector.load %arg5[%c0_9, %c0_10, %c0_11] : memref<3x512x512xbf16, #tpu.memory_space<vmem>>, vector<1x512x512xbf16>
    %14 = vector.shape_cast %13 : vector<1x512x512xbf16> to vector<512x512xbf16>
    %cst_12 = arith.constant dense<0.000000e+00> : vector<32x512xf32>
    %15 = tpu.matmul %12, %14, %cst_12 {dimension_numbers = #tpu.dot_dimension_numbers<[1], [0], [0], [1], [0, 0, 1, 1], [], []>} : vector<32x512xbf16>, vector<512x512xbf16>, vector<32x512xf32> -> vector<32x512xf32>
    %c0_13 = arith.constant 0 : index
    %c0_14 = arith.constant 0 : index
    %c0_15 = arith.constant 0 : index
    %16 = vector.load %arg6[%c0_13, %c0_14, %c0_15] : memref<3x1x512xf32, #tpu.memory_space<vmem>>, vector<1x1x512xf32>
    %17 = vector.shape_cast %16 : vector<1x1x512xf32> to vector<1x512xf32>
    %18 = vector.broadcast %17 : vector<1x512xf32> to vector<32x512xf32>
    %19 = arith.addf %15, %18 : vector<32x512xf32>
    %cst_16 = arith.constant 0.000000e+00 : f32
    %20 = vector.broadcast %cst_16 : f32 to vector<32x512xf32>
    %21 = arith.maximumf %19, %20 : vector<32x512xf32>
    %22 = arith.truncf %21 : vector<32x512xf32> to vector<32x512xbf16>
    %c0_17 = arith.constant 0 : index
    %c0_18 = arith.constant 0 : index
    %c0_19 = arith.constant 0 : index
    %23 = vector.load %arg7[%c0_17, %c0_18, %c0_19] : memref<3x512x128xbf16, #tpu.memory_space<vmem>>, vector<1x512x128xbf16>
    %24 = vector.shape_cast %23 : vector<1x512x128xbf16> to vector<512x128xbf16>
    %cst_20 = arith.constant dense<0.000000e+00> : vector<32x128xf32>
    %25 = tpu.matmul %22, %24, %cst_20 {dimension_numbers = #tpu.dot_dimension_numbers<[1], [0], [0], [1], [0, 0, 1, 1], [], []>} : vector<32x512xbf16>, vector<512x128xbf16>, vector<32x128xf32> -> vector<32x128xf32>
    %26 = arith.addf %1, %25 : vector<32x128xf32>
    %c0_21 = arith.constant 0 : index
    %c0_22 = arith.constant 0 : index
    %c0_23 = arith.constant 0 : index
    %27 = vector.load %arg8[%c0_21, %c0_22, %c0_23] : memref<3x1x128xf32, #tpu.memory_space<vmem>>, vector<1x1x128xf32>
    %28 = vector.shape_cast %27 : vector<1x1x128xf32> to vector<1x128xf32>
    %29 = vector.broadcast %28 : vector<1x128xf32> to vector<32x128xf32>
    %30 = arith.addf %26, %29 : vector<32x128xf32>
    %31 = arith.truncf %30 : vector<32x128xf32> to vector<32x128xbf16>
    %c1 = arith.constant 1 : index
    %c0_24 = arith.constant 0 : index
    %c0_25 = arith.constant 0 : index
    %32 = vector.load %arg3[%c1, %c0_24, %c0_25] : memref<3x128x512xbf16, #tpu.memory_space<vmem>>, vector<1x128x512xbf16>
    %33 = vector.shape_cast %32 : vector<1x128x512xbf16> to vector<128x512xbf16>
    %cst_26 = arith.constant dense<0.000000e+00> : vector<32x512xf32>
    %34 = tpu.matmul %31, %33, %cst_26 {dimension_numbers = #tpu.dot_dimension_numbers<[1], [0], [0], [1], [0, 0, 1, 1], [], []>} : vector<32x128xbf16>, vector<128x512xbf16>, vector<32x512xf32> -> vector<32x512xf32>
    %c1_27 = arith.constant 1 : index
    %c0_28 = arith.constant 0 : index
    %c0_29 = arith.constant 0 : index
    %35 = vector.load %arg4[%c1_27, %c0_28, %c0_29] : memref<3x1x512xf32, #tpu.memory_space<vmem>>, vector<1x1x512xf32>
    %36 = vector.shape_cast %35 : vector<1x1x512xf32> to vector<1x512xf32>
    %37 = vector.broadcast %36 : vector<1x512xf32> to vector<32x512xf32>
    %38 = arith.addf %34, %37 : vector<32x512xf32>
    %cst_30 = arith.constant 0.000000e+00 : f32
    %39 = vector.broadcast %cst_30 : f32 to vector<32x512xf32>
    %40 = arith.maximumf %38, %39 : vector<32x512xf32>
    %41 = arith.truncf %40 : vector<32x512xf32> to vector<32x512xbf16>
    %c1_31 = arith.constant 1 : index
    %c0_32 = arith.constant 0 : index
    %c0_33 = arith.constant 0 : index
    %42 = vector.load %arg5[%c1_31, %c0_32, %c0_33] : memref<3x512x512xbf16, #tpu.memory_space<vmem>>, vector<1x512x512xbf16>
    %43 = vector.shape_cast %42 : vector<1x512x512xbf16> to vector<512x512xbf16>
    %cst_34 = arith.constant dense<0.000000e+00> : vector<32x512xf32>
    %44 = tpu.matmul %41, %43, %cst_34 {dimension_numbers = #tpu.dot_dimension_numbers<[1], [0], [0], [1], [0, 0, 1, 1], [], []>} : vector<32x512xbf16>, vector<512x512xbf16>, vector<32x512xf32> -> vector<32x512xf32>
    %c1_35 = arith.constant 1 : index
    %c0_36 = arith.constant 0 : index
    %c0_37 = arith.constant 0 : index
    %45 = vector.load %arg6[%c1_35, %c0_36, %c0_37] : memref<3x1x512xf32, #tpu.memory_space<vmem>>, vector<1x1x512xf32>
    %46 = vector.shape_cast %45 : vector<1x1x512xf32> to vector<1x512xf32>
    %47 = vector.broadcast %46 : vector<1x512xf32> to vector<32x512xf32>
    %48 = arith.addf %44, %47 : vector<32x512xf32>
    %cst_38 = arith.constant 0.000000e+00 : f32
    %49 = vector.broadcast %cst_38 : f32 to vector<32x512xf32>
    %50 = arith.maximumf %48, %49 : vector<32x512xf32>
    %51 = arith.truncf %50 : vector<32x512xf32> to vector<32x512xbf16>
    %c1_39 = arith.constant 1 : index
    %c0_40 = arith.constant 0 : index
    %c0_41 = arith.constant 0 : index
    %52 = vector.load %arg7[%c1_39, %c0_40, %c0_41] : memref<3x512x128xbf16, #tpu.memory_space<vmem>>, vector<1x512x128xbf16>
    %53 = vector.shape_cast %52 : vector<1x512x128xbf16> to vector<512x128xbf16>
    %cst_42 = arith.constant dense<0.000000e+00> : vector<32x128xf32>
    %54 = tpu.matmul %51, %53, %cst_42 {dimension_numbers = #tpu.dot_dimension_numbers<[1], [0], [0], [1], [0, 0, 1, 1], [], []>} : vector<32x512xbf16>, vector<512x128xbf16>, vector<32x128xf32> -> vector<32x128xf32>
    %55 = arith.addf %30, %54 : vector<32x128xf32>
    %c1_43 = arith.constant 1 : index
    %c0_44 = arith.constant 0 : index
    %c0_45 = arith.constant 0 : index
    %56 = vector.load %arg8[%c1_43, %c0_44, %c0_45] : memref<3x1x128xf32, #tpu.memory_space<vmem>>, vector<1x1x128xf32>
    %57 = vector.shape_cast %56 : vector<1x1x128xf32> to vector<1x128xf32>
    %58 = vector.broadcast %57 : vector<1x128xf32> to vector<32x128xf32>
    %59 = arith.addf %55, %58 : vector<32x128xf32>
    %60 = arith.truncf %59 : vector<32x128xf32> to vector<32x128xbf16>
    %c2 = arith.constant 2 : index
    %c0_46 = arith.constant 0 : index
    %c0_47 = arith.constant 0 : index
    %61 = vector.load %arg3[%c2, %c0_46, %c0_47] : memref<3x128x512xbf16, #tpu.memory_space<vmem>>, vector<1x128x512xbf16>
    %62 = vector.shape_cast %61 : vector<1x128x512xbf16> to vector<128x512xbf16>
    %cst_48 = arith.constant dense<0.000000e+00> : vector<32x512xf32>
    %63 = tpu.matmul %60, %62, %cst_48 {dimension_numbers = #tpu.dot_dimension_numbers<[1], [0], [0], [1], [0, 0, 1, 1], [], []>} : vector<32x128xbf16>, vector<128x512xbf16>, vector<32x512xf32> -> vector<32x512xf32>
    %c2_49 = arith.constant 2 : index
    %c0_50 = arith.constant 0 : index
    %c0_51 = arith.constant 0 : index
    %64 = vector.load %arg4[%c2_49, %c0_50, %c0_51] : memref<3x1x512xf32, #tpu.memory_space<vmem>>, vector<1x1x512xf32>
    %65 = vector.shape_cast %64 : vector<1x1x512xf32> to vector<1x512xf32>
    %66 = vector.broadcast %65 : vector<1x512xf32> to vector<32x512xf32>
    %67 = arith.addf %63, %66 : vector<32x512xf32>
    %cst_52 = arith.constant 0.000000e+00 : f32
    %68 = vector.broadcast %cst_52 : f32 to vector<32x512xf32>
    %69 = arith.maximumf %67, %68 : vector<32x512xf32>
    %70 = arith.truncf %69 : vector<32x512xf32> to vector<32x512xbf16>
    %c2_53 = arith.constant 2 : index
    %c0_54 = arith.constant 0 : index
    %c0_55 = arith.constant 0 : index
    %71 = vector.load %arg5[%c2_53, %c0_54, %c0_55] : memref<3x512x512xbf16, #tpu.memory_space<vmem>>, vector<1x512x512xbf16>
    %72 = vector.shape_cast %71 : vector<1x512x512xbf16> to vector<512x512xbf16>
    %cst_56 = arith.constant dense<0.000000e+00> : vector<32x512xf32>
    %73 = tpu.matmul %70, %72, %cst_56 {dimension_numbers = #tpu.dot_dimension_numbers<[1], [0], [0], [1], [0, 0, 1, 1], [], []>} : vector<32x512xbf16>, vector<512x512xbf16>, vector<32x512xf32> -> vector<32x512xf32>
    %c2_57 = arith.constant 2 : index
    %c0_58 = arith.constant 0 : index
    %c0_59 = arith.constant 0 : index
    %74 = vector.load %arg6[%c2_57, %c0_58, %c0_59] : memref<3x1x512xf32, #tpu.memory_space<vmem>>, vector<1x1x512xf32>
    %75 = vector.shape_cast %74 : vector<1x1x512xf32> to vector<1x512xf32>
    %76 = vector.broadcast %75 : vector<1x512xf32> to vector<32x512xf32>
    %77 = arith.addf %73, %76 : vector<32x512xf32>
    %cst_60 = arith.constant 0.000000e+00 : f32
    %78 = vector.broadcast %cst_60 : f32 to vector<32x512xf32>
    %79 = arith.maximumf %77, %78 : vector<32x512xf32>
    %80 = arith.truncf %79 : vector<32x512xf32> to vector<32x512xbf16>
    %c2_61 = arith.constant 2 : index
    %c0_62 = arith.constant 0 : index
    %c0_63 = arith.constant 0 : index
    %81 = vector.load %arg7[%c2_61, %c0_62, %c0_63] : memref<3x512x128xbf16, #tpu.memory_space<vmem>>, vector<1x512x128xbf16>
    %82 = vector.shape_cast %81 : vector<1x512x128xbf16> to vector<512x128xbf16>
    %cst_64 = arith.constant dense<0.000000e+00> : vector<32x128xf32>
    %83 = tpu.matmul %80, %82, %cst_64 {dimension_numbers = #tpu.dot_dimension_numbers<[1], [0], [0], [1], [0, 0, 1, 1], [], []>} : vector<32x512xbf16>, vector<512x128xbf16>, vector<32x128xf32> -> vector<32x128xf32>
    %84 = arith.addf %59, %83 : vector<32x128xf32>
    %c2_65 = arith.constant 2 : index
    %c0_66 = arith.constant 0 : index
    %c0_67 = arith.constant 0 : index
    %85 = vector.load %arg8[%c2_65, %c0_66, %c0_67] : memref<3x1x128xf32, #tpu.memory_space<vmem>>, vector<1x1x128xf32>
    %86 = vector.shape_cast %85 : vector<1x1x128xf32> to vector<1x128xf32>
    %87 = vector.broadcast %86 : vector<1x128xf32> to vector<32x128xf32>
    %88 = arith.addf %84, %87 : vector<32x128xf32>
    %89 = vector.shape_cast %88 : vector<32x128xf32> to vector<2x16x128xf32>
    %cst_68 = arith.constant dense<0xFF800000> : vector<2x128xf32>
    %90 = vector.multi_reduction <maximumf>, %89, %cst_68 [1] : vector<2x16x128xf32> to vector<2x128xf32>
    %c0_i32 = arith.constant 0 : i32
    %91 = arith.cmpi eq, %arg1, %c0_i32 : i32
    %c0_69 = arith.constant 0 : index
    %c0_70 = arith.constant 0 : index
    %92 = vector.load %arg14[%c0_69, %c0_70] : memref<2x128xf32, #tpu.memory_space<vmem>>, vector<2x128xf32>
    %cst_71 = arith.constant 0xFF800000 : f32
    %93 = vector.broadcast %cst_71 : f32 to vector<2x128xf32>
    %94 = arith.select %91, %93, %92 : vector<2x128xf32>
    %95 = arith.maximumf %94, %90 : vector<2x128xf32>
    %c0_72 = arith.constant 0 : index
    %c0_73 = arith.constant 0 : index
    %96 = vector.load %arg14[%c0_72, %c0_73] : memref<2x128xf32, #tpu.memory_space<vmem>>, vector<2x128xf32>
    tpu.vector_store %arg14[%c0_72, %c0_73], %95 {strides = array<i32>} : memref<2x128xf32, #tpu.memory_space<vmem>>, vector<2x128xf32>,
    %c0_i32_74 = arith.constant 0 : i32
    %97 = arith.cmpi eq, %arg1, %c0_i32_74 : i32
    %98 = arith.extui %97 : i1 to i32
    %c0_i32_75 = arith.constant 0 : i32
    %99 = arith.cmpi ne, %98, %c0_i32_75 : i32
    scf.if %99 {
      %c0_76 = arith.constant 0 : index
      %c0_77 = arith.constant 0 : index
      %100 = vector.load %arg14[%c0_76, %c0_77] : memref<2x128xf32, #tpu.memory_space<vmem>>, vector<2x128xf32>
      %cst_78 = arith.constant 0.000000e+00 : f32
      %101 = vector.broadcast %cst_78 : f32 to vector<2x128xf32>
      %102 = arith.maximumf %100, %101 : vector<2x128xf32>
      %103 = arith.truncf %102 : vector<2x128xf32> to vector<2x128xbf16>
      %c0_79 = arith.constant 0 : index
      %c0_80 = arith.constant 0 : index
      %104 = vector.load %arg9[%c0_79, %c0_80] : memref<128x1024xbf16, #tpu.memory_space<vmem>>, vector<128x1024xbf16>
      %cst_81 = arith.constant dense<0.000000e+00> : vector<2x1024xf32>
      %105 = tpu.matmul %103, %104, %cst_81 {dimension_numbers = #tpu.dot_dimension_numbers<[1], [0], [0], [1], [0, 0, 1, 1], [], []>} : vector<2x128xbf16>, vector<128x1024xbf16>, vector<2x1024xf32> -> vector<2x1024xf32>
      %c0_82 = arith.constant 0 : index
      %c0_83 = arith.constant 0 : index
      %106 = vector.load %arg10[%c0_82, %c0_83] : memref<1x1024xf32, #tpu.memory_space<vmem>>, vector<1x1024xf32>
      %107 = vector.broadcast %106 : vector<1x1024xf32> to vector<2x1024xf32>
      %108 = arith.addf %105, %107 : vector<2x1024xf32>
      %cst_84 = arith.constant 0.000000e+00 : f32
      %109 = vector.broadcast %cst_84 : f32 to vector<2x1024xf32>
      %110 = arith.maximumf %108, %109 : vector<2x1024xf32>
      %111 = arith.truncf %110 : vector<2x1024xf32> to vector<2x1024xbf16>
      %c0_85 = arith.constant 0 : index
      %c0_86 = arith.constant 0 : index
      %112 = vector.load %arg11[%c0_85, %c0_86] : memref<1024x384xbf16, #tpu.memory_space<vmem>>, vector<1024x384xbf16>
      %cst_87 = arith.constant dense<0.000000e+00> : vector<2x384xf32>
      %113 = tpu.matmul %111, %112, %cst_87 {dimension_numbers = #tpu.dot_dimension_numbers<[1], [0], [0], [1], [0, 0, 1, 1], [], []>} : vector<2x1024xbf16>, vector<1024x384xbf16>, vector<2x384xf32> -> vector<2x384xf32>
      %c0_88 = arith.constant 0 : index
      %c0_89 = arith.constant 0 : index
      %114 = vector.load %arg12[%c0_88, %c0_89] : memref<1x384xf32, #tpu.memory_space<vmem>>, vector<1x384xf32>
      %115 = vector.broadcast %114 : vector<1x384xf32> to vector<2x384xf32>
      %116 = arith.addf %113, %115 : vector<2x384xf32>
      %117 = vector.shape_cast %116 : vector<2x384xf32> to vector<2x1x384xf32>
      %c0_90 = arith.constant 0 : index
      %c0_91 = arith.constant 0 : index
      %c0_92 = arith.constant 0 : index
      %118 = vector.load %arg13[%c0_90, %c0_91, %c0_92] : memref<2x1x384xf32, #tpu.memory_space<vmem>>, vector<2x1x384xf32>
      tpu.vector_store %arg13[%c0_90, %c0_91, %c0_92], %117 {strides = array<i32>} : memref<2x1x384xf32, #tpu.memory_space<vmem>>, vector<2x1x384xf32>,
    } else {
    }
    return
  }
  func.func @transform_0(%arg0: i32, %arg1: i32) -> (i32, i32, i32) {
    %c0_i32 = arith.constant 0 : i32
    %c0_i32_0 = arith.constant 0 : i32
    return %arg0, %arg1, %c0_i32 : i32, i32, i32
  }
  func.func @transform_1(%arg0: i32, %arg1: i32) -> (i32, i32, i32) {
    %c0_i32 = arith.constant 0 : i32
    %c0_i32_0 = arith.constant 0 : i32
    %c0_i32_1 = arith.constant 0 : i32
    %c0_i32_2 = arith.constant 0 : i32
    return %c0_i32, %c0_i32_0, %c0_i32_1 : i32, i32, i32
  }
  func.func @transform_2(%arg0: i32, %arg1: i32) -> (i32, i32, i32) {
    %c0_i32 = arith.constant 0 : i32
    %c0_i32_0 = arith.constant 0 : i32
    %c0_i32_1 = arith.constant 0 : i32
    %c0_i32_2 = arith.constant 0 : i32
    return %c0_i32, %c0_i32_0, %c0_i32_1 : i32, i32, i32
  }
  func.func @transform_3(%arg0: i32, %arg1: i32) -> (i32, i32, i32) {
    %c0_i32 = arith.constant 0 : i32
    %c0_i32_0 = arith.constant 0 : i32
    %c0_i32_1 = arith.constant 0 : i32
    %c0_i32_2 = arith.constant 0 : i32
    return %c0_i32, %c0_i32_0, %c0_i32_1 : i32, i32, i32
  }
  func.func @transform_4(%arg0: i32, %arg1: i32) -> (i32, i32, i32) {
    %c0_i32 = arith.constant 0 : i32
    %c0_i32_0 = arith.constant 0 : i32
    %c0_i32_1 = arith.constant 0 : i32
    %c0_i32_2 = arith.constant 0 : i32
    return %c0_i32, %c0_i32_0, %c0_i32_1 : i32, i32, i32
  }
  func.func @transform_5(%arg0: i32, %arg1: i32) -> (i32, i32, i32) {
    %c0_i32 = arith.constant 0 : i32
    %c0_i32_0 = arith.constant 0 : i32
    %c0_i32_1 = arith.constant 0 : i32
    %c0_i32_2 = arith.constant 0 : i32
    return %c0_i32, %c0_i32_0, %c0_i32_1 : i32, i32, i32
  }
  func.func @transform_6(%arg0: i32, %arg1: i32) -> (i32, i32, i32) {
    %c0_i32 = arith.constant 0 : i32
    %c0_i32_0 = arith.constant 0 : i32
    %c0_i32_1 = arith.constant 0 : i32
    %c0_i32_2 = arith.constant 0 : i32
    return %c0_i32, %c0_i32_0, %c0_i32_1 : i32, i32, i32
  }
  func.func @transform_7(%arg0: i32, %arg1: i32) -> (i32, i32) {
    %c0_i32 = arith.constant 0 : i32
    %c0_i32_0 = arith.constant 0 : i32
    %c0_i32_1 = arith.constant 0 : i32
    return %c0_i32, %c0_i32_0 : i32, i32
  }
  func.func @transform_8(%arg0: i32, %arg1: i32) -> (i32, i32) {
    %c0_i32 = arith.constant 0 : i32
    %c0_i32_0 = arith.constant 0 : i32
    %c0_i32_1 = arith.constant 0 : i32
    return %c0_i32, %c0_i32_0 : i32, i32
  }
  func.func @transform_9(%arg0: i32, %arg1: i32) -> (i32, i32) {
    %c0_i32 = arith.constant 0 : i32
    %c0_i32_0 = arith.constant 0 : i32
    %c0_i32_1 = arith.constant 0 : i32
    return %c0_i32, %c0_i32_0 : i32, i32
  }
  func.func @transform_10(%arg0: i32, %arg1: i32) -> (i32, i32) {
    %c0_i32 = arith.constant 0 : i32
    %c0_i32_0 = arith.constant 0 : i32
    %c0_i32_1 = arith.constant 0 : i32
    return %c0_i32, %c0_i32_0 : i32, i32
  }
  func.func @transform_11(%arg0: i32, %arg1: i32) -> (i32, i32, i32) {
    %c0_i32 = arith.constant 0 : i32
    %c0_i32_0 = arith.constant 0 : i32
    %c0_i32_1 = arith.constant 0 : i32
    return %arg0, %c0_i32, %c0_i32_0 : i32, i32, i32
  }
}

</mosaic_0001>

<bundles_post_ra>
// kernel: tpu_custom_call.1
= control target key start
LH: loop header
LB: loop body
LE: loop exit
PB: predicated region body
PF: predicated region fallthrough
CT: control target
= control target key end

     0   :  { %16 = vsyncpa [#allocation4], 0  ;;  %s10816_s0 = inlined_call_operand.hbm [shape: f32[2,16,128], index: 0, kind: input, shape index: {}]   ;;  %s10817_s1 = inlined_call_operand.hbm [shape: bf16[3,128,512], index: 1, kind: input, shape index: {}]   ;;  %s10818_s2 = inlined_call_operand.hbm [shape: f32[3,1,512], index: 2, kind: input, shape index: {}]   ;;  %s10819_s3 = inlined_call_operand.hbm [shape: bf16[3,512,512], index: 3, kind: input, shape index: {}]   ;;  %s10820_s4 = inlined_call_operand.hbm [shape: f32[3,1,512], index: 4, kind: input, shape index: {}]   ;;  %s10821_s5 = inlined_call_operand.hbm [shape: bf16[3,512,128], index: 5, kind: input, shape index: {}]   ;;  %s10822_s6 = inlined_call_operand.hbm [shape: f32[3,1,128], index: 6, kind: input, shape index: {}]   ;;  %s10823_s7 = inlined_call_operand.hbm [shape: bf16[128,1024], index: 7, kind: input, shape index: {}]   ;;  %s10824_s8 = inlined_call_operand.hbm [shape: f32[1,1024], index: 8, kind: input, shape index: {}]   ;;  %s10825_s9 = inlined_call_operand.hbm [shape: bf16[1024,384], index: 9, kind: input, shape index: {}]   ;;  %s10826_s10 = inlined_call_operand.hbm [shape: f32[1,384], index: 10, kind: input, shape index: {}]   ;;  %s10827_s11 = inlined_call_operand.hbm [shape: f32[2,1,384], index: 11, kind: output, shape index: {}]  }
   0x1   :  { %17 = vsyncpa [#allocation7], 0 }
   0x2   :  { %18 = vsyncpa [#allocation10], 0 }
   0x3   :  { %19 = vsyncpa [#allocation13], 0 }
   0x4   :  { %20 = vsyncpa [#allocation16], 0 }
   0x5   :  { %21 = vsyncpa [#allocation19], 0 }
   0x6   :  { %22 = vsyncpa [#allocation5], 0  ;;  %s10330_s17 = smov [#allocation6]   ;;  %s10052_s21 = scalar_lea.hbm %s10817_s1, 12288 }
   0x7   :  { %s40_s18 = sshll.u32 %s10330_s17, 4  ;;  %p10053_p0 = scmp.ne.s32.totalorder %s10817_s1, %s10052_s21  ;;  %s41_s18 = int_to_ptr.vmem [resolvable:$true] %s40_s18 }
   0x8   :  { %p10056_p1 = scmp.lt.u32.totalorder %s10052_s21, %s10817_s1 }
   0xa   :  { %p10058_p2 = pnand %p10056_p1, %p10053_p0 }
   0xc   :  { %10061 = shalt.err (!%p10058_p2)
}
   0xd   :  { %s10062_s26 = scalar_lea.vmem %s41_s18, 12288  ;;  %p10067_p4 = scmp.lt.s32.totalorder %s41_s18, %s41_s18 }
   0xe   :  { %p10063_p3 = scmp.ne.s32.totalorder %s41_s18, %s10062_s26  ;;  %p10068_p5 = scmp.lt.s32.totalorder %s10062_s26, %s10062_s26 }
  0x10   :  { %p10069_p6 = por %p10068_p5, %p10067_p4 }
  0x12   :  { %p10070_p7 = pnand %p10069_p6, %p10063_p3 }
  0x14   :  { %10073 = shalt.err (!%p10070_p7)
}
  0x15   :  { %s10331_s27 = smov 256   ;;  %s10332_s28 = smov 16  }
  0x16   :  { %46 = dma.hbm_to_vmem [thread:$0]  %s10817_s1, 12288, %s41_s18, [#allocation7], %s10331_s27, %s10331_s27, %s10332_s28  }
  0x17   :  { %s10333_s12 = smov [#allocation9]   ;;  %s10074_s16 = scalar_lea.hbm %s10819_s3, 49152 }
  0x18   :  { %s64_s13 = sshll.u32 %s10333_s12, 4  ;;  %p10075_p8 = scmp.ne.s32.totalorder %s10819_s3, %s10074_s16  ;;  %s65_s13 = int_to_ptr.vmem [resolvable:$true] %s64_s13 }
  0x19   :  { %p10078_p9 = scmp.lt.u32.totalorder %s10074_s16, %s10819_s3 }
  0x1b   :  { %p10080_p10 = pnand %p10078_p9, %p10075_p8 }
  0x1d   :  { %10083 = shalt.err (!%p10080_p10)
}
  0x1e   :  { %s10084_s22 = scalar_lea.vmem %s65_s13, 49152  ;;  %p10089_p12 = scmp.lt.s32.totalorder %s65_s13, %s65_s13 }
  0x1f   :  { %p10085_p11 = scmp.ne.s32.totalorder %s65_s13, %s10084_s22  ;;  %p10090_p13 = scmp.lt.s32.totalorder %s10084_s22, %s10084_s22 }
  0x21   :  { %p10091_p0 = por %p10090_p13, %p10089_p12 }
  0x23   :  { %p10092_p1 = pnand %p10091_p0, %p10085_p11 }
  0x25   :  { %10095 = shalt.err (!%p10092_p1)
}
  0x26   :  { %70 = dma.hbm_to_vmem [thread:$0]  %s10819_s3, 49152, %s65_s13, [#allocation10], %s10331_s27, %s10331_s27, %s10332_s28  }
  0x27   :  { %s10334_s23 = smov [#allocation12]   ;;  %s10335_s25 = smov [#allocation15]  }
  0x28   :  { %s88_s24 = sshll.u32 %s10334_s23, 4  ;;  %s112_s26 = sshll.u32 %s10335_s25, 4  ;;  %s89_s24 = int_to_ptr.vmem [resolvable:$true] %s88_s24  ;;  %s10443_s26 = int_to_ptr.vmem [resolvable:$true] %s112_s26 }
  0x29   :  { %s10096_s12 = scalar_lea.hbm %s10821_s5, 12288 }
  0x2a   :  { %p10097_p2 = scmp.ne.s32.totalorder %s10821_s5, %s10096_s12  ;;  %p10100_p3 = scmp.lt.u32.totalorder %s10096_s12, %s10821_s5 }
  0x2c   :  { %p10102_p4 = pnand %p10100_p3, %p10097_p2 }
  0x2e   :  { %10105 = shalt.err (!%p10102_p4)
}
  0x2f   :  { %s10106_s3 = scalar_lea.vmem %s89_s24, 12288  ;;  %p10111_p6 = scmp.lt.s32.totalorder %s89_s24, %s89_s24 }
  0x30   :  { %p10107_p5 = scmp.ne.s32.totalorder %s89_s24, %s10106_s3  ;;  %p10112_p7 = scmp.lt.s32.totalorder %s10106_s3, %s10106_s3 }
  0x32   :  { %p10113_p8 = por %p10112_p7, %p10111_p6 }
  0x34   :  { %p10114_p9 = pnand %p10113_p8, %p10107_p5 }
  0x36   :  { %10117 = shalt.err (!%p10114_p9)
}
  0x37   :  { %s10336_s27 = smov 64   ;;  %s10337_s13 = smov 4  }
  0x38   :  { %94 = dma.hbm_to_vmem [thread:$0]  %s10821_s5, 12288, %s89_s24, [#allocation13], %s10336_s27, %s10336_s27, %s10337_s13  }
  0x39   :  { %s10118_s1 = scalar_lea.hbm %s10823_s7, 8192 }
  0x3a   :  { %p10119_p10 = scmp.ne.s32.totalorder %s10823_s7, %s10118_s1  ;;  %p10122_p11 = scmp.lt.u32.totalorder %s10118_s1, %s10823_s7 }
  0x3c   :  { %p10124_p12 = pnand %p10122_p11, %p10119_p10 }
  0x3e   :  { %10127 = shalt.err (!%p10124_p12)
}
  0x3f   :  { %s10128_s30 = scalar_lea.vmem %s10443_s26, 8192  ;;  %p10133_p0 = scmp.lt.s32.totalorder %s10443_s26, %s10443_s26 }
  0x40   :  { %p10129_p13 = scmp.ne.s32.totalorder %s10443_s26, %s10128_s30  ;;  %p10134_p1 = scmp.lt.s32.totalorder %s10128_s30, %s10128_s30 }
  0x42   :  { %p10135_p2 = por %p10134_p1, %p10133_p0 }
  0x44   :  { %p10136_p3 = pnand %p10135_p2, %p10129_p13 }
  0x46   :  { %10139 = shalt.err (!%p10136_p3)
}
  0x47   :  { %s10338_s5 = smov 512   ;;  %s10339_s24 = smov 32  }
  0x48   :  { %118 = dma.hbm_to_vmem [thread:$0]  %s10823_s7, 8192, %s10443_s26, [#allocation16], %s10338_s5, %s10338_s5, %s10339_s24  }
  0x49   :  { %s10340_s15 = smov [#allocation18]   ;;  %s10140_s19 = scalar_lea.hbm %s10825_s9, 24576 }
  0x4a   :  { %s134_s16 = sshll.u32 %s10340_s15, 4  ;;  %p10141_p4 = scmp.ne.s32.totalorder %s10825_s9, %s10140_s19  ;;  %s135_s16 = int_to_ptr.vmem [resolvable:$true] %s134_s16 }
  0x4b   :  { %p10144_p5 = scmp.lt.u32.totalorder %s10140_s19, %s10825_s9 }
  0x4d   :  { %p10146_p6 = pnand %p10144_p5, %p10141_p4 }
  0x4f   :  { %10149 = shalt.err (!%p10146_p6)
}
  0x50   :  { %s10150_s18 = scalar_lea.vmem %s135_s16, 24576  ;;  %p10155_p8 = scmp.lt.s32.totalorder %s135_s16, %s135_s16 }
  0x51   :  { %p10151_p7 = scmp.ne.s32.totalorder %s135_s16, %s10150_s18  ;;  %p10156_p9 = scmp.lt.s32.totalorder %s10150_s18, %s10150_s18 }
  0x53   :  { %p10157_p10 = por %p10156_p9, %p10155_p8 }
  0x55   :  { %p10158_p11 = pnand %p10157_p10, %p10151_p7 }
  0x57   :  { %10161 = shalt.err (!%p10158_p11)
}
  0x58   :  { %s10341_s7 = smov 192   ;;  %s10342_s26 = smov 12  }
  0x59   :  { %140 = dma.hbm_to_vmem [thread:$0]  %s10825_s9, 24576, %s135_s16, [#allocation19], %s10341_s7, %s10341_s7, %s10342_s26  }
  0x5a   :  { %s10343_s29 = smov [#allocation3]   ;;  %s10162_s12 = scalar_lea.hbm %s10816_s0, 512 }
  0x5b   :  { %s28_s30 = sshll.u32 %s10343_s29, 4  ;;  %p10163_p12 = scmp.ne.s32.totalorder %s10816_s0, %s10162_s12  ;;  %s29_s30 = int_to_ptr.vmem [resolvable:$true] %s28_s30 }
  0x5c   :  { %p10166_p13 = scmp.lt.u32.totalorder %s10162_s12, %s10816_s0 }
  0x5e   :  { %p10168_p0 = pnand %p10166_p13, %p10163_p12 }
  0x60   :  { %10171 = shalt.err (!%p10168_p0)
}
  0x61   :  { %s10172_s19 = scalar_lea.vmem %s29_s30, 512  ;;  %p10177_p2 = scmp.lt.s32.totalorder %s29_s30, %s29_s30 }
  0x62   :  { %p10173_p1 = scmp.ne.s32.totalorder %s29_s30, %s10172_s19  ;;  %p10178_p3 = scmp.lt.s32.totalorder %s10172_s19, %s10172_s19 }
  0x64   :  { %p10179_p4 = por %p10178_p3, %p10177_p2 }
  0x66   :  { %p10180_p5 = pnand %p10179_p4, %p10173_p1 }
  0x68   :  { %10183 = shalt.err (!%p10180_p5)
}
  0x69   :  { %s10344_s9 = smov 128   ;;  %s10345_s16 = smov 8  }
  0x6a   :  { %34 = dma.hbm_to_vmem [thread:$0]  %s10816_s0, 512, %s29_s30, [#allocation4], %s10344_s9, %s10344_s9, %s10345_s16  }
  0x6b   :  { %s10346_s22 = smov [#allocation8]   ;;  %s10347_s18 = smov [#allocation11]  }
  0x6c   :  { %s52_s1 = sshll.u32 %s10346_s22, 4  ;;  %s76_s7 = sshll.u32 %s10347_s18, 4  ;;  %s53_s1 = int_to_ptr.vmem [resolvable:$true] %s52_s1  ;;  %s10501_s7 = int_to_ptr.vmem [resolvable:$true] %s76_s7 }
  0x6d   :  { %s10184_s25 = scalar_lea.hbm %s10818_s2, 192 }
  0x6e   :  { %p10185_p6 = scmp.ne.s32.totalorder %s10818_s2, %s10184_s25  ;;  %p10188_p7 = scmp.lt.u32.totalorder %s10184_s25, %s10818_s2 }
  0x70   :  { %p10190_p8 = pnand %p10188_p7, %p10185_p6 }
  0x72   :  { %10193 = shalt.err (!%p10190_p8)
}
  0x73   :  { %s10194_s0 = scalar_lea.vmem %s53_s1, 192  ;;  %p10199_p10 = scmp.lt.s32.totalorder %s53_s1, %s53_s1 }
  0x74   :  { %p10195_p9 = scmp.ne.s32.totalorder %s53_s1, %s10194_s0  ;;  %p10200_p11 = scmp.lt.s32.totalorder %s10194_s0, %s10194_s0 }
  0x76   :  { %p10201_p12 = por %p10200_p11, %p10199_p10 }
  0x78   :  { %p10202_p13 = pnand %p10201_p12, %p10195_p9 }
  0x7a   :  { %10205 = shalt.err (!%p10202_p13)
}
  0x7b   :  { %58 = dma.hbm_to_vmem [thread:$0]  %s10818_s2, 192, %s53_s1, [#allocation7], %s10336_s27, %s10336_s27, %s10337_s13  }
  0x7c   :  { %s10206_s3 = scalar_lea.hbm %s10820_s4, 192 }
  0x7d   :  { %p10207_p0 = scmp.ne.s32.totalorder %s10820_s4, %s10206_s3  ;;  %p10210_p1 = scmp.lt.u32.totalorder %s10206_s3, %s10820_s4 }
  0x7f   :  { %p10212_p2 = pnand %p10210_p1, %p10207_p0 }
  0x81   :  { %10215 = shalt.err (!%p10212_p2)
}
  0x82   :  { %s10216_s21 = scalar_lea.vmem %s10501_s7, 192  ;;  %p10221_p4 = scmp.lt.s32.totalorder %s10501_s7, %s10501_s7 }
  0x83   :  { %p10217_p3 = scmp.ne.s32.totalorder %s10501_s7, %s10216_s21  ;;  %p10222_p5 = scmp.lt.s32.totalorder %s10216_s21, %s10216_s21 }
  0x85   :  { %p10223_p6 = por %p10222_p5, %p10221_p4 }
  0x87   :  { %p10224_p7 = pnand %p10223_p6, %p10217_p3 }
  0x89   :  { %10227 = shalt.err (!%p10224_p7)
}
  0x8a   :  { %82 = dma.hbm_to_vmem [thread:$0]  %s10820_s4, 192, %s10501_s7, [#allocation10], %s10336_s27, %s10336_s27, %s10337_s13  }
  0x8b   :  { %s10348_s1 = smov [#allocation14]   ;;  %s10349_s26 = smov [#allocation17]  }
  0x8c   :  { %s100_s18 = sshll.u32 %s10348_s1, 4  ;;  %s125_s23 = sshll.u32 %s10349_s26, 4  ;;  %s101_s18 = int_to_ptr.vmem [resolvable:$true] %s100_s18  ;;  %s126_s23 = int_to_ptr.vmem [resolvable:$true] %s125_s23 }
  0x8d   :  { %s10228_s5 = scalar_lea.hbm %s10822_s6, 48 }
  0x8e   :  { %p10229_p8 = scmp.ne.s32.totalorder %s10822_s6, %s10228_s5  ;;  %p10232_p9 = scmp.lt.u32.totalorder %s10228_s5, %s10822_s6 }
  0x90   :  { %p10234_p10 = pnand %p10232_p9, %p10229_p8 }
  0x92   :  { %10237 = shalt.err (!%p10234_p10)
}
  0x93   :  { %s10238_s4 = scalar_lea.vmem %s101_s18, 48  ;;  %s10242_s27 = scalar_lea.vmem %s101_s18, 64 }
  0x94   :  { %p10239_p11 = scmp.ne.s32.totalorder %s101_s18, %s10238_s4  ;;  %p10243_p12 = scmp.lt.s32.totalorder %s101_s18, %s101_s18 }
  0x95   :  { %p10244_p13 = scmp.lt.s32.totalorder %s10242_s27, %s10238_s4 }
  0x97   :  { %p10245_p0 = por %p10244_p13, %p10243_p12 }
  0x99   :  { %p10246_p1 = pnand %p10245_p0, %p10239_p11 }
  0x9b   :  { %10249 = shalt.err (!%p10246_p1)
}
  0x9c   :  { %s10350_s13 = smov 1   ;;  %s10250_s3 = scalar_lea.hbm %s10824_s8, 128 }
  0x9d   :  { %106 = dma.hbm_to_vmem [thread:$0]  %s10822_s6, 48, %s101_s18, [#allocation13], %s10332_s28, %s10332_s28, %s10350_s13  }
  0x9e   :  { %p10251_p2 = scmp.ne.s32.totalorder %s10824_s8, %s10250_s3  ;;  %p10254_p3 = scmp.lt.u32.totalorder %s10250_s3, %s10824_s8 }
  0xa0   :  { %p10256_p4 = pnand %p10254_p3, %p10251_p2 }
  0xa2   :  { %10259 = shalt.err (!%p10256_p4)
}
  0xa3   :  { %s10260_s21 = scalar_lea.vmem %s126_s23, 128  ;;  %p10265_p6 = scmp.lt.s32.totalorder %s126_s23, %s126_s23 }
  0xa4   :  { %p10261_p5 = scmp.ne.s32.totalorder %s126_s23, %s10260_s21  ;;  %p10266_p7 = scmp.lt.s32.totalorder %s10260_s21, %s10260_s21 }
  0xa6   :  { %p10267_p8 = por %p10266_p7, %p10265_p6 }
  0xa8   :  { %p10268_p9 = pnand %p10267_p8, %p10261_p5 }
  0xaa   :  { %10271 = shalt.err (!%p10268_p9)
}
  0xab   :  { %128 = dma.hbm_to_vmem [thread:$0]  %s10824_s8, 128, %s126_s23, [#allocation16]  }
  0xac   :  { %s10351_s2 = smov [#allocation20]   ;;  %s10272_s26 = scalar_lea.hbm %s10826_s10, 48 }
  0xad   :  { %s147_s22 = sshll.u32 %s10351_s2, 4  ;;  %p10273_p10 = scmp.ne.s32.totalorder %s10826_s10, %s10272_s26  ;;  %s148_s22 = int_to_ptr.vmem [resolvable:$true] %s147_s22 }
  0xae   :  { %p10276_p11 = scmp.lt.u32.totalorder %s10272_s26, %s10826_s10 }
  0xb0   :  { %p10278_p12 = pnand %p10276_p11, %p10273_p10 }
  0xb2   :  { %10281 = shalt.err (!%p10278_p12)
}
  0xb3   :  { %s10282_s12 = scalar_lea.vmem %s148_s22, 48  ;;  %s10286_s8 = scalar_lea.vmem %s148_s22, 64 }
  0xb4   :  { %p10283_p13 = scmp.ne.s32.totalorder %s148_s22, %s10282_s12  ;;  %p10287_p0 = scmp.lt.s32.totalorder %s148_s22, %s148_s22 }
  0xb5   :  { %p10288_p1 = scmp.lt.s32.totalorder %s10286_s8, %s10282_s12 }
  0xb7   :  { %p10289_p2 = por %p10288_p1, %p10287_p0 }
  0xb9   :  { %p10290_p3 = pnand %p10289_p2, %p10283_p13 }
  0xbb   :  { %10293 = shalt.err (!%p10290_p3)
}
  0xbc   :  { %150 = dma.hbm_to_vmem [thread:$0]  %s10826_s10, 48, %s148_s22, [#allocation19]  }
  0xbd   :  { %10316 = dma.done.wait [#allocation4], 512  }
  0xbe   :  { %10317 = vsyncadd [#allocation4], 4294966784 }
  0xbf   :  { %10318 = dma.done.wait [#allocation7], 12480  }
  0xc0   :  { %10319 = vsyncadd [#allocation7], 4294954816 }
  0xc1   :  { %10320 = dma.done.wait [#allocation10], 49344  }
  0xc2   :  { %10321 = vsyncadd [#allocation10], 4294917952 }
  0xc3   :  { %10322 = dma.done.wait [#allocation13], 12336  }
  0xc4   :  { %10323 = vsyncadd [#allocation13], 4294954960 }
  0xc5   :  { %10324 = dma.done.wait [#allocation16], 8320  }
  0xc6   :  { %10325 = vsyncadd [#allocation16], 4294958976 }
  0xc7   :  { %10326 = dma.done.wait [#allocation19], 24624  }
  0xc8   :  { %10327 = vsyncadd [#allocation19], 4294942672  ;;  %v10352_v0 = vmov 0   ;;  %v8976_v1 = vld [vmem:[#allocation6 + $0x4] ss:$16 sps:$4 sm:$0xff]   ;;  %v186_v33 = vld [vmem:[#allocation3 + $0x8] sm:$0xff] }
  0xc9   :  { %437 = vmatprep.mubr.bf16.mxu0 %v10352_v0  ;;  %490 = vmatprep.mubr.bf16.mxu1 %v10352_v0  ;;  %v8978_v2 = vld [vmem:[#allocation6] ss:$16 sps:$4 sm:$0xff]   ;;  %v8979_v3 = vld [vmem:[#allocation6 + $0xc] ss:$16 sps:$4 sm:$0xff]   ;;  %v8981_v4 = vld [vmem:[#allocation6 + $0x8] ss:$16 sps:$4 sm:$0xff]  }
  0xca   :  { %405 = vmatprep.subr.bf16.mxu0 %v8976_v1  ;;  %v8982_v5 = vld [vmem:[#allocation6 + $0x24] ss:$16 sps:$4 sm:$0xff]   ;;  %v8984_v6 = vld [vmem:[#allocation6 + $0x20] ss:$16 sps:$4 sm:$0xff]   ;;  %458 = vmatprep.subr.bf16.mxu1 %v8979_v3  ;;  %v8985_v7 = vld [vmem:[#allocation6 + $0x2c] ss:$16 sps:$4 sm:$0xff]  }
  0xcb   :  { %406 = vmatpush1.bf16.msra.mxu0 %v8978_v2  ;;  %459 = vmatpush1.bf16.msra.mxu1 %v8981_v4  ;;  %v8987_v8 = vld [vmem:[#allocation6 + $0x28] ss:$16 sps:$4 sm:$0xff]   ;;  %v8988_v9 = vld [vmem:[#allocation6 + $0x44] ss:$16 sps:$4 sm:$0xff]   ;;  %v8990_v10 = vld [vmem:[#allocation6 + $0x40] ss:$16 sps:$4 sm:$0xff]  }
  0xcc   :  { %407 = vmatprep.subr.bf16.mxu0 %v8982_v5  ;;  %460 = vmatprep.subr.bf16.mxu1 %v8985_v7  ;;  %v8991_v11 = vld [vmem:[#allocation6 + $0x4c] ss:$16 sps:$4 sm:$0xff]   ;;  %v8994_v12 = vld [vmem:[#allocation6 + $0x64] ss:$16 sps:$4 sm:$0xff]   ;;  %v8993_v13 = vld [vmem:[#allocation6 + $0x48] ss:$16 sps:$4 sm:$0xff]  }
  0xcd   :  { %v8997_v14 = vld [vmem:[#allocation6 + $0x6c] ss:$16 sps:$4 sm:$0xff]   ;;  %v8996_v15 = vld [vmem:[#allocation6 + $0x60] ss:$16 sps:$4 sm:$0xff]   ;;  %v9000_v16 = vld [vmem:[#allocation6 + $0x84] ss:$16 sps:$4 sm:$0xff]  }
  0xce   :  { %v8999_v17 = vld [vmem:[#allocation6 + $0x68] ss:$16 sps:$4 sm:$0xff]   ;;  %v9003_v18 = vld [vmem:[#allocation6 + $0x8c] ss:$16 sps:$4 sm:$0xff]   ;;  %v9002_v19 = vld [vmem:[#allocation6 + $0x80] ss:$16 sps:$4 sm:$0xff]  }
  0xcf   :  { %408 = vmatpush1.bf16.msra.mxu0 %v8984_v6  ;;  %461 = vmatpush1.bf16.msra.mxu1 %v8987_v8  ;;  %v9006_v20 = vld [vmem:[#allocation6 + $0xa4] ss:$16 sps:$4 sm:$0xff]   ;;  %v9005_v21 = vld [vmem:[#allocation6 + $0x88] ss:$16 sps:$4 sm:$0xff]   ;;  %v9009_v22 = vld [vmem:[#allocation6 + $0xac] ss:$16 sps:$4 sm:$0xff]  }
  0xd0   :  { %409 = vmatprep.subr.bf16.mxu0 %v8988_v9  ;;  %462 = vmatprep.subr.bf16.mxu1 %v8991_v11  ;;  %v9008_v23 = vld [vmem:[#allocation6 + $0xa0] ss:$16 sps:$4 sm:$0xff]   ;;  %v9012_v24 = vld [vmem:[#allocation6 + $0xc4] ss:$16 sps:$4 sm:$0xff]   ;;  %v9011_v25 = vld [vmem:[#allocation6 + $0xa8] ss:$16 sps:$4 sm:$0xff]  }
  0xd1   :  { %v9015_v26 = vld [vmem:[#allocation6 + $0xcc] ss:$16 sps:$4 sm:$0xff]   ;;  %v9014_v27 = vld [vmem:[#allocation6 + $0xc0] ss:$16 sps:$4 sm:$0xff]   ;;  %v9018_v28 = vld [vmem:[#allocation6 + $0xe4] ss:$16 sps:$4 sm:$0xff]  }
  0xd2   :  { %v9017_v29 = vld [vmem:[#allocation6 + $0xc8] ss:$16 sps:$4 sm:$0xff]   ;;  %v9020_v30 = vld [vmem:[#allocation6 + $0xe0] ss:$16 sps:$4 sm:$0xff]   ;;  %v9021_v31 = vld [vmem:[#allocation6 + $0xec] ss:$16 sps:$4 sm:$0xff]  }
  0xd3   :  { %410 = vmatpush1.bf16.msra.mxu0 %v8990_v10  ;;  %463 = vmatpush1.bf16.msra.mxu1 %v8993_v13  ;;  %v185_v32 = vld [vmem:[#allocation3] sm:$0xff]  ;;  %v9023_v35 = vld [vmem:[#allocation6 + $0xe8] ss:$16 sps:$4 sm:$0xff]   ;;  %v9027_v38 = vld [vmem:[#allocation9 + $0x200] ss:$16 sps:$4 sm:$0xff]   ;;  %vm5446_vm0 = vcmask 1041409  }
  0xd4   :  { %411 = vmatprep.subr.bf16.mxu0 %v8994_v12  ;;  %464 = vmatprep.subr.bf16.mxu1 %v8997_v14  ;;  %v9029_v34 = vld [vmem:[#allocation9 + $0x204] ss:$16 sps:$4 sm:$0xff]   ;;  %v189_v36 = vpack.c.bf16 %v186_v33, %v185_v32  ;;  %v9024_v40 = vld [vmem:[#allocation9] ss:$16 sps:$4 sm:$0xff]   ;;  %s10354_s10 = smov [#allocation21]  }
  0xd5   :  { %v9026_v37 = vld [vmem:[#allocation9 + $0x4] ss:$16 sps:$4 sm:$0xff]   ;;  %v188_v43 = vld [vmem:[#allocation3 + $0x18] sm:$0xff]  ;;  %s7731_s30 = sshll.u32 %s10354_s10, 4  ;;  %s7732_s30 = int_to_ptr.vmem [resolvable:$true] %s7731_s30 }
  0xd6   :  { %v9035_v39 = vld [vmem:[#allocation9 + $0x224] ss:$16 sps:$4 sm:$0xff]   ;;  %v9033_v44 = vld [vmem:[#allocation9 + $0x220] ss:$16 sps:$4 sm:$0xff]   ;;  %s10294_s4 = scalar_lea.vmem %s7732_s30, 96  ;;  %p10299_p5 = scmp.lt.s32.totalorder %s7732_s30, %s7732_s30 }
  0xd7   :  { %412 = vmatpush1.bf16.msra.mxu0 %v8996_v15  ;;  %465 = vmatpush1.bf16.msra.mxu1 %v8999_v17  ;;  %v187_v41 = vld [vmem:[#allocation3 + $0x10] sm:$0xff]  ;;  %v9030_v46 = vld [vmem:[#allocation9 + $0x20] ss:$16 sps:$4 sm:$0xff]   ;;  %p10295_p4 = scmp.ne.s32.totalorder %s7732_s30, %s10294_s4  ;;  %p10300_p6 = scmp.lt.s32.totalorder %s10294_s4, %s10294_s4 }
  0xd8   :  { %413 = vmatprep.subr.bf16.mxu0 %v9000_v16  ;;  %466 = vmatprep.subr.bf16.mxu1 %v9003_v18  ;;  %v9032_v42 = vld [vmem:[#allocation9 + $0x24] ss:$16 sps:$4 sm:$0xff]   ;;  %v190_v47 = vpack.c.bf16 %v188_v43, %v187_v41  ;;  %v9039_v49 = vld [vmem:[#allocation9 + $0x240] ss:$16 sps:$4 sm:$0xff]   ;;  %v225_v41 = vlaneseq }
  0xd9   :  { %v9041_v45 = vld [vmem:[#allocation9 + $0x244] ss:$16 sps:$4 sm:$0xff]   ;;  %v9036_v51 = vld [vmem:[#allocation9 + $0x40] ss:$16 sps:$4 sm:$0xff]   ;;  %p10301_p7 = por %p10300_p6, %p10299_p5 }
  0xda   :  { %v9038_v48 = vld [vmem:[#allocation9 + $0x44] ss:$16 sps:$4 sm:$0xff]   ;;  %v9045_v53 = vld [vmem:[#allocation9 + $0x260] ss:$16 sps:$4 sm:$0xff]   ;;  %vm7722_vm1 = vcmp.lt.s32.totalorder %v225_v41, 384 }
  0xdb   :  { %414 = vmatpush1.bf16.msra.mxu0 %v9002_v19  ;;  %467 = vmatpush1.bf16.msra.mxu1 %v9005_v21  ;;  %v9047_v50 = vld [vmem:[#allocation9 + $0x264] ss:$16 sps:$4 sm:$0xff]   ;;  %v9042_v55 = vld [vmem:[#allocation9 + $0x60] ss:$16 sps:$4 sm:$0xff]   ;;  %p10302_p8 = pnand %p10301_p7, %p10295_p4 }
  0xdc   :  { %415 = vmatprep.subr.bf16.mxu0 %v9006_v20  ;;  %468 = vmatprep.subr.bf16.mxu1 %v9009_v22  ;;  %v9044_v52 = vld [vmem:[#allocation9 + $0x64] ss:$16 sps:$4 sm:$0xff]   ;;  %v9051_v57 = vld [vmem:[#allocation9 + $0x280] ss:$16 sps:$4 sm:$0xff]  }
  0xdd   :  { %v9053_v54 = vld [vmem:[#allocation9 + $0x284] ss:$16 sps:$4 sm:$0xff]   ;;  %v9048_v59 = vld [vmem:[#allocation9 + $0x80] ss:$16 sps:$4 sm:$0xff]  }
  0xde   :  { %v9050_v56 = vld [vmem:[#allocation9 + $0x84] ss:$16 sps:$4 sm:$0xff]   ;;  %v9057_v61 = vld [vmem:[#allocation9 + $0x2a0] ss:$16 sps:$4 sm:$0xff]  }
  0xdf   :  { %416 = vmatpush1.bf16.msra.mxu0 %v9008_v23  ;;  %469 = vmatpush1.bf16.msra.mxu1 %v9011_v25  ;;  %v9059_v58 = vld [vmem:[#allocation9 + $0x2a4] ss:$16 sps:$4 sm:$0xff]   ;;  %v9054_v63 = vld [vmem:[#allocation9 + $0xa0] ss:$16 sps:$4 sm:$0xff]  }
  0xe0   :  { %417 = vmatprep.subr.bf16.mxu0 %v9012_v24  ;;  %470 = vmatprep.subr.bf16.mxu1 %v9015_v26  ;;  %v9056_v60 = vld [vmem:[#allocation9 + $0xa4] ss:$16 sps:$4 sm:$0xff]   ;;  %v9063_v2 = vld [vmem:[#allocation9 + $0x2c0] ss:$16 sps:$4 sm:$0xff]  }
  0xe1   :  { %v9065_v62 = vld [vmem:[#allocation9 + $0x2c4] ss:$16 sps:$4 sm:$0xff]   ;;  %v9060_v4 = vld [vmem:[#allocation9 + $0xc0] ss:$16 sps:$4 sm:$0xff]  }
  0xe2   :  { %v9062_v1 = vld [vmem:[#allocation9 + $0xc4] ss:$16 sps:$4 sm:$0xff]   ;;  %v9069_v6 = vld [vmem:[#allocation9 + $0x2e0] ss:$16 sps:$4 sm:$0xff]  }
  0xe3   :  { %418 = vmatpush1.bf16.msra.mxu0 %v9014_v27  ;;  %471 = vmatpush1.bf16.msra.mxu1 %v9017_v29  ;;  %v9071_v3 = vld [vmem:[#allocation9 + $0x2e4] ss:$16 sps:$4 sm:$0xff]   ;;  %v9066_v8 = vld [vmem:[#allocation9 + $0xe0] ss:$16 sps:$4 sm:$0xff]  }
  0xe4   :  { %419 = vmatprep.subr.bf16.mxu0 %v9018_v28  ;;  %472 = vmatprep.subr.bf16.mxu1 %v9021_v31  ;;  %v9068_v5 = vld [vmem:[#allocation9 + $0xe4] ss:$16 sps:$4 sm:$0xff]   ;;  %v9075_v10 = vld [vmem:[#allocation9 + $0x300] ss:$16 sps:$4 sm:$0xff]  }
  0xe5   :  { %v9077_v7 = vld [vmem:[#allocation9 + $0x304] ss:$16 sps:$4 sm:$0xff]   ;;  %v9072_v12 = vld [vmem:[#allocation9 + $0x100] ss:$16 sps:$4 sm:$0xff]  }
  0xe6   :  { %v9074_v9 = vld [vmem:[#allocation9 + $0x104] ss:$16 sps:$4 sm:$0xff]   ;;  %v9081_v14 = vld [vmem:[#allocation9 + $0x320] ss:$16 sps:$4 sm:$0xff]  }
  0xe7   :  { %420 = vmatpush1.bf16.msra.mxu0 %v9020_v30  ;;  %473 = vmatpush1.bf16.msra.mxu1 %v9023_v35  ;;  %v9083_v11 = vld [vmem:[#allocation9 + $0x324] ss:$16 sps:$4 sm:$0xff]   ;;  %v9078_v16 = vld [vmem:[#allocation9 + $0x120] ss:$16 sps:$4 sm:$0xff]  }
  0xe8   :  { %1378 = vmatprep.subr.bf16.mxu0 %v9029_v34  ;;  %1325 = vmatprep.subr.bf16.mxu1 %v9026_v37  ;;  %v9080_v13 = vld [vmem:[#allocation9 + $0x124] ss:$16 sps:$4 sm:$0xff]   ;;  %v9087_v18 = vld [vmem:[#allocation9 + $0x340] ss:$16 sps:$4 sm:$0xff]  }
  0xe9   :  { %v9089_v15 = vld [vmem:[#allocation9 + $0x344] ss:$16 sps:$4 sm:$0xff]   ;;  %v9084_v20 = vld [vmem:[#allocation9 + $0x140] ss:$16 sps:$4 sm:$0xff]  }
  0xea   :  { %438 = vmatmul.mubr.bf16.vlgmr.msra.gmra.mrb[0].mxu0 %v189_v36  ;;  %491 = vmatmul.mubr.bf16.vlgmr.msra.gmra.mrb[0].mxu1 %v189_v36  ;;  %v9086_v17 = vld [vmem:[#allocation9 + $0x144] ss:$16 sps:$4 sm:$0xff]   ;;  %v9093_v22 = vld [vmem:[#allocation9 + $0x360] ss:$16 sps:$4 sm:$0xff]  }
  0xeb   :  { %447 = vmatprep.mubr.bf16.mxu0 %v10352_v0  ;;  %1379 = vmatpush1.bf16.msra.mxu0 %v9027_v38  ;;  %v9095_v19 = vld [vmem:[#allocation9 + $0x364] ss:$16 sps:$4 sm:$0xff]   ;;  %v9090_v24 = vld [vmem:[#allocation9 + $0x160] ss:$16 sps:$4 sm:$0xff]  }
  0xec   :  { %1380 = vmatprep.subr.bf16.mxu0 %v9035_v39  ;;  %500 = vmatprep.mubr.bf16.mxu1 %v10352_v0  ;;  %v9092_v21 = vld [vmem:[#allocation9 + $0x164] ss:$16 sps:$4 sm:$0xff]   ;;  %v9099_v26 = vld [vmem:[#allocation9 + $0x380] ss:$16 sps:$4 sm:$0xff]  }
  0xed   :  { %1326 = vmatpush1.bf16.msra.mxu1 %v9024_v40  ;;  %v9101_v23 = vld [vmem:[#allocation9 + $0x384] ss:$16 sps:$4 sm:$0xff]   ;;  %v9096_v27 = vld [vmem:[#allocation9 + $0x180] ss:$16 sps:$4 sm:$0xff]   ;;  %v9122_v40 = vld [vmem:[#allocation9 + $0xc] ss:$16 sps:$4 sm:$0xff]  }
  0xee   :  { %1327 = vmatprep.subr.bf16.mxu1 %v9032_v42  ;;  %v9098_v25 = vld [vmem:[#allocation9 + $0x184] ss:$16 sps:$4 sm:$0xff]   ;;  %v9102_v29 = vld [vmem:[#allocation9 + $0x1a0] ss:$16 sps:$4 sm:$0xff]   ;;  %v10581_v42 = vshrl.u32 %v225_v41, 7 }
  0xef   :  { %1381 = vmatpush1.bf16.msra.mxu0 %v9033_v44  ;;  %v9104_v28 = vld [vmem:[#allocation9 + $0x1a4] ss:$16 sps:$4 sm:$0xff]   ;;  %v9105_v31 = vld [vmem:[#allocation9 + $0x3a0] ss:$16 sps:$4 sm:$0xff]  }
  0xf0   :  { %1382 = vmatprep.subr.bf16.mxu0 %v9041_v45  ;;  %v9107_v30 = vld [vmem:[#allocation9 + $0x3a4] ss:$16 sps:$4 sm:$0xff]   ;;  %v9108_v33 = vld [vmem:[#allocation9 + $0x1c0] ss:$16 sps:$4 sm:$0xff]   ;;  %v10584_v44 = vsub.s32 0, %v10581_v42  ;;  %v10587_v45 = vsub.s32 1, %v10581_v42 }
  0xf1   :  { %1328 = vmatpush1.bf16.msra.mxu1 %v9030_v46  ;;  %v9110_v32 = vld [vmem:[#allocation9 + $0x1c4] ss:$16 sps:$4 sm:$0xff]   ;;  %v9111_v35 = vld [vmem:[#allocation9 + $0x3c0] ss:$16 sps:$4 sm:$0xff]   ;;  %v10590_v46 = vsub.s32 2, %v10581_v42 }
  0xf2   :  { %448 = vmatmul.mubr.bf16.gmra.mrb[4].mxu0 %v190_v47  ;;  %1329 = vmatprep.subr.bf16.mxu1 %v9038_v48  ;;  %v9113_v34 = vld [vmem:[#allocation9 + $0x3c4] ss:$16 sps:$4 sm:$0xff]   ;;  %v9114_v37 = vld [vmem:[#allocation9 + $0x1e0] ss:$16 sps:$4 sm:$0xff]  }
  0xf3   :  { %1383 = vmatpush1.bf16.msra.mxu0 %v9039_v49  ;;  %501 = vmatmul.mubr.bf16.gmra.mrb[4].mxu1 %v190_v47  ;;  %v9116_v36 = vld [vmem:[#allocation9 + $0x1e4] ss:$16 sps:$4 sm:$0xff]   ;;  %v9117_v39 = vld [vmem:[#allocation9 + $0x3e0] ss:$16 sps:$4 sm:$0xff]   ;;  %v10593_v47 = vsub.s32 3, %v10581_v42 }
  0xf4   :  { %1384 = vmatprep.subr.bf16.mxu0 %v9047_v50  ;;  %v9119_v38 = vld [vmem:[#allocation9 + $0x3e4] ss:$16 sps:$4 sm:$0xff]  }
  0xf5   :  { %1330 = vmatpush1.bf16.msra.mxu1 %v9036_v51  ;;  %v223_v43 = vld [vmem:[#allocation8] sm:$0xf] }
  0xf6   :  { %1331 = vmatprep.subr.bf16.mxu1 %v9044_v52  ;;  %v228_v48 = vrot.slane %v223_v43, %v10584_v44  ;;  %v232_v49 = vrot.slane %v223_v43, %v10587_v45  ;;  %v236_v50 = vrot.slane %v223_v43, %v10590_v46  ;;  %v240_v52 = vrot.slane %v223_v43, %v10593_v47  ;;  %v9126_v43 = vld [vmem:[#allocation9 + $0x48] ss:$16 sps:$4 sm:$0xff]  }
  0xf7   :  { %1385 = vmatpush1.bf16.msra.mxu0 %v9045_v53 }
  0xf8   :  { %1386 = vmatprep.subr.bf16.mxu0 %v9053_v54 }
  0xf9   :  { %1332 = vmatpush1.bf16.msra.mxu1 %v9042_v55 }
  0xfa   :  { %1333 = vmatprep.subr.bf16.mxu1 %v9050_v56 }
  0xfb   :  { %1387 = vmatpush1.bf16.msra.mxu0 %v9051_v57 }
  0xfc   :  { %1388 = vmatprep.subr.bf16.mxu0 %v9059_v58 }
  0xfd   :  { %1334 = vmatpush1.bf16.msra.mxu1 %v9048_v59 }
  0xfe   :  { %1335 = vmatprep.subr.bf16.mxu1 %v9056_v60 }
  0xff   :  { %1389 = vmatpush1.bf16.msra.mxu0 %v9057_v61 }
 0x100   :  { %1390 = vmatprep.subr.bf16.mxu0 %v9065_v62 }
 0x101   :  { %1336 = vmatpush1.bf16.msra.mxu1 %v9054_v63 }
 0x102   :  { %1337 = vmatprep.subr.bf16.mxu1 %v9062_v1 }
 0x103   :  { %1391 = vmatpush1.bf16.msra.mxu0 %v9063_v2 }
 0x104   :  { %1392 = vmatprep.subr.bf16.mxu0 %v9071_v3 }
 0x105   :  { %1338 = vmatpush1.bf16.msra.mxu1 %v9060_v4 }
 0x106   :  { %1339 = vmatprep.subr.bf16.mxu1 %v9068_v5 }
 0x107   :  { %1393 = vmatpush1.bf16.msra.mxu0 %v9069_v6 }
 0x108   :  { %1394 = vmatprep.subr.bf16.mxu0 %v9077_v7 }
 0x109   :  { %1340 = vmatpush1.bf16.msra.mxu1 %v9066_v8 }
 0x10a   :  { %1341 = vmatprep.subr.bf16.mxu1 %v9074_v9 }
 0x10b   :  { %1395 = vmatpush1.bf16.msra.mxu0 %v9075_v10 }
 0x10c   :  { %1396 = vmatprep.subr.bf16.mxu0 %v9083_v11  ;;  %v9120_v11 = vld [vmem:[#allocation9 + $0x8] ss:$16 sps:$4 sm:$0xff]  }
 0x10d   :  { %1342 = vmatpush1.bf16.msra.mxu1 %v9072_v12 }
 0x10e   :  { %1343 = vmatprep.subr.bf16.mxu1 %v9080_v13 }
 0x10f   :  { %1397 = vmatpush1.bf16.msra.mxu0 %v9081_v14  ;;  %v9125_v14 = vld [vmem:[#allocation9 + $0x2c] ss:$16 sps:$4 sm:$0xff]  }
 0x110   :  { %1398 = vmatprep.subr.bf16.mxu0 %v9089_v15 }
 0x111   :  { %1344 = vmatpush1.bf16.msra.mxu1 %v9078_v16 }
 0x112   :  { %1345 = vmatprep.subr.bf16.mxu1 %v9086_v17 }
 0x113   :  { %1399 = vmatpush1.bf16.msra.mxu0 %v9087_v18 }
 0x114   :  { %1400 = vmatprep.subr.bf16.mxu0 %v9095_v19 }
 0x115   :  { %1346 = vmatpush1.bf16.msra.mxu1 %v9084_v20 }
 0x116   :  { %1347 = vmatprep.subr.bf16.mxu1 %v9092_v21 }
 0x117   :  { %1401 = vmatpush1.bf16.msra.mxu0 %v9093_v22 }
 0x118   :  { %1402 = vmatprep.subr.bf16.mxu0 %v9101_v23 }
 0x119   :  { %1348 = vmatpush1.bf16.msra.mxu1 %v9090_v24  ;;  %v9123_v24 = vld [vmem:[#allocation9 + $0x28] ss:$16 sps:$4 sm:$0xff]  }
 0x11a   :  { %1349 = vmatprep.subr.bf16.mxu1 %v9098_v25 }
 0x11b   :  { %1403 = vmatpush1.bf16.msra.mxu0 %v9099_v26 }
 0x11c   :  { %1404 = vmatprep.subr.bf16.mxu0 %v9107_v30 }
 0x11d   :  { %1350 = vmatpush1.bf16.msra.mxu1 %v9096_v27 }
 0x11e   :  { %1351 = vmatprep.subr.bf16.mxu1 %v9104_v28 }
 0x11f   :  { %1405 = vmatpush1.bf16.msra.mxu0 %v9105_v31 }
 0x120   :  { %1406 = vmatprep.subr.bf16.mxu0 %v9113_v34 }
 0x121   :  { %1352 = vmatpush1.bf16.msra.mxu1 %v9102_v29  ;;  %v9128_v29 = vld [vmem:[#allocation9 + $0x4c] ss:$16 sps:$4 sm:$0xff]  }
 0x122   :  { %1353 = vmatprep.subr.bf16.mxu1 %v9110_v32 }
 0x123   :  { %1407 = vmatpush1.bf16.msra.mxu0 %v9111_v35 }
 0x124   :  { %1408 = vmatprep.subr.bf16.mxu0 %v9119_v38 }
 0x125   :  { %1354 = vmatpush1.bf16.msra.mxu1 %v9108_v33 }
 0x126   :  { %1355 = vmatprep.subr.bf16.mxu1 %v9116_v36 }
 0x127   :  { %1409 = vmatpush1.bf16.msra.mxu0 %v9117_v39 }
 0x129   :  { %1356 = vmatpush1.bf16.msra.mxu1 %v9114_v37 }
 0x12a   :  { %1431 = vmatprep.subr.bf16.mxu1 %v9122_v40 }
 0x1bd   :  { %v439_v51 = vpop.f32.mrb[0].mxu0  ;;  %v492_v57 = vpop.f32.mrb[0].mxu1 }
 0x1be   :  { %v440_v53 = vadd.f32 %v439_v51, %v228_v48  ;;  %v441_v54 = vpop.f32.mrb[1].mxu0  ;;  %v493_v59 = vadd.f32 %v492_v57, %v236_v50  ;;  %v494_v61 = vpop.f32.mrb[1].mxu1 }
 0x1bf   :  { %v442_v55 = vadd.f32 %v441_v54, %v232_v49  ;;  %v443_v56 = vpop.f32.mrb[2].mxu0  ;;  %v495_v1 = vadd.f32 %v494_v61, %v240_v52  ;;  %v496_v2 = vpop.f32.mrb[2].mxu1  ;;  %v9131_v54 = vld [vmem:[#allocation9 + $0x6c] ss:$16 sps:$4 sm:$0xff]  }
 0x1c0   :  { %v444_v58 = vadd.f32 %v443_v56, %v228_v48  ;;  %v445_v60 = vpop.f32.mrb[3].mxu0  ;;  %v511_v62 = vmax.f32 %v440_v53, 0.0  ;;  %v513_v4 = vmax.f32 %v493_v59, 0.0  ;;  %v497_v5 = vadd.f32 %v496_v2, %v236_v50  ;;  %v498_v6 = vpop.f32.mrb[3].mxu1  ;;  %v9217_v59 = vld [vmem:[#allocation12] sm:$0xff]  }
 0x1c1   :  { %v446_v63 = vadd.f32 %v445_v60, %v232_v49  ;;  %v512_v7 = vmax.f32 %v442_v55, 0.0  ;;  %v514_v9 = vmax.f32 %v495_v1, 0.0  ;;  %v499_v10 = vadd.f32 %v498_v6, %v240_v52  ;;  %v9218_v60 = vld [vmem:[#allocation12 + $0x48] sm:$0xff]   ;;  %v9134_v61 = vld [vmem:[#allocation9 + $0x8c] ss:$16 sps:$4 sm:$0xff]  }
 0x1c2   :  { %v515_v3 = vmax.f32 %v444_v58, 0.0  ;;  %v517_v13 = vmax.f32 %v497_v5, 0.0  ;;  %v9220_v1 = vld [vmem:[#allocation12 + $0x50] sm:$0xff]   ;;  %v9222_v5 = vld [vmem:[#allocation12 + $0x58] sm:$0xff]  }
 0x1c3   :  { %v516_v8 = vmax.f32 %v446_v63, 0.0  ;;  %v518_v16 = vmax.f32 %v499_v10, 0.0  ;;  %v9219_v63 = vld [vmem:[#allocation12 + $0x8] sm:$0xff]   ;;  %v9137_v2 = vld [vmem:[#allocation9 + $0xac] ss:$16 sps:$4 sm:$0xff]  }
 0x1c4   :  { %v10599_v12 = vpack.c.bf16 %v515_v3, %v511_v62  ;;  %v10601_v18 = vpack.c.bf16 %v517_v13, %v513_v4  ;;  %v9132_v62 = vld [vmem:[#allocation9 + $0x88] ss:$16 sps:$4 sm:$0xff]   ;;  %v9221_v3 = vld [vmem:[#allocation12 + $0x10] sm:$0xff]  }
 0x1c5   :  { %v528_v15 = vpack.c.bf16 %v516_v8, %v512_v7  ;;  %v449_v17 = vpop.f32.mrb[4].mxu0  ;;  %v10603_v21 = vpack.c.bf16 %v518_v16, %v514_v9  ;;  %v9135_v4 = vld [vmem:[#allocation9 + $0xa8] ss:$16 sps:$4 sm:$0xff]   ;;  %v9140_v6 = vld [vmem:[#allocation9 + $0xcc] ss:$16 sps:$4 sm:$0xff]  }
 0x1c6   :  { %v450_v19 = vadd.f32 %v449_v17, %v228_v48  ;;  %v451_v20 = vpop.f32.mrb[5].mxu0  ;;  %v502_v25 = vpop.f32.mrb[4].mxu1  ;;  %v9223_v7 = vld [vmem:[#allocation12 + $0x18] sm:$0xff]   ;;  %v9224_v9 = vld [vmem:[#allocation12 + $0x60] sm:$0xff]  }
 0x1c7   :  { %v452_v22 = vadd.f32 %v451_v20, %v232_v49  ;;  %v453_v23 = vpop.f32.mrb[6].mxu0  ;;  %1357 = vmatprep.mubr.bf16.mxu1 %v528_v15  ;;  %v503_v30 = vadd.f32 %v502_v25, %v236_v50  ;;  %v504_v31 = vpop.f32.mrb[5].mxu1  ;;  %1410 = vmatprep.mubr.bf16.mxu0 %v10603_v21  ;;  %v9138_v8 = vld [vmem:[#allocation9 + $0xc8] ss:$16 sps:$4 sm:$0xff]   ;;  %v9143_v10 = vld [vmem:[#allocation9 + $0xec] ss:$16 sps:$4 sm:$0xff]  }
 0x1c8   :  { %v519_v26 = vmax.f32 %v450_v19, 0.0  ;;  %v454_v27 = vadd.f32 %v453_v23, %v228_v48  ;;  %v455_v28 = vpop.f32.mrb[7].mxu0  ;;  %1358 = vmatmul.mubr.bf16.vlgmr.msra.gmra.mrb[8].mxu1 %v10599_v12  ;;  %v505_v34 = vadd.f32 %v504_v31, %v240_v52  ;;  %v506_v35 = vpop.f32.mrb[6].mxu1  ;;  %1411 = vmatmul.mubr.bf16.vlgmr.msra.gmra.mrb[8].mxu0 %v10601_v18  ;;  %v9141_v13 = vld [vmem:[#allocation9 + $0xe8] ss:$16 sps:$4 sm:$0xff]  }
 0x1c9   :  { %v520_v32 = vmax.f32 %v452_v22, 0.0  ;;  %v456_v33 = vadd.f32 %v455_v28, %v232_v49  ;;  %1432 = vmatpush1.bf16.msra.mxu1 %v9120_v11  ;;  %v521_v37 = vmax.f32 %v503_v30, 0.0  ;;  %v507_v38 = vadd.f32 %v506_v35, %v236_v50  ;;  %v508_v39 = vpop.f32.mrb[7].mxu1  ;;  %v9216_v50 = vld [vmem:[#allocation12 + $0x40] sm:$0xff]   ;;  %v9147_v17 = vld [vmem:[#allocation9 + $0x128] ss:$16 sps:$4 sm:$0xff]  }
 0x1ca   :  { %v523_v36 = vmax.f32 %v454_v27, 0.0  ;;  %1433 = vmatprep.subr.bf16.mxu1 %v9125_v14  ;;  %v522_v48 = vmax.f32 %v505_v34, 0.0  ;;  %v509_v51 = vadd.f32 %v508_v39, %v240_v52  ;;  %v9129_v52 = vld [vmem:[#allocation9 + $0x68] ss:$16 sps:$4 sm:$0xff]   ;;  %8583 = vmatprep.subr.bf16.mxu0 %v9216_v50  ;;  %v9225_v11 = vld [vmem:[#allocation12 + $0x20] sm:$0xff]   ;;  %v9228_v50 = vld [vmem:[#allocation12 + $0x70] sm:$0xff]  }
 0x1cb   :  { %v524_v40 = vmax.f32 %v456_v33, 0.0  ;;  %v525_v49 = vmax.f32 %v507_v38, 0.0  ;;  %8584 = vmatpush3.bf16.msra.mxu0 %v9217_v59  ;;  %v9146_v14 = vld [vmem:[#allocation9 + $0x10c] ss:$16 sps:$4 sm:$0xff]   ;;  %v9150_v20 = vld [vmem:[#allocation9 + $0x148] ss:$16 sps:$4 sm:$0xff]  }
 0x1cc   :  { %v10608_v53 = vpack.c.bf16 %v523_v36, %v519_v26  ;;  %v526_v56 = vmax.f32 %v509_v51, 0.0  ;;  %8585 = vmatprep.subr.bf16.mxu0 %v9218_v60  ;;  %v9149_v16 = vld [vmem:[#allocation9 + $0x12c] ss:$16 sps:$4 sm:$0xff]   ;;  %v9153_v23 = vld [vmem:[#allocation9 + $0x168] ss:$16 sps:$4 sm:$0xff]  }
 0x1cd   :  { %v10610_v55 = vpack.c.bf16 %v524_v40, %v520_v32  ;;  %1434 = vmatpush1.bf16.msra.mxu1 %v9123_v24  ;;  %v10612_v57 = vpack.c.bf16 %v525_v49, %v521_v37  ;;  %v9152_v19 = vld [vmem:[#allocation9 + $0x14c] ss:$16 sps:$4 sm:$0xff]   ;;  %v9156_v25 = vld [vmem:[#allocation9 + $0x188] ss:$16 sps:$4 sm:$0xff]  }
 0x1ce   :  { %1435 = vmatprep.subr.bf16.mxu1 %v9128_v29  ;;  %v10615_v58 = vpack.c.bf16 %v526_v56, %v522_v48  ;;  %v9155_v22 = vld [vmem:[#allocation9 + $0x16c] ss:$16 sps:$4 sm:$0xff]   ;;  %v9159_v27 = vld [vmem:[#allocation9 + $0x1a8] ss:$16 sps:$4 sm:$0xff]  }
 0x1cf   :  { %1367 = vmatprep.mubr.bf16.mxu1 %v10610_v55  ;;  %8586 = vmatpush3.bf16.msra.mxu0 %v9219_v63  ;;  %v9158_v24 = vld [vmem:[#allocation9 + $0x18c] ss:$16 sps:$4 sm:$0xff]   ;;  %v9162_v29 = vld [vmem:[#allocation9 + $0x1c8] ss:$16 sps:$4 sm:$0xff]  }
 0x1d0   :  { %1368 = vmatmul.mubr.bf16.gmra.mrb[12].mxu1 %v10608_v53  ;;  %1420 = vmatprep.mubr.bf16.mxu0 %v10615_v58  ;;  %v9161_v26 = vld [vmem:[#allocation9 + $0x1ac] ss:$16 sps:$4 sm:$0xff]   ;;  %v9165_v31 = vld [vmem:[#allocation9 + $0x1e8] ss:$16 sps:$4 sm:$0xff]  }
 0x1d1   :  { %1436 = vmatpush1.bf16.msra.mxu1 %v9126_v43  ;;  %1463 = vmatprep.mubr.bf16.mxu1 %v528_v15  ;;  %v9144_v15 = vld [vmem:[#allocation9 + $0x108] ss:$16 sps:$4 sm:$0xff]   ;;  %v9164_v28 = vld [vmem:[#allocation9 + $0x1cc] ss:$16 sps:$4 sm:$0xff]  }
 0x1d2   :  { %1437 = vmatprep.subr.bf16.mxu1 %v9131_v54  ;;  %1421 = vmatmul.mubr.bf16.gmra.mrb[12].mxu0 %v10612_v57  ;;  %v9167_v30 = vld [vmem:[#allocation9 + $0x1ec] ss:$16 sps:$4 sm:$0xff]   ;;  %v9168_v33 = vld [vmem:[#allocation9 + $0x208] ss:$16 sps:$4 sm:$0xff]  }
 0x1d3   :  { %8587 = vmatprep.subr.bf16.mxu0 %v9220_v1  ;;  %v9170_v32 = vld [vmem:[#allocation9 + $0x20c] ss:$16 sps:$4 sm:$0xff]   ;;  %v9171_v35 = vld [vmem:[#allocation9 + $0x228] ss:$16 sps:$4 sm:$0xff]  }
 0x1d4   :  { %8588 = vmatpush3.bf16.msra.mxu0 %v9221_v3  ;;  %v9173_v34 = vld [vmem:[#allocation9 + $0x22c] ss:$16 sps:$4 sm:$0xff]   ;;  %v9174_v37 = vld [vmem:[#allocation9 + $0x248] ss:$16 sps:$4 sm:$0xff]  }
 0x1d5   :  { %1438 = vmatpush1.bf16.msra.mxu1 %v9129_v52  ;;  %8589 = vmatprep.subr.bf16.mxu0 %v9222_v5  ;;  %v9176_v36 = vld [vmem:[#allocation9 + $0x24c] ss:$16 sps:$4 sm:$0xff]   ;;  %v9177_v39 = vld [vmem:[#allocation9 + $0x268] ss:$16 sps:$4 sm:$0xff]  }
 0x1d6   :  { %1439 = vmatprep.subr.bf16.mxu1 %v9134_v61  ;;  %v9179_v38 = vld [vmem:[#allocation9 + $0x26c] ss:$16 sps:$4 sm:$0xff]   ;;  %v9180_v43 = vld [vmem:[#allocation9 + $0x288] ss:$16 sps:$4 sm:$0xff]  }
 0x1d7   :  { %v9182_v40 = vld [vmem:[#allocation9 + $0x28c] ss:$16 sps:$4 sm:$0xff]   ;;  %v9186_v54 = vld [vmem:[#allocation9 + $0x2c8] ss:$16 sps:$4 sm:$0xff]  }
 0x1d8   :  { %8590 = vmatpush3.bf16.msra.mxu0 %v9223_v7  ;;  %v9185_v48 = vld [vmem:[#allocation9 + $0x2ac] ss:$16 sps:$4 sm:$0xff]   ;;  %v9226_v49 = vld [vmem:[#allocation12 + $0x68] sm:$0xff]   ;;  %v9230_v60 = vld [vmem:[#allocation12 + $0x78] sm:$0xff]  }
 0x1d9   :  { %1440 = vmatpush1.bf16.msra.mxu1 %v9132_v62  ;;  %8591 = vmatprep.subr.bf16.mxu0 %v9224_v9  ;;  %v9188_v51 = vld [vmem:[#allocation9 + $0x2cc] ss:$16 sps:$4 sm:$0xff]   ;;  %v9227_v56 = vld [vmem:[#allocation12 + $0x28] sm:$0xff]   ;;  %v9231_v62 = vld [vmem:[#allocation12 + $0x38] sm:$0xff]  }
 0x1da   :  { %1441 = vmatprep.subr.bf16.mxu1 %v9137_v2  ;;  %v9229_v59 = vld [vmem:[#allocation12 + $0x30] sm:$0xff]   ;;  %v9192_v52 = vld [vmem:[#allocation9 + $0x308] ss:$16 sps:$4 sm:$0xff]  }
 0x1db   :  { %v9197_v61 = vld [vmem:[#allocation9 + $0x32c] ss:$16 sps:$4 sm:$0xff]   ;;  %v9195_v63 = vld [vmem:[#allocation9 + $0x328] ss:$16 sps:$4 sm:$0xff]  }
 0x1dc   :  { %8592 = vmatpush3.bf16.msra.mxu0 %v9225_v11  ;;  %v9200_v1 = vld [vmem:[#allocation9 + $0x34c] ss:$16 sps:$4 sm:$0xff]   ;;  %v9198_v2 = vld [vmem:[#allocation9 + $0x348] ss:$16 sps:$4 sm:$0xff]  }
 0x1dd   :  { %1442 = vmatpush1.bf16.msra.mxu1 %v9135_v4  ;;  %8593 = vmatprep.subr.bf16.mxu0 %v9226_v49  ;;  %v9203_v3 = vld [vmem:[#allocation9 + $0x36c] ss:$16 sps:$4 sm:$0xff]   ;;  %v9201_v4 = vld [vmem:[#allocation9 + $0x368] ss:$16 sps:$4 sm:$0xff]  }
 0x1de   :  { %1443 = vmatprep.subr.bf16.mxu1 %v9140_v6  ;;  %v9206_v5 = vld [vmem:[#allocation9 + $0x38c] ss:$16 sps:$4 sm:$0xff]   ;;  %v9204_v6 = vld [vmem:[#allocation9 + $0x388] ss:$16 sps:$4 sm:$0xff]  }
 0x1df   :  { %v9209_v7 = vld [vmem:[#allocation9 + $0x3ac] ss:$16 sps:$4 sm:$0xff]  }
 0x1e0   :  { %8594 = vmatpush3.bf16.msra.mxu0 %v9227_v56  ;;  %v9212_v9 = vld [vmem:[#allocation9 + $0x3cc] ss:$16 sps:$4 sm:$0xff]  }
 0x1e1   :  { %1444 = vmatpush1.bf16.msra.mxu1 %v9138_v8  ;;  %8595 = vmatprep.subr.bf16.mxu0 %v9228_v50  ;;  %v9207_v8 = vld [vmem:[#allocation9 + $0x3a8] ss:$16 sps:$4 sm:$0xff]   ;;  %v9215_v11 = vld [vmem:[#allocation9 + $0x3ec] ss:$16 sps:$4 sm:$0xff]  }
 0x1e2   :  { %1445 = vmatprep.subr.bf16.mxu1 %v9143_v10  ;;  %v9210_v10 = vld [vmem:[#allocation9 + $0x3c8] ss:$16 sps:$4 sm:$0xff]  }
 0x1e4   :  { %8596 = vmatpush3.bf16.msra.mxu0 %v9229_v59 }
 0x1e5   :  { %1446 = vmatpush1.bf16.msra.mxu1 %v9141_v13  ;;  %8597 = vmatprep.subr.bf16.mxu0 %v9230_v60  ;;  %v9213_v13 = vld [vmem:[#allocation9 + $0x3e8] ss:$16 sps:$4 sm:$0xff]  }
 0x1e6   :  { %1447 = vmatprep.subr.bf16.mxu1 %v9146_v14  ;;  %v9232_v14 = vld [vmem:[#allocation12 + $0xc0] sm:$0xff]  }
 0x1e8   :  { %8598 = vmatpush3.bf16.msra.mxu0 %v9231_v62 }
 0x1e9   :  { %1448 = vmatpush1.bf16.msra.mxu1 %v9144_v15  ;;  %v9233_v15 = vld [vmem:[#allocation12 + $0x80] sm:$0xff]  }
 0x1ea   :  { %1449 = vmatprep.subr.bf16.mxu1 %v9149_v16  ;;  %v9234_v16 = vld [vmem:[#allocation12 + $0xc8] sm:$0xff]  }
 0x1ed   :  { %1450 = vmatpush1.bf16.msra.mxu1 %v9147_v17  ;;  %v9235_v17 = vld [vmem:[#allocation12 + $0x88] sm:$0xff]  }
 0x1ee   :  { %1451 = vmatprep.subr.bf16.mxu1 %v9152_v19  ;;  %v9236_v19 = vld [vmem:[#allocation12 + $0xd0] sm:$0xff]  }
 0x1f1   :  { %1452 = vmatpush1.bf16.msra.mxu1 %v9150_v20  ;;  %v9237_v20 = vld [vmem:[#allocation12 + $0x90] sm:$0xff]  }
 0x1f2   :  { %1453 = vmatprep.subr.bf16.mxu1 %v9155_v22  ;;  %v9238_v22 = vld [vmem:[#allocation12 + $0xd8] sm:$0xff]  }
 0x1f5   :  { %1454 = vmatpush1.bf16.msra.mxu1 %v9153_v23  ;;  %v9239_v23 = vld [vmem:[#allocation12 + $0x98] sm:$0xff]  }
 0x1f6   :  { %1455 = vmatprep.subr.bf16.mxu1 %v9158_v24  ;;  %v9240_v24 = vld [vmem:[#allocation12 + $0xe0] sm:$0xff]  }
 0x1f9   :  { %1456 = vmatpush1.bf16.msra.mxu1 %v9156_v25  ;;  %v9241_v25 = vld [vmem:[#allocation12 + $0xa0] sm:$0xff]  }
 0x1fa   :  { %1457 = vmatprep.subr.bf16.mxu1 %v9161_v26 }
 0x1fd   :  { %1458 = vmatpush1.bf16.msra.mxu1 %v9159_v27 }
 0x1fe   :  { %1459 = vmatprep.subr.bf16.mxu1 %v9164_v28  ;;  %v9243_v28 = vld [vmem:[#allocation12 + $0xa8] sm:$0xff]  }
 0x201   :  { %1460 = vmatpush1.bf16.msra.mxu1 %v9162_v29 }
 0x202   :  { %1461 = vmatprep.subr.bf16.mxu1 %v9167_v30 }
 0x205   :  { %1462 = vmatpush1.bf16.msra.mxu1 %v9165_v31  ;;  %v9244_v31 = vld [vmem:[#allocation12 + $0xf0] sm:$0xff]  }
 0x206   :  { %1484 = vmatprep.subr.bf16.mxu1 %v9170_v32 }
 0x208   :  { %1464 = vmatmul.mubr.bf16.vlgmr.msra.gmra.mrb[16].mxu1 %v10599_v12  ;;  %v9183_v12 = vld [vmem:[#allocation9 + $0x2a8] ss:$16 sps:$4 sm:$0xff]  }
 0x209   :  { %1473 = vmatprep.mubr.bf16.mxu1 %v10610_v55  ;;  %1485 = vmatpush1.bf16.msra.mxu1 %v9168_v33  ;;  %v9191_v55 = vld [vmem:[#allocation9 + $0x2ec] ss:$16 sps:$4 sm:$0xff]  }
 0x20a   :  { %1486 = vmatprep.subr.bf16.mxu1 %v9173_v34 }
 0x20d   :  { %1487 = vmatpush1.bf16.msra.mxu1 %v9171_v35  ;;  %v9245_v35 = vld [vmem:[#allocation12 + $0xb0] sm:$0xff]  }
 0x20e   :  { %1488 = vmatprep.subr.bf16.mxu1 %v9176_v36 }
 0x210   :  { %1474 = vmatmul.mubr.bf16.gmra.mrb[20].mxu1 %v10608_v53  ;;  %v9189_v53 = vld [vmem:[#allocation9 + $0x2e8] ss:$16 sps:$4 sm:$0xff]  }
 0x211   :  { %1489 = vmatpush1.bf16.msra.mxu1 %v9174_v37  ;;  %1516 = vmatprep.mubr.bf16.mxu1 %v10603_v21  ;;  %v9194_v21 = vld [vmem:[#allocation9 + $0x30c] ss:$16 sps:$4 sm:$0xff]  }
 0x212   :  { %1490 = vmatprep.subr.bf16.mxu1 %v9179_v38 }
 0x215   :  { %1491 = vmatpush1.bf16.msra.mxu1 %v9177_v39 }
 0x216   :  { %1492 = vmatprep.subr.bf16.mxu1 %v9182_v40 }
 0x219   :  { %1493 = vmatpush1.bf16.msra.mxu1 %v9180_v43 }
 0x21a   :  { %1494 = vmatprep.subr.bf16.mxu1 %v9185_v48 }
 0x21d   :  { %1495 = vmatpush1.bf16.msra.mxu1 %v9183_v12 }
 0x21e   :  { %1496 = vmatprep.subr.bf16.mxu1 %v9188_v51 }
 0x221   :  { %1497 = vmatpush1.bf16.msra.mxu1 %v9186_v54  ;;  %v9246_v54 = vld [vmem:[#allocation12 + $0xf8] sm:$0xff]  }
 0x222   :  { %1498 = vmatprep.subr.bf16.mxu1 %v9191_v55  ;;  %v9247_v55 = vld [vmem:[#allocation12 + $0xb8] sm:$0xff]  }
 0x225   :  { %1499 = vmatpush1.bf16.msra.mxu1 %v9189_v53 }
 0x226   :  { %1500 = vmatprep.subr.bf16.mxu1 %v9194_v21 }
 0x229   :  { %1501 = vmatpush1.bf16.msra.mxu1 %v9192_v52 }
 0x22a   :  { %1502 = vmatprep.subr.bf16.mxu1 %v9197_v61 }
 0x22d   :  { %1503 = vmatpush1.bf16.msra.mxu1 %v9195_v63 }
 0x22e   :  { %1504 = vmatprep.subr.bf16.mxu1 %v9200_v1 }
 0x231   :  { %1505 = vmatpush1.bf16.msra.mxu1 %v9198_v2 }
 0x232   :  { %1506 = vmatprep.subr.bf16.mxu1 %v9203_v3 }
 0x235   :  { %1507 = vmatpush1.bf16.msra.mxu1 %v9201_v4 }
 0x236   :  { %1508 = vmatprep.subr.bf16.mxu1 %v9206_v5 }
 0x239   :  { %1509 = vmatpush1.bf16.msra.mxu1 %v9204_v6 }
 0x23a   :  { %1510 = vmatprep.subr.bf16.mxu1 %v9209_v7 }
 0x23d   :  { %1511 = vmatpush1.bf16.msra.mxu1 %v9207_v8 }
 0x23e   :  { %1512 = vmatprep.subr.bf16.mxu1 %v9212_v9 }
 0x241   :  { %1513 = vmatpush1.bf16.msra.mxu1 %v9210_v10 }
 0x242   :  { %1514 = vmatprep.subr.bf16.mxu1 %v9215_v11 }
 0x245   :  { %1515 = vmatpush1.bf16.msra.mxu1 %v9213_v13 }
 0x246   :  { %8611 = vmatprep.subr.bf16.mxu1 %v9232_v14 }
 0x248   :  { %1517 = vmatmul.mubr.bf16.vlgmr.msra.gmra.mrb[16].mxu1 %v10601_v18  ;;  %v9242_v18 = vld [vmem:[#allocation12 + $0xe8] sm:$0xff]  }
 0x249   :  { %1526 = vmatprep.mubr.bf16.mxu1 %v10615_v58  ;;  %8612 = vmatpush3.bf16.msra.mxu1 %v9233_v15  ;;  %v10627_v58 = vld [vmem:[#allocation11] sm:$0xf] }
 0x24a   :  { %8613 = vmatprep.subr.bf16.mxu1 %v9234_v16  ;;  %v668_v26 = vrot.slane %v10627_v58, %v10584_v44  ;;  %v672_v27 = vrot.slane %v10627_v58, %v10587_v45 }
 0x24d   :  { %8614 = vmatpush3.bf16.msra.mxu1 %v9235_v17 }
 0x24e   :  { %8615 = vmatprep.subr.bf16.mxu1 %v9236_v19 }
 0x250   :  { %1527 = vmatmul.mubr.bf16.gmra.mrb[20].mxu1 %v10612_v57 }
 0x251   :  { %8616 = vmatpush3.bf16.msra.mxu1 %v9237_v20 }
 0x252   :  { %8617 = vmatprep.subr.bf16.mxu1 %v9238_v22  ;;  %v9248_v22 = vld [vmem:[#allocation6 + $0x100] ss:$16 sps:$4 sm:$0xff]  }
 0x255   :  { %8618 = vmatpush3.bf16.msra.mxu1 %v9239_v23  ;;  %v9250_v23 = vld [vmem:[#allocation6 + $0x104] ss:$16 sps:$4 sm:$0xff]  }
 0x256   :  { %8619 = vmatprep.subr.bf16.mxu1 %v9240_v24  ;;  %v9253_v24 = vld [vmem:[#allocation6 + $0x10c] ss:$16 sps:$4 sm:$0xff]   ;;  %2148 = vmatprep.subr.bf16.mxu0 %v9250_v23  ;;  %v9286_v23 = vld [vmem:[#allocation6 + $0x1c4] ss:$16 sps:$4 sm:$0xff]  }
 0x259   :  { %8620 = vmatpush3.bf16.msra.mxu1 %v9241_v25  ;;  %v9256_v25 = vld [vmem:[#allocation6 + $0x124] ss:$16 sps:$4 sm:$0xff]  }
 0x25a   :  { %8621 = vmatprep.subr.bf16.mxu1 %v9242_v18  ;;  %v9254_v18 = vld [vmem:[#allocation6 + $0x120] ss:$16 sps:$4 sm:$0xff]  }
 0x25d   :  { %8622 = vmatpush3.bf16.msra.mxu1 %v9243_v28  ;;  %v9268_v28 = vld [vmem:[#allocation6 + $0x164] ss:$16 sps:$4 sm:$0xff]  }
 0x25e   :  { %8623 = vmatprep.subr.bf16.mxu1 %v9244_v31  ;;  %v676_v31 = vrot.slane %v10627_v58, %v10590_v46 }
 0x261   :  { %8624 = vmatpush3.bf16.msra.mxu1 %v9245_v35 }
 0x262   :  { %8625 = vmatprep.subr.bf16.mxu1 %v9246_v54 }
 0x265   :  { %8626 = vmatpush3.bf16.msra.mxu1 %v9247_v55 }
 0x266   :  { %2201 = vmatprep.subr.bf16.mxu1 %v9253_v24  ;;  %v9289_v24 = vld [vmem:[#allocation6 + $0x1cc] ss:$16 sps:$4 sm:$0xff]  }
 0x29b   :  { %v1359_v57 = vpop.f32.mrb[8].mxu1  ;;  %v1412_v34 = vpop.f32.mrb[8].mxu0 }
 0x29c   :  { %v1360_v29 = vadd.f32 %v1359_v57, %v668_v26  ;;  %v1361_v30 = vpop.f32.mrb[9].mxu1  ;;  %v1414_v39 = vpop.f32.mrb[9].mxu0  ;;  %v9266_v57 = vld [vmem:[#allocation6 + $0x160] ss:$16 sps:$4 sm:$0xff]  }
 0x29d   :  { %v1362_v32 = vadd.f32 %v1361_v30, %v672_v27  ;;  %v1363_v33 = vpop.f32.mrb[10].mxu1  ;;  %v1416_v48 = vpop.f32.mrb[10].mxu0  ;;  %v9272_v30 = vld [vmem:[#allocation6 + $0x180] ss:$16 sps:$4 sm:$0xff]  }
 0x29e   :  { %v1364_v36 = vadd.f32 %v1363_v33, %v668_v26  ;;  %v1413_v37 = vadd.f32 %v1412_v34, %v1360_v29  ;;  %v1365_v38 = vpop.f32.mrb[11].mxu1  ;;  %v1418_v51 = vpop.f32.mrb[11].mxu0  ;;  %v9274_v29 = vld [vmem:[#allocation6 + $0x184] ss:$16 sps:$4 sm:$0xff]  }
 0x29f   :  { %v1366_v40 = vadd.f32 %v1365_v38, %v672_v27  ;;  %v1415_v43 = vadd.f32 %v1414_v39, %v1362_v32  ;;  %v680_v32 = vrot.slane %v10627_v58, %v10593_v47  ;;  %v9259_v58 = vld [vmem:[#allocation6 + $0x12c] ss:$16 sps:$4 sm:$0xff]  }
 0x2a0   :  { %v1417_v12 = vadd.f32 %v1416_v48, %v1364_v36  ;;  %v1537_v56 = vmax.f32 %v1413_v37, 0.0 }
 0x2a1   :  { %v1419_v49 = vadd.f32 %v1418_v51, %v1366_v40  ;;  %v1538_v50 = vmax.f32 %v1415_v43, 0.0 }
 0x2a2   :  { %v1541_v53 = vmax.f32 %v1417_v12, 0.0 }
 0x2a3   :  { %v1542_v21 = vmax.f32 %v1419_v49, 0.0  ;;  %v1369_v59 = vpop.f32.mrb[12].mxu1 }
 0x2a4   :  { %v1553_v52 = vpack.c.bf16 %v1541_v53, %v1537_v56  ;;  %v1370_v60 = vadd.f32 %v1369_v59, %v668_v26  ;;  %v1371_v61 = vpop.f32.mrb[13].mxu1  ;;  %v9251_v56 = vld [vmem:[#allocation6 + $0x108] ss:$16 sps:$4 sm:$0xff]  }
 0x2a5   :  { %v1554_v62 = vpack.c.bf16 %v1542_v21, %v1538_v50  ;;  %v1372_v63 = vadd.f32 %v1371_v61, %v672_v27  ;;  %v1373_v1 = vpop.f32.mrb[14].mxu1  ;;  %v1422_v3 = vpop.f32.mrb[12].mxu0 }
 0x2a6   :  { %v1374_v2 = vadd.f32 %v1373_v1, %v668_v26  ;;  %v1375_v4 = vpop.f32.mrb[15].mxu1  ;;  %v1423_v5 = vadd.f32 %v1422_v3, %v1370_v60  ;;  %v1424_v7 = vpop.f32.mrb[13].mxu0  ;;  %v9262_v26 = vld [vmem:[#allocation6 + $0x144] ss:$16 sps:$4 sm:$0xff]  }
 0x2a7   :  { %1849 = vmatprep.mubr.bf16.mxu0 %v1554_v62  ;;  %v1376_v6 = vadd.f32 %v1375_v4, %v672_v27  ;;  %v1425_v8 = vadd.f32 %v1424_v7, %v1372_v63  ;;  %v1426_v9 = vpop.f32.mrb[14].mxu0  ;;  %v9260_v27 = vld [vmem:[#allocation6 + $0x140] ss:$16 sps:$4 sm:$0xff]   ;;  %v9257_v62 = vld [vmem:[#allocation6 + $0x128] ss:$16 sps:$4 sm:$0xff]  }
 0x2a8   :  { %1850 = vmatmul.mubr.bf16.vlgmr.msra.gmra.mrb[16].mxu0 %v1553_v52  ;;  %v1545_v10 = vmax.f32 %v1423_v5, 0.0  ;;  %v1427_v11 = vadd.f32 %v1426_v9, %v1374_v2  ;;  %v1428_v13 = vpop.f32.mrb[15].mxu0  ;;  %v9265_v2 = vld [vmem:[#allocation6 + $0x14c] ss:$16 sps:$4 sm:$0xff]   ;;  %v9263_v7 = vld [vmem:[#allocation6 + $0x148] ss:$16 sps:$4 sm:$0xff]  }
 0x2a9   :  { %v1546_v14 = vmax.f32 %v1425_v8, 0.0  ;;  %v1429_v15 = vadd.f32 %v1428_v13, %v1376_v6  ;;  %2149 = vmatpush1.bf16.msra.mxu0 %v9248_v22  ;;  %v9271_v8 = vld [vmem:[#allocation6 + $0x16c] ss:$16 sps:$4 sm:$0xff]   ;;  %v9269_v9 = vld [vmem:[#allocation6 + $0x168] ss:$16 sps:$4 sm:$0xff]  }
 0x2aa   :  { %v1549_v16 = vmax.f32 %v1427_v11, 0.0  ;;  %2150 = vmatprep.subr.bf16.mxu0 %v9256_v25  ;;  %v9275_v11 = vld [vmem:[#allocation6 + $0x188] ss:$16 sps:$4 sm:$0xff]   ;;  %v9280_v13 = vld [vmem:[#allocation6 + $0x1a4] ss:$16 sps:$4 sm:$0xff]  }
 0x2ab   :  { %v1550_v17 = vmax.f32 %v1429_v15, 0.0  ;;  %v9278_v15 = vld [vmem:[#allocation6 + $0x1a0] ss:$16 sps:$4 sm:$0xff]  }
 0x2ac   :  { %v1557_v19 = vpack.c.bf16 %v1549_v16, %v1545_v10  ;;  %v9277_v10 = vld [vmem:[#allocation6 + $0x18c] ss:$16 sps:$4 sm:$0xff]   ;;  %v9281_v16 = vld [vmem:[#allocation6 + $0x1a8] ss:$16 sps:$4 sm:$0xff]  }
 0x2ad   :  { %v1558_v20 = vpack.c.bf16 %v1550_v17, %v1546_v14  ;;  %2151 = vmatpush1.bf16.msra.mxu0 %v9254_v18  ;;  %v9283_v14 = vld [vmem:[#allocation6 + $0x1ac] ss:$16 sps:$4 sm:$0xff]   ;;  %v9284_v18 = vld [vmem:[#allocation6 + $0x1c0] ss:$16 sps:$4 sm:$0xff]  }
 0x2ae   :  { %2152 = vmatprep.subr.bf16.mxu0 %v9262_v26  ;;  %v9287_v26 = vld [vmem:[#allocation6 + $0x1c8] ss:$16 sps:$4 sm:$0xff]  }
 0x2af   :  { %1857 = vmatprep.mubr.bf16.mxu0 %v1558_v20 }
 0x2b0   :  { %1858 = vmatmul.mubr.bf16.gmra.mrb[20].mxu0 %v1557_v19 }
 0x2b1   :  { %2180 = vmatprep.mubr.bf16.mxu0 %v10352_v0  ;;  %2153 = vmatpush1.bf16.msra.mxu0 %v9260_v27 }
 0x2b2   :  { %2154 = vmatprep.subr.bf16.mxu0 %v9268_v28  ;;  %v9292_v28 = vld [vmem:[#allocation6 + $0x1e4] ss:$16 sps:$4 sm:$0xff]  }
 0x2b5   :  { %2155 = vmatpush1.bf16.msra.mxu0 %v9266_v57  ;;  %v9295_v57 = vld [vmem:[#allocation6 + $0x1ec] ss:$16 sps:$4 sm:$0xff]  }
 0x2b6   :  { %2156 = vmatprep.subr.bf16.mxu0 %v9274_v29  ;;  %v9290_v29 = vld [vmem:[#allocation6 + $0x1e0] ss:$16 sps:$4 sm:$0xff]  }
 0x2b9   :  { %2157 = vmatpush1.bf16.msra.mxu0 %v9272_v30  ;;  %v9293_v30 = vld [vmem:[#allocation6 + $0x1e8] ss:$16 sps:$4 sm:$0xff]  }
 0x2ba   :  { %2158 = vmatprep.subr.bf16.mxu0 %v9280_v13 }
 0x2bd   :  { %2159 = vmatpush1.bf16.msra.mxu0 %v9278_v15  ;;  %v9305_v15 = vld [vmem:[#allocation9 + $0x428] ss:$16 sps:$4 sm:$0xff]  }
 0x2be   :  { %2160 = vmatprep.subr.bf16.mxu0 %v9286_v23  ;;  %v9308_v23 = vld [vmem:[#allocation9 + $0x440] ss:$16 sps:$4 sm:$0xff]  }
 0x2c1   :  { %2161 = vmatpush1.bf16.msra.mxu0 %v9284_v18  ;;  %v9319_v18 = vld [vmem:[#allocation9 + $0x46c] ss:$16 sps:$4 sm:$0xff]  }
 0x2c2   :  { %2162 = vmatprep.subr.bf16.mxu0 %v9292_v28  ;;  %v9322_v28 = vld [vmem:[#allocation9 + $0x484] ss:$16 sps:$4 sm:$0xff]  }
 0x2c5   :  { %2163 = vmatpush1.bf16.msra.mxu0 %v9290_v29  ;;  %v9320_v29 = vld [vmem:[#allocation9 + $0x480] ss:$16 sps:$4 sm:$0xff]  }
 0x31b   :  { %v1518_v33 = vpop.f32.mrb[16].mxu1 }
 0x31c   :  { %v8855_v34 = vadd.f32 %v1518_v33, %v676_v31  ;;  %v1520_v35 = vpop.f32.mrb[17].mxu1 }
 0x31d   :  { %v8856_v36 = vadd.f32 %v1520_v35, %v680_v32  ;;  %v1522_v37 = vpop.f32.mrb[18].mxu1 }
 0x31e   :  { %v8857_v38 = vadd.f32 %v1522_v37, %v676_v31  ;;  %v1524_v39 = vpop.f32.mrb[19].mxu1  ;;  %v1539_v43 = vmax.f32 %v8855_v34, 0.0  ;;  %v9298_v37 = vld [vmem:[#allocation9 + $0x404] ss:$16 sps:$4 sm:$0xff]  }
 0x31f   :  { %v8858_v40 = vadd.f32 %v1524_v39, %v680_v32  ;;  %v1540_v12 = vmax.f32 %v8856_v36, 0.0  ;;  %3070 = vmatprep.subr.bf16.mxu0 %v9298_v37  ;;  %v9332_v37 = vld [vmem:[#allocation9 + $0x4c0] ss:$16 sps:$4 sm:$0xff]  }
 0x320   :  { %v1543_v48 = vmax.f32 %v8857_v38, 0.0  ;;  %v9301_v38 = vld [vmem:[#allocation9 + $0x40c] ss:$16 sps:$4 sm:$0xff]  }
 0x321   :  { %v1544_v51 = vmax.f32 %v8858_v40, 0.0 }
 0x322   :  { %v1555_v54 = vpack.c.bf16 %v1543_v48, %v1539_v43 }
 0x323   :  { %v1556_v49 = vpack.c.bf16 %v1544_v51, %v1540_v12  ;;  %v1528_v55 = vpop.f32.mrb[20].mxu1 }
 0x324   :  { %v8859_v53 = vadd.f32 %v1528_v55, %v676_v31  ;;  %v1530_v50 = vpop.f32.mrb[21].mxu1 }
 0x325   :  { %v8860_v21 = vadd.f32 %v1530_v50, %v680_v32  ;;  %v1532_v59 = vpop.f32.mrb[22].mxu1  ;;  %1898 = vmatprep.mubr.bf16.mxu1 %v1556_v49  ;;  %v10048_v49 = vld [vmem:[#allocation3] sm:$0xff]  ;;  %v10049_v50 = vld [vmem:[#allocation3 + $0x8] sm:$0xff] }
 0x326   :  { %v8861_v52 = vadd.f32 %v1532_v59, %v676_v31  ;;  %v1534_v60 = vpop.f32.mrb[23].mxu1  ;;  %1899 = vmatmul.mubr.bf16.vlgmr.msra.gmra.mrb[24].mxu1 %v1555_v54  ;;  %v1547_v63 = vmax.f32 %v8859_v53, 0.0  ;;  %v7940_v53 = vld [vmem:[#allocation14] ss:$0 sm:$0xff] }
 0x327   :  { %v8862_v61 = vadd.f32 %v1534_v60, %v680_v32  ;;  %2202 = vmatpush1.bf16.msra.mxu1 %v9251_v56  ;;  %v1548_v3 = vmax.f32 %v8860_v21, 0.0 }
 0x328   :  { %v1551_v1 = vmax.f32 %v8861_v52, 0.0  ;;  %2203 = vmatprep.subr.bf16.mxu1 %v9259_v58 }
 0x329   :  { %v1552_v4 = vmax.f32 %v8862_v61, 0.0 }
 0x32a   :  { %v1559_v5 = vpack.c.bf16 %v1551_v1, %v1547_v63 }
 0x32b   :  { %v1560_v6 = vpack.c.bf16 %v1552_v4, %v1548_v3  ;;  %2204 = vmatpush1.bf16.msra.mxu1 %v9257_v62  ;;  %v9296_v4 = vld [vmem:[#allocation9 + $0x400] ss:$16 sps:$4 sm:$0xff]  }
 0x32c   :  { %2205 = vmatprep.subr.bf16.mxu1 %v9265_v2 }
 0x32d   :  { %1906 = vmatprep.mubr.bf16.mxu1 %v1560_v6  ;;  %v9304_v6 = vld [vmem:[#allocation9 + $0x424] ss:$16 sps:$4 sm:$0xff]  }
 0x32e   :  { %1907 = vmatmul.mubr.bf16.gmra.mrb[28].mxu1 %v1559_v5  ;;  %v9299_v5 = vld [vmem:[#allocation9 + $0x408] ss:$16 sps:$4 sm:$0xff]  }
 0x32f   :  { %2206 = vmatpush1.bf16.msra.mxu1 %v9263_v7  ;;  %2233 = vmatprep.mubr.bf16.mxu1 %v10352_v0  ;;  %v9307_v7 = vld [vmem:[#allocation9 + $0x42c] ss:$16 sps:$4 sm:$0xff]  }
 0x330   :  { %2207 = vmatprep.subr.bf16.mxu1 %v9271_v8  ;;  %v10050_v8 = vld [vmem:[#allocation3 + $0x10] sm:$0xff] }
 0x333   :  { %2208 = vmatpush1.bf16.msra.mxu1 %v9269_v9 }
 0x334   :  { %2209 = vmatprep.subr.bf16.mxu1 %v9277_v10 }
 0x337   :  { %2210 = vmatpush1.bf16.msra.mxu1 %v9275_v11  ;;  %v10051_v11 = vld [vmem:[#allocation3 + $0x18] sm:$0xff] }
 0x338   :  { %2211 = vmatprep.subr.bf16.mxu1 %v9283_v14  ;;  %v9302_v14 = vld [vmem:[#allocation9 + $0x420] ss:$16 sps:$4 sm:$0xff]  }
 0x33b   :  { %2212 = vmatpush1.bf16.msra.mxu1 %v9281_v16  ;;  %v9310_v16 = vld [vmem:[#allocation9 + $0x444] ss:$16 sps:$4 sm:$0xff]  }
 0x33c   :  { %2213 = vmatprep.subr.bf16.mxu1 %v9289_v24  ;;  %v9311_v24 = vld [vmem:[#allocation9 + $0x448] ss:$16 sps:$4 sm:$0xff]  }
 0x33f   :  { %2214 = vmatpush1.bf16.msra.mxu1 %v9287_v26  ;;  %v9314_v26 = vld [vmem:[#allocation9 + $0x460] ss:$16 sps:$4 sm:$0xff]  }
 0x340   :  { %2215 = vmatprep.subr.bf16.mxu1 %v9295_v57  ;;  %v9325_v57 = vld [vmem:[#allocation9 + $0x48c] ss:$16 sps:$4 sm:$0xff]  }
 0x343   :  { %2216 = vmatpush1.bf16.msra.mxu1 %v9293_v30  ;;  %v9323_v30 = vld [vmem:[#allocation9 + $0x488] ss:$16 sps:$4 sm:$0xff]  }
 0x344   :  { %3176 = vmatprep.subr.bf16.mxu1 %v9301_v38  ;;  %v9335_v38 = vld [vmem:[#allocation9 + $0x4c8] ss:$16 sps:$4 sm:$0xff]  }
 0x37b   :  { %v8599_v17 = vpop.f32.mrb[16].mxu0 }
 0x37c   :  { %v8600_v19 = vpop.f32.mrb[17].mxu0 }
 0x37d   :  { %v8601_v20 = vadd.f32 %v8600_v19, %v8599_v17  ;;  %v8602_v22 = vpop.f32.mrb[18].mxu0  ;;  %v9313_v17 = vld [vmem:[#allocation9 + $0x44c] ss:$16 sps:$4 sm:$0xff]  }
 0x37e   :  { %v8603_v25 = vpop.f32.mrb[19].mxu0 }
 0x37f   :  { %v8604_v27 = vadd.f32 %v8603_v25, %v8602_v22  ;;  %v9316_v25 = vld [vmem:[#allocation9 + $0x464] ss:$16 sps:$4 sm:$0xff]  }
 0x383   :  { %v8605_v31 = vpop.f32.mrb[20].mxu0 }
 0x384   :  { %v8606_v32 = vpop.f32.mrb[21].mxu0 }
 0x385   :  { %v8607_v33 = vadd.f32 %v8606_v32, %v8605_v31  ;;  %v8608_v34 = vpop.f32.mrb[22].mxu0  ;;  %v9328_v31 = vld [vmem:[#allocation9 + $0x4a4] ss:$16 sps:$4 sm:$0xff]   ;;  %v9331_v32 = vld [vmem:[#allocation9 + $0x4ac] ss:$16 sps:$4 sm:$0xff]  }
 0x386   :  { %v8609_v35 = vpop.f32.mrb[23].mxu0 }
 0x387   :  { %v8610_v36 = vadd.f32 %v8609_v35, %v8608_v34  ;;  %v9329_v34 = vld [vmem:[#allocation9 + $0x4a8] ss:$16 sps:$4 sm:$0xff]   ;;  %v9334_v35 = vld [vmem:[#allocation9 + $0x4c4] ss:$16 sps:$4 sm:$0xff]  }
 0x3f9   :  { %v8627_v39 = vpop.f32.mrb[24].mxu1 }
 0x3fa   :  { %v8628_v40 = vpop.f32.mrb[25].mxu1 }
 0x3fb   :  { %v8629_v43 = vadd.f32 %v8628_v40, %v8627_v39  ;;  %v8630_v48 = vpop.f32.mrb[26].mxu1  ;;  %v9340_v39 = vld [vmem:[#allocation9 + $0x4e4] ss:$16 sps:$4 sm:$0xff]   ;;  %v9343_v40 = vld [vmem:[#allocation9 + $0x4ec] ss:$16 sps:$4 sm:$0xff]  }
 0x3fc   :  { %v8631_v12 = vpop.f32.mrb[27].mxu1 }
 0x3fd   :  { %v1901_v51 = vadd.f32 %v8629_v43, %v8601_v20  ;;  %v8632_v54 = vadd.f32 %v8631_v12, %v8630_v48  ;;  %v9338_v43 = vld [vmem:[#allocation9 + $0x4e0] ss:$16 sps:$4 sm:$0xff]   ;;  %v9341_v48 = vld [vmem:[#allocation9 + $0x4e8] ss:$16 sps:$4 sm:$0xff]   ;;  %v9346_v12 = vld [vmem:[#allocation9 + $0x504] ss:$16 sps:$4 sm:$0xff]  }
 0x3ff   :  { %v1915_v55 = vadd.f32 %v10048_v49, %v1901_v51  ;;  %v1904_v56 = vadd.f32 %v8632_v54, %v8604_v27  ;;  %v9317_v27 = vld [vmem:[#allocation9 + $0x468] ss:$16 sps:$4 sm:$0xff]   ;;  %v9349_v51 = vld [vmem:[#allocation9 + $0x50c] ss:$16 sps:$4 sm:$0xff]   ;;  %v9344_v54 = vld [vmem:[#allocation9 + $0x500] ss:$16 sps:$4 sm:$0xff]  }
 0x400   :  { %v9347_v49 = vld [vmem:[#allocation9 + $0x508] ss:$16 sps:$4 sm:$0xff]  }
 0x401   :  { %v1916_v58 = vadd.f32 %v10049_v50, %v1904_v56  ;;  %v8633_v21 = vpop.f32.mrb[28].mxu1  ;;  %v10639_v52 = vadd.f32 %v7940_v53, %v1915_v55  ;;  %v9352_v55 = vld [vmem:[#allocation9 + $0x524] ss:$16 sps:$4 sm:$0xff]   ;;  %v9355_v56 = vld [vmem:[#allocation9 + $0x52c] ss:$16 sps:$4 sm:$0xff]  }
 0x402   :  { %v8634_v59 = vpop.f32.mrb[29].mxu1  ;;  %v9353_v50 = vld [vmem:[#allocation9 + $0x528] ss:$16 sps:$4 sm:$0xff]  }
 0x403   :  { %v10641_v60 = vadd.f32 %v7940_v53, %v1916_v58  ;;  %v8635_v61 = vadd.f32 %v8634_v59, %v8633_v21  ;;  %v8636_v62 = vpop.f32.mrb[30].mxu1  ;;  %v9358_v58 = vld [vmem:[#allocation9 + $0x544] ss:$16 sps:$4 sm:$0xff]   ;;  %v9361_v21 = vld [vmem:[#allocation9 + $0x54c] ss:$16 sps:$4 sm:$0xff]  }
 0x404   :  { %v8637_v63 = vpop.f32.mrb[31].mxu1  ;;  %v9356_v59 = vld [vmem:[#allocation9 + $0x540] ss:$16 sps:$4 sm:$0xff]  }
 0x405   :  { %v1930_v1 = vpack.c.bf16 %v10641_v60, %v10639_v52  ;;  %v1909_v2 = vadd.f32 %v8635_v61, %v8607_v33  ;;  %v8638_v3 = vadd.f32 %v8637_v63, %v8636_v62  ;;  %v9326_v33 = vld [vmem:[#allocation9 + $0x4a0] ss:$16 sps:$4 sm:$0xff]   ;;  %v9359_v61 = vld [vmem:[#allocation9 + $0x548] ss:$16 sps:$4 sm:$0xff]   ;;  %v9364_v62 = vld [vmem:[#allocation9 + $0x564] ss:$16 sps:$4 sm:$0xff]  }
 0x406   :  { %v9367_v63 = vld [vmem:[#allocation9 + $0x56c] ss:$16 sps:$4 sm:$0xff]  }
 0x407   :  { %v1917_v9 = vadd.f32 %v10050_v8, %v1909_v2  ;;  %v1912_v10 = vadd.f32 %v8638_v3, %v8610_v36  ;;  %2181 = vmatmul.mubr.bf16.vlgmr.msra.gmra.mrb[24].mxu0 %v1930_v1  ;;  %2234 = vmatmul.mubr.bf16.vlgmr.msra.gmra.mrb[32].mxu1 %v1930_v1  ;;  %v9337_v36 = vld [vmem:[#allocation9 + $0x4cc] ss:$16 sps:$4 sm:$0xff]   ;;  %v9362_v1 = vld [vmem:[#allocation9 + $0x560] ss:$16 sps:$4 sm:$0xff]   ;;  %v9365_v2 = vld [vmem:[#allocation9 + $0x568] ss:$16 sps:$4 sm:$0xff]  }
 0x408   :  { %2190 = vmatprep.mubr.bf16.mxu0 %v10352_v0  ;;  %2243 = vmatprep.mubr.bf16.mxu1 %v10352_v0  ;;  %v9370_v3 = vld [vmem:[#allocation9 + $0x584] ss:$16 sps:$4 sm:$0xff]   ;;  %v9379_v8 = vld [vmem:[#allocation9 + $0x5ac] ss:$16 sps:$4 sm:$0xff]  }
 0x409   :  { %v1918_v13 = vadd.f32 %v10051_v11, %v1912_v10  ;;  %3071 = vmatpush1.bf16.msra.mxu0 %v9296_v4  ;;  %3177 = vmatpush1.bf16.msra.mxu1 %v9299_v5  ;;  %v10647_v19 = vadd.f32 %v7940_v53, %v1917_v9  ;;  %v9373_v4 = vld [vmem:[#allocation9 + $0x58c] ss:$16 sps:$4 sm:$0xff]   ;;  %v9368_v5 = vld [vmem:[#allocation9 + $0x580] ss:$16 sps:$4 sm:$0xff]   ;;  %v9377_v10 = vld [vmem:[#allocation9 + $0x5a8] ss:$16 sps:$4 sm:$0xff]  }
 0x40a   :  { %3072 = vmatprep.subr.bf16.mxu0 %v9304_v6  ;;  %3178 = vmatprep.subr.bf16.mxu1 %v9307_v7  ;;  %v9371_v6 = vld [vmem:[#allocation9 + $0x588] ss:$16 sps:$4 sm:$0xff]   ;;  %v9376_v7 = vld [vmem:[#allocation9 + $0x5a4] ss:$16 sps:$4 sm:$0xff]   ;;  %v9374_v9 = vld [vmem:[#allocation9 + $0x5a0] ss:$16 sps:$4 sm:$0xff]  }
 0x40b   :  { %v10649_v20 = vadd.f32 %v7940_v53, %v1918_v13  ;;  %v9350_v53 = vld [vmem:[#allocation9 + $0x520] ss:$16 sps:$4 sm:$0xff]   ;;  %v9382_v11 = vld [vmem:[#allocation9 + $0x5c4] ss:$16 sps:$4 sm:$0xff]   ;;  %v9385_v13 = vld [vmem:[#allocation9 + $0x5cc] ss:$16 sps:$4 sm:$0xff]  }
 0x40d   :  { %v1931_v22 = vpack.c.bf16 %v10649_v20, %v10647_v19  ;;  %3073 = vmatpush1.bf16.msra.mxu0 %v9302_v14  ;;  %3179 = vmatpush1.bf16.msra.mxu1 %v9305_v15  ;;  %v9380_v14 = vld [vmem:[#allocation9 + $0x5c0] ss:$16 sps:$4 sm:$0xff]   ;;  %v9383_v15 = vld [vmem:[#allocation9 + $0x5c8] ss:$16 sps:$4 sm:$0xff]  }
 0x40e   :  { %3074 = vmatprep.subr.bf16.mxu0 %v9310_v16  ;;  %3180 = vmatprep.subr.bf16.mxu1 %v9313_v17  ;;  %v9388_v16 = vld [vmem:[#allocation9 + $0x5e4] ss:$16 sps:$4 sm:$0xff]   ;;  %v9391_v17 = vld [vmem:[#allocation9 + $0x5ec] ss:$16 sps:$4 sm:$0xff]  }
 0x40f   :  { %2191 = vmatmul.mubr.bf16.gmra.mrb[28].mxu0 %v1931_v22  ;;  %2244 = vmatmul.mubr.bf16.gmra.mrb[36].mxu1 %v1931_v22  ;;  %v9386_v22 = vld [vmem:[#allocation9 + $0x5e0] ss:$16 sps:$4 sm:$0xff]  }
 0x411   :  { %3075 = vmatpush1.bf16.msra.mxu0 %v9308_v23  ;;  %3181 = vmatpush1.bf16.msra.mxu1 %v9311_v24  ;;  %v9389_v23 = vld [vmem:[#allocation9 + $0x5e8] ss:$16 sps:$4 sm:$0xff]   ;;  %v9394_v24 = vld [vmem:[#allocation9 + $0x604] ss:$16 sps:$4 sm:$0xff]  }
 0x412   :  { %3076 = vmatprep.subr.bf16.mxu0 %v9316_v25  ;;  %3182 = vmatprep.subr.bf16.mxu1 %v9319_v18  ;;  %v9397_v25 = vld [vmem:[#allocation9 + $0x60c] ss:$16 sps:$4 sm:$0xff]   ;;  %v1966_v18 = vld [vmem:[#allocation8 + $0x4] sm:$0xf] }
 0x415   :  { %3077 = vmatpush1.bf16.msra.mxu0 %v9314_v26  ;;  %3183 = vmatpush1.bf16.msra.mxu1 %v9317_v27  ;;  %v1971_v26 = vrot.slane %v1966_v18, %v10584_v44  ;;  %v1979_v27 = vrot.slane %v1966_v18, %v10590_v46 }
 0x416   :  { %3078 = vmatprep.subr.bf16.mxu0 %v9322_v28  ;;  %3184 = vmatprep.subr.bf16.mxu1 %v9325_v57  ;;  %v1975_v28 = vrot.slane %v1966_v18, %v10587_v45  ;;  %v1983_v57 = vrot.slane %v1966_v18, %v10593_v47  ;;  %v9398_v18 = vld [vmem:[#allocation9 + $0x620] ss:$16 sps:$4 sm:$0xff]  }
 0x419   :  { %3079 = vmatpush1.bf16.msra.mxu0 %v9320_v29  ;;  %3185 = vmatpush1.bf16.msra.mxu1 %v9323_v30 }
 0x41a   :  { %3080 = vmatprep.subr.bf16.mxu0 %v9328_v31  ;;  %3186 = vmatprep.subr.bf16.mxu1 %v9331_v32 }
 0x41d   :  { %3081 = vmatpush1.bf16.msra.mxu0 %v9326_v33  ;;  %3187 = vmatpush1.bf16.msra.mxu1 %v9329_v34 }
 0x41e   :  { %3082 = vmatprep.subr.bf16.mxu0 %v9334_v35  ;;  %3188 = vmatprep.subr.bf16.mxu1 %v9337_v36 }
 0x421   :  { %3083 = vmatpush1.bf16.msra.mxu0 %v9332_v37  ;;  %3189 = vmatpush1.bf16.msra.mxu1 %v9335_v38 }
 0x422   :  { %3084 = vmatprep.subr.bf16.mxu0 %v9340_v39  ;;  %3190 = vmatprep.subr.bf16.mxu1 %v9343_v40 }
 0x425   :  { %3085 = vmatpush1.bf16.msra.mxu0 %v9338_v43  ;;  %3191 = vmatpush1.bf16.msra.mxu1 %v9341_v48 }
 0x426   :  { %3086 = vmatprep.subr.bf16.mxu0 %v9346_v12  ;;  %3192 = vmatprep.subr.bf16.mxu1 %v9349_v51 }
 0x429   :  { %3087 = vmatpush1.bf16.msra.mxu0 %v9344_v54  ;;  %3193 = vmatpush1.bf16.msra.mxu1 %v9347_v49 }
 0x42a   :  { %3088 = vmatprep.subr.bf16.mxu0 %v9352_v55  ;;  %3194 = vmatprep.subr.bf16.mxu1 %v9355_v56 }
 0x42d   :  { %3089 = vmatpush1.bf16.msra.mxu0 %v9350_v53  ;;  %3195 = vmatpush1.bf16.msra.mxu1 %v9353_v50 }
 0x42e   :  { %3090 = vmatprep.subr.bf16.mxu0 %v9358_v58  ;;  %3196 = vmatprep.subr.bf16.mxu1 %v9361_v21 }
 0x431   :  { %3091 = vmatpush1.bf16.msra.mxu0 %v9356_v59  ;;  %3197 = vmatpush1.bf16.msra.mxu1 %v9359_v61 }
 0x432   :  { %3092 = vmatprep.subr.bf16.mxu0 %v9364_v62  ;;  %3198 = vmatprep.subr.bf16.mxu1 %v9367_v63 }
 0x435   :  { %3093 = vmatpush1.bf16.msra.mxu0 %v9362_v1  ;;  %3199 = vmatpush1.bf16.msra.mxu1 %v9365_v2 }
 0x436   :  { %3094 = vmatprep.subr.bf16.mxu0 %v9370_v3  ;;  %3200 = vmatprep.subr.bf16.mxu1 %v9373_v4  ;;  %v9392_v3 = vld [vmem:[#allocation9 + $0x600] ss:$16 sps:$4 sm:$0xff]   ;;  %v9395_v4 = vld [vmem:[#allocation9 + $0x608] ss:$16 sps:$4 sm:$0xff]  }
 0x439   :  { %3095 = vmatpush1.bf16.msra.mxu0 %v9368_v5  ;;  %3201 = vmatpush1.bf16.msra.mxu1 %v9371_v6 }
 0x43a   :  { %3096 = vmatprep.subr.bf16.mxu0 %v9376_v7  ;;  %3202 = vmatprep.subr.bf16.mxu1 %v9379_v8 }
 0x43d   :  { %3097 = vmatpush1.bf16.msra.mxu0 %v9374_v9  ;;  %3203 = vmatpush1.bf16.msra.mxu1 %v9377_v10  ;;  %v9400_v9 = vld [vmem:[#allocation9 + $0x624] ss:$16 sps:$4 sm:$0xff]   ;;  %v9403_v10 = vld [vmem:[#allocation9 + $0x62c] ss:$16 sps:$4 sm:$0xff]  }
 0x43e   :  { %3098 = vmatprep.subr.bf16.mxu0 %v9382_v11  ;;  %3204 = vmatprep.subr.bf16.mxu1 %v9385_v13 }
 0x441   :  { %3099 = vmatpush1.bf16.msra.mxu0 %v9380_v14  ;;  %3205 = vmatpush1.bf16.msra.mxu1 %v9383_v15 }
 0x442   :  { %3100 = vmatprep.subr.bf16.mxu0 %v9388_v16  ;;  %3206 = vmatprep.subr.bf16.mxu1 %v9391_v17 }
 0x445   :  { %3101 = vmatpush1.bf16.msra.mxu0 %v9386_v22  ;;  %3207 = vmatpush1.bf16.msra.mxu1 %v9389_v23 }
 0x446   :  { %3123 = vmatprep.subr.bf16.mxu0 %v9394_v24  ;;  %3229 = vmatprep.subr.bf16.mxu1 %v9397_v25 }
 0x4da   :  { %v2182_v29 = vpop.f32.mrb[24].mxu0  ;;  %v2235_v30 = vpop.f32.mrb[32].mxu1 }
 0x4db   :  { %v2183_v31 = vadd.f32 %v2182_v29, %v1971_v26  ;;  %v2236_v32 = vadd.f32 %v2235_v30, %v1979_v27  ;;  %v2184_v33 = vpop.f32.mrb[25].mxu0  ;;  %v2237_v34 = vpop.f32.mrb[33].mxu1  ;;  %v9401_v29 = vld [vmem:[#allocation9 + $0x628] ss:$16 sps:$4 sm:$0xff]   ;;  %v9406_v30 = vld [vmem:[#allocation9 + $0x644] ss:$16 sps:$4 sm:$0xff]  }
 0x4dc   :  { %v2185_v35 = vadd.f32 %v2184_v33, %v1975_v28  ;;  %v2238_v36 = vadd.f32 %v2237_v34, %v1983_v57  ;;  %v2186_v37 = vpop.f32.mrb[26].mxu0  ;;  %v2239_v38 = vpop.f32.mrb[34].mxu1 }
 0x4dd   :  { %v2187_v39 = vadd.f32 %v2186_v37, %v1971_v26  ;;  %v2240_v40 = vadd.f32 %v2239_v38, %v1979_v27  ;;  %v2188_v43 = vpop.f32.mrb[27].mxu0  ;;  %v2241_v48 = vpop.f32.mrb[35].mxu1  ;;  %v2254_v54 = vmax.f32 %v2183_v31, 0.0  ;;  %v2256_v49 = vmax.f32 %v2236_v32, 0.0 }
 0x4de   :  { %v2189_v12 = vadd.f32 %v2188_v43, %v1975_v28  ;;  %v2242_v51 = vadd.f32 %v2241_v48, %v1983_v57  ;;  %v2255_v53 = vmax.f32 %v2185_v35, 0.0  ;;  %v2257_v50 = vmax.f32 %v2238_v36, 0.0  ;;  %v9409_v35 = vld [vmem:[#allocation9 + $0x64c] ss:$16 sps:$4 sm:$0xff]   ;;  %v9407_v43 = vld [vmem:[#allocation9 + $0x648] ss:$16 sps:$4 sm:$0xff]  }
 0x4df   :  { %v2258_v55 = vmax.f32 %v2187_v39, 0.0  ;;  %v2260_v56 = vmax.f32 %v2240_v40, 0.0  ;;  %v9404_v40 = vld [vmem:[#allocation9 + $0x640] ss:$16 sps:$4 sm:$0xff]   ;;  %v9412_v48 = vld [vmem:[#allocation9 + $0x664] ss:$16 sps:$4 sm:$0xff]  }
 0x4e0   :  { %v2259_v58 = vmax.f32 %v2189_v12, 0.0  ;;  %v2261_v21 = vmax.f32 %v2242_v51, 0.0  ;;  %v9415_v12 = vld [vmem:[#allocation9 + $0x66c] ss:$16 sps:$4 sm:$0xff]   ;;  %v9410_v51 = vld [vmem:[#allocation9 + $0x660] ss:$16 sps:$4 sm:$0xff]  }
 0x4e1   :  { %v2270_v59 = vpack.c.bf16 %v2258_v55, %v2254_v54  ;;  %v10657_v61 = vpack.c.bf16 %v2260_v56, %v2256_v49  ;;  %v9413_v54 = vld [vmem:[#allocation9 + $0x668] ss:$16 sps:$4 sm:$0xff]   ;;  %v9418_v49 = vld [vmem:[#allocation9 + $0x684] ss:$16 sps:$4 sm:$0xff]   ;;  %v9421_v55 = vld [vmem:[#allocation9 + $0x68c] ss:$16 sps:$4 sm:$0xff]  }
 0x4e2   :  { %v2271_v62 = vpack.c.bf16 %v2259_v58, %v2255_v53  ;;  %v2273_v63 = vpack.c.bf16 %v2261_v21, %v2257_v50  ;;  %v2192_v1 = vpop.f32.mrb[28].mxu0  ;;  %v2245_v2 = vpop.f32.mrb[36].mxu1  ;;  %v9416_v56 = vld [vmem:[#allocation9 + $0x680] ss:$16 sps:$4 sm:$0xff]   ;;  %v9419_v53 = vld [vmem:[#allocation9 + $0x688] ss:$16 sps:$4 sm:$0xff]  }
 0x4e3   :  { %v2193_v5 = vadd.f32 %v2192_v1, %v1971_v26  ;;  %v2246_v6 = vadd.f32 %v2245_v2, %v1979_v27  ;;  %v2194_v7 = vpop.f32.mrb[29].mxu0  ;;  %v2247_v8 = vpop.f32.mrb[37].mxu1  ;;  %v9424_v50 = vld [vmem:[#allocation9 + $0x6a4] ss:$16 sps:$4 sm:$0xff]   ;;  %v9427_v58 = vld [vmem:[#allocation9 + $0x6ac] ss:$16 sps:$4 sm:$0xff]  }
 0x4e4   :  { %v2195_v11 = vadd.f32 %v2194_v7, %v1975_v28  ;;  %v2248_v13 = vadd.f32 %v2247_v8, %v1983_v57  ;;  %v2196_v14 = vpop.f32.mrb[30].mxu0  ;;  %v2249_v15 = vpop.f32.mrb[38].mxu1  ;;  %3102 = vmatprep.mubr.bf16.mxu0 %v2271_v62  ;;  %3208 = vmatprep.mubr.bf16.mxu1 %v2271_v62  ;;  %v9422_v21 = vld [vmem:[#allocation9 + $0x6a0] ss:$16 sps:$4 sm:$0xff]   ;;  %v9430_v62 = vld [vmem:[#allocation9 + $0x6c4] ss:$16 sps:$4 sm:$0xff]  }
 0x4e5   :  { %v2197_v16 = vadd.f32 %v2196_v14, %v1971_v26  ;;  %v2250_v17 = vadd.f32 %v2249_v15, %v1979_v27  ;;  %v2198_v22 = vpop.f32.mrb[31].mxu0  ;;  %v2251_v23 = vpop.f32.mrb[39].mxu1  ;;  %3103 = vmatmul.mubr.bf16.vlgmr.msra.gmra.mrb[32].mxu0 %v2270_v59  ;;  %3209 = vmatmul.mubr.bf16.vlgmr.msra.gmra.mrb[40].mxu1 %v2270_v59  ;;  %v2262_v31 = vmax.f32 %v2193_v5, 0.0  ;;  %v2264_v32 = vmax.f32 %v2246_v6, 0.0  ;;  %v9425_v59 = vld [vmem:[#allocation9 + $0x6a8] ss:$16 sps:$4 sm:$0xff]  }
 0x4e6   :  { %v2199_v24 = vadd.f32 %v2198_v22, %v1975_v28  ;;  %v2252_v25 = vadd.f32 %v2251_v23, %v1983_v57  ;;  %3124 = vmatpush1.bf16.msra.mxu0 %v9392_v3  ;;  %3230 = vmatpush1.bf16.msra.mxu1 %v9395_v4  ;;  %v2263_v26 = vmax.f32 %v2195_v11, 0.0  ;;  %v2265_v27 = vmax.f32 %v2248_v13, 0.0  ;;  %v9428_v1 = vld [vmem:[#allocation9 + $0x6c0] ss:$16 sps:$4 sm:$0xff]   ;;  %v9431_v2 = vld [vmem:[#allocation9 + $0x6c8] ss:$16 sps:$4 sm:$0xff]  }
 0x4e7   :  { %v2266_v33 = vmax.f32 %v2197_v16, 0.0  ;;  %v2268_v34 = vmax.f32 %v2250_v17, 0.0  ;;  %3125 = vmatprep.subr.bf16.mxu0 %v9400_v9  ;;  %3231 = vmatprep.subr.bf16.mxu1 %v9403_v10  ;;  %v9436_v3 = vld [vmem:[#allocation9 + $0x6e4] ss:$16 sps:$4 sm:$0xff]   ;;  %v9439_v4 = vld [vmem:[#allocation9 + $0x6ec] ss:$16 sps:$4 sm:$0xff]  }
 0x4e8   :  { %v2267_v36 = vmax.f32 %v2199_v24, 0.0  ;;  %v2269_v37 = vmax.f32 %v2252_v25, 0.0  ;;  %v9434_v5 = vld [vmem:[#allocation9 + $0x6e0] ss:$16 sps:$4 sm:$0xff]   ;;  %v9437_v6 = vld [vmem:[#allocation9 + $0x6e8] ss:$16 sps:$4 sm:$0xff]  }
 0x4e9   :  { %v2274_v38 = vpack.c.bf16 %v2266_v33, %v2262_v31  ;;  %v10659_v39 = vpack.c.bf16 %v2268_v34, %v2264_v32  ;;  %v9442_v7 = vld [vmem:[#allocation9 + $0x704] ss:$16 sps:$4 sm:$0xff]   ;;  %v9445_v8 = vld [vmem:[#allocation9 + $0x70c] ss:$16 sps:$4 sm:$0xff]   ;;  %v9440_v9 = vld [vmem:[#allocation9 + $0x700] ss:$16 sps:$4 sm:$0xff]  }
 0x4ea   :  { %v2275_v28 = vpack.c.bf16 %v2267_v36, %v2263_v26  ;;  %v10661_v57 = vpack.c.bf16 %v2269_v37, %v2265_v27  ;;  %3126 = vmatpush1.bf16.msra.mxu0 %v9398_v18  ;;  %3232 = vmatpush1.bf16.msra.mxu1 %v9401_v29  ;;  %v9443_v10 = vld [vmem:[#allocation9 + $0x708] ss:$16 sps:$4 sm:$0xff]   ;;  %v9448_v11 = vld [vmem:[#allocation9 + $0x724] ss:$16 sps:$4 sm:$0xff]   ;;  %v9451_v13 = vld [vmem:[#allocation9 + $0x72c] ss:$16 sps:$4 sm:$0xff]  }
 0x4eb   :  { %3127 = vmatprep.subr.bf16.mxu0 %v9406_v30  ;;  %3233 = vmatprep.subr.bf16.mxu1 %v9409_v35  ;;  %v9446_v14 = vld [vmem:[#allocation9 + $0x720] ss:$16 sps:$4 sm:$0xff]   ;;  %v9449_v15 = vld [vmem:[#allocation9 + $0x728] ss:$16 sps:$4 sm:$0xff]   ;;  %v9454_v16 = vld [vmem:[#allocation9 + $0x744] ss:$16 sps:$4 sm:$0xff]  }
 0x4ec   :  { %3112 = vmatprep.mubr.bf16.mxu0 %v2275_v28  ;;  %3218 = vmatprep.mubr.bf16.mxu1 %v2275_v28  ;;  %v9457_v17 = vld [vmem:[#allocation9 + $0x74c] ss:$16 sps:$4 sm:$0xff]   ;;  %v9452_v22 = vld [vmem:[#allocation9 + $0x740] ss:$16 sps:$4 sm:$0xff]   ;;  %v9455_v23 = vld [vmem:[#allocation9 + $0x748] ss:$16 sps:$4 sm:$0xff]  }
 0x4ed   :  { %3113 = vmatmul.mubr.bf16.gmra.mrb[36].mxu0 %v2274_v38  ;;  %3219 = vmatmul.mubr.bf16.gmra.mrb[44].mxu1 %v2274_v38  ;;  %v9460_v24 = vld [vmem:[#allocation9 + $0x764] ss:$16 sps:$4 sm:$0xff]   ;;  %v9463_v25 = vld [vmem:[#allocation9 + $0x76c] ss:$16 sps:$4 sm:$0xff]   ;;  %v9458_v18 = vld [vmem:[#allocation9 + $0x760] ss:$16 sps:$4 sm:$0xff]  }
 0x4ee   :  { %3128 = vmatpush1.bf16.msra.mxu0 %v9404_v40  ;;  %3234 = vmatpush1.bf16.msra.mxu1 %v9407_v43  ;;  %v9461_v29 = vld [vmem:[#allocation9 + $0x768] ss:$16 sps:$4 sm:$0xff]   ;;  %v9466_v30 = vld [vmem:[#allocation9 + $0x784] ss:$16 sps:$4 sm:$0xff]   ;;  %v9469_v31 = vld [vmem:[#allocation9 + $0x78c] ss:$16 sps:$4 sm:$0xff]  }
 0x4ef   :  { %3155 = vmatprep.mubr.bf16.mxu0 %v2273_v63  ;;  %3261 = vmatprep.mubr.bf16.mxu1 %v2273_v63  ;;  %v9433_v63 = vld [vmem:[#allocation9 + $0x6cc] ss:$16 sps:$4 sm:$0xff]   ;;  %v9464_v32 = vld [vmem:[#allocation9 + $0x780] ss:$16 sps:$4 sm:$0xff]   ;;  %v9467_v33 = vld [vmem:[#allocation9 + $0x788] ss:$16 sps:$4 sm:$0xff]  }
 0x4f0   :  { %3129 = vmatprep.subr.bf16.mxu0 %v9412_v48  ;;  %3235 = vmatprep.subr.bf16.mxu1 %v9415_v12  ;;  %v9472_v34 = vld [vmem:[#allocation9 + $0x7a4] ss:$16 sps:$4 sm:$0xff]   ;;  %v9475_v35 = vld [vmem:[#allocation9 + $0x7ac] ss:$16 sps:$4 sm:$0xff]   ;;  %v9470_v26 = vld [vmem:[#allocation9 + $0x7a0] ss:$16 sps:$4 sm:$0xff]  }
 0x4f1   :  { %v9473_v27 = vld [vmem:[#allocation9 + $0x7a8] ss:$16 sps:$4 sm:$0xff]   ;;  %v9478_v36 = vld [vmem:[#allocation9 + $0x7c4] ss:$16 sps:$4 sm:$0xff]   ;;  %v9481_v37 = vld [vmem:[#allocation9 + $0x7cc] ss:$16 sps:$4 sm:$0xff]  }
 0x4f2   :  { %3130 = vmatpush1.bf16.msra.mxu0 %v9410_v51  ;;  %3236 = vmatpush1.bf16.msra.mxu1 %v9413_v54  ;;  %v9476_v38 = vld [vmem:[#allocation9 + $0x7c0] ss:$16 sps:$4 sm:$0xff]   ;;  %v9479_v28 = vld [vmem:[#allocation9 + $0x7c8] ss:$16 sps:$4 sm:$0xff]   ;;  %v9484_v40 = vld [vmem:[#allocation9 + $0x7e4] ss:$16 sps:$4 sm:$0xff]  }
 0x4f3   :  { %3131 = vmatprep.subr.bf16.mxu0 %v9418_v49  ;;  %3237 = vmatprep.subr.bf16.mxu1 %v9421_v55  ;;  %v9487_v43 = vld [vmem:[#allocation9 + $0x7ec] ss:$16 sps:$4 sm:$0xff]   ;;  %v9482_v48 = vld [vmem:[#allocation9 + $0x7e0] ss:$16 sps:$4 sm:$0xff]   ;;  %v9485_v12 = vld [vmem:[#allocation9 + $0x7e8] ss:$16 sps:$4 sm:$0xff]  }
 0x4f4   :  { %v9488_v51 = vld [vmem:[#allocation12 + $0x140] sm:$0xff]  }
 0x4f5   :  { %v9489_v54 = vld [vmem:[#allocation12 + $0x1c0] sm:$0xff]  }
 0x4f6   :  { %3132 = vmatpush1.bf16.msra.mxu0 %v9416_v56  ;;  %3238 = vmatpush1.bf16.msra.mxu1 %v9419_v53  ;;  %v9490_v49 = vld [vmem:[#allocation12 + $0x100] sm:$0xff]   ;;  %v9492_v56 = vld [vmem:[#allocation12 + $0x148] sm:$0xff]  }
 0x4f7   :  { %3133 = vmatprep.subr.bf16.mxu0 %v9424_v50  ;;  %3239 = vmatprep.subr.bf16.mxu1 %v9427_v58  ;;  %v9491_v55 = vld [vmem:[#allocation12 + $0x180] sm:$0xff]   ;;  %v9493_v53 = vld [vmem:[#allocation12 + $0x1c8] sm:$0xff]  }
 0x4f8   :  { %v9494_v50 = vld [vmem:[#allocation12 + $0x108] sm:$0xff]  }
 0x4f9   :  { %v9495_v58 = vld [vmem:[#allocation12 + $0x188] sm:$0xff]  }
 0x4fa   :  { %3134 = vmatpush1.bf16.msra.mxu0 %v9422_v21  ;;  %3240 = vmatpush1.bf16.msra.mxu1 %v9425_v59  ;;  %v9496_v21 = vld [vmem:[#allocation12 + $0x150] sm:$0xff]  }
 0x4fb   :  { %3135 = vmatprep.subr.bf16.mxu0 %v9430_v62  ;;  %3241 = vmatprep.subr.bf16.mxu1 %v9433_v63  ;;  %v9497_v59 = vld [vmem:[#allocation12 + $0x1d0] sm:$0xff]  }
 0x4fc   :  { %v9498_v62 = vld [vmem:[#allocation12 + $0x110] sm:$0xff]  }
 0x4fd   :  { %v9499_v63 = vld [vmem:[#allocation12 + $0x190] sm:$0xff]  }
 0x4fe   :  { %3136 = vmatpush1.bf16.msra.mxu0 %v9428_v1  ;;  %3242 = vmatpush1.bf16.msra.mxu1 %v9431_v2  ;;  %v9500_v1 = vld [vmem:[#allocation12 + $0x158] sm:$0xff]  }
 0x4ff   :  { %3137 = vmatprep.subr.bf16.mxu0 %v9436_v3  ;;  %3243 = vmatprep.subr.bf16.mxu1 %v9439_v4  ;;  %v9503_v2 = vld [vmem:[#allocation12 + $0x198] sm:$0xff]   ;;  %v9504_v3 = vld [vmem:[#allocation12 + $0x160] sm:$0xff]  }
 0x500   :  { %v9505_v4 = vld [vmem:[#allocation12 + $0x1e0] sm:$0xff]  }
 0x502   :  { %3138 = vmatpush1.bf16.msra.mxu0 %v9434_v5  ;;  %3244 = vmatpush1.bf16.msra.mxu1 %v9437_v6  ;;  %v9506_v5 = vld [vmem:[#allocation12 + $0x120] sm:$0xff]  }
 0x503   :  { %3139 = vmatprep.subr.bf16.mxu0 %v9442_v7  ;;  %3245 = vmatprep.subr.bf16.mxu1 %v9445_v8  ;;  %v9507_v6 = vld [vmem:[#allocation12 + $0x1a0] sm:$0xff]   ;;  %v9508_v7 = vld [vmem:[#allocation12 + $0x168] sm:$0xff]  }
 0x504   :  { %v9509_v8 = vld [vmem:[#allocation12 + $0x1e8] sm:$0xff]  }
 0x506   :  { %3140 = vmatpush1.bf16.msra.mxu0 %v9440_v9  ;;  %3246 = vmatpush1.bf16.msra.mxu1 %v9443_v10  ;;  %v9511_v9 = vld [vmem:[#allocation12 + $0x1a8] sm:$0xff]   ;;  %v9512_v10 = vld [vmem:[#allocation12 + $0x170] sm:$0xff]  }
 0x507   :  { %3141 = vmatprep.subr.bf16.mxu0 %v9448_v11  ;;  %3247 = vmatprep.subr.bf16.mxu1 %v9451_v13  ;;  %v9513_v11 = vld [vmem:[#allocation12 + $0x1f0] sm:$0xff]  }
 0x508   :  { %v9514_v13 = vld [vmem:[#allocation12 + $0x130] sm:$0xff]  }
 0x50a   :  { %3142 = vmatpush1.bf16.msra.mxu0 %v9446_v14  ;;  %3248 = vmatpush1.bf16.msra.mxu1 %v9449_v15  ;;  %v9515_v14 = vld [vmem:[#allocation12 + $0x1b0] sm:$0xff]   ;;  %v9516_v15 = vld [vmem:[#allocation12 + $0x178] sm:$0xff]  }
 0x50b   :  { %3143 = vmatprep.subr.bf16.mxu0 %v9454_v16  ;;  %3249 = vmatprep.subr.bf16.mxu1 %v9457_v17  ;;  %v9517_v16 = vld [vmem:[#allocation12 + $0x1f8] sm:$0xff]  }
 0x50c   :  { %v9518_v17 = vld [vmem:[#allocation12 + $0x138] sm:$0xff]  }
 0x50e   :  { %3144 = vmatpush1.bf16.msra.mxu0 %v9452_v22  ;;  %3250 = vmatpush1.bf16.msra.mxu1 %v9455_v23  ;;  %v9519_v22 = vld [vmem:[#allocation12 + $0x1b8] sm:$0xff]  }
 0x50f   :  { %3145 = vmatprep.subr.bf16.mxu0 %v9460_v24  ;;  %3251 = vmatprep.subr.bf16.mxu1 %v9463_v25  ;;  %v9522_v23 = vld [vmem:[#allocation6 + $0x204] ss:$16 sps:$4 sm:$0xff]   ;;  %v9525_v24 = vld [vmem:[#allocation6 + $0x20c] ss:$16 sps:$4 sm:$0xff]   ;;  %v2408_v25 = vld [vmem:[#allocation11 + $0x4] sm:$0xf] }
 0x512   :  { %3146 = vmatpush1.bf16.msra.mxu0 %v9458_v18  ;;  %3252 = vmatpush1.bf16.msra.mxu1 %v9461_v29  ;;  %v2413_v18 = vrot.slane %v2408_v25, %v10584_v44  ;;  %v2421_v29 = vrot.slane %v2408_v25, %v10590_v46 }
 0x513   :  { %3147 = vmatprep.subr.bf16.mxu0 %v9466_v30  ;;  %3253 = vmatprep.subr.bf16.mxu1 %v9469_v31  ;;  %v2417_v30 = vrot.slane %v2408_v25, %v10587_v45  ;;  %v2425_v31 = vrot.slane %v2408_v25, %v10593_v47  ;;  %v9526_v25 = vld [vmem:[#allocation6 + $0x220] ss:$16 sps:$4 sm:$0xff]  }
 0x516   :  { %3148 = vmatpush1.bf16.msra.mxu0 %v9464_v32  ;;  %3254 = vmatpush1.bf16.msra.mxu1 %v9467_v33 }
 0x517   :  { %3149 = vmatprep.subr.bf16.mxu0 %v9472_v34  ;;  %3255 = vmatprep.subr.bf16.mxu1 %v9475_v35 }
 0x51a   :  { %3150 = vmatpush1.bf16.msra.mxu0 %v9470_v26  ;;  %3256 = vmatpush1.bf16.msra.mxu1 %v9473_v27 }
 0x51b   :  { %3151 = vmatprep.subr.bf16.mxu0 %v9478_v36  ;;  %3257 = vmatprep.subr.bf16.mxu1 %v9481_v37 }
 0x51e   :  { %3152 = vmatpush1.bf16.msra.mxu0 %v9476_v38  ;;  %3258 = vmatpush1.bf16.msra.mxu1 %v9479_v28 }
 0x51f   :  { %3153 = vmatprep.subr.bf16.mxu0 %v9484_v40  ;;  %3259 = vmatprep.subr.bf16.mxu1 %v9487_v43 }
 0x522   :  { %3154 = vmatpush1.bf16.msra.mxu0 %v9482_v48  ;;  %3260 = vmatpush1.bf16.msra.mxu1 %v9485_v12 }
 0x523   :  { %8639 = vmatprep.subr.bf16.mxu0 %v9488_v51  ;;  %8667 = vmatprep.subr.bf16.mxu1 %v9489_v54 }
 0x525   :  { %3156 = vmatmul.mubr.bf16.vlgmr.msra.gmra.mrb[32].mxu0 %v10657_v61  ;;  %3262 = vmatmul.mubr.bf16.vlgmr.msra.gmra.mrb[40].mxu1 %v10657_v61  ;;  %v9501_v61 = vld [vmem:[#allocation12 + $0x1d8] sm:$0xff]  }
 0x526   :  { %3165 = vmatprep.mubr.bf16.mxu0 %v10661_v57  ;;  %3271 = vmatprep.mubr.bf16.mxu1 %v10661_v57  ;;  %v9502_v57 = vld [vmem:[#allocation12 + $0x118] sm:$0xff]  }
 0x527   :  { %8640 = vmatpush3.bf16.msra.mxu0 %v9490_v49  ;;  %8668 = vmatpush3.bf16.msra.mxu1 %v9491_v55 }
 0x528   :  { %8641 = vmatprep.subr.bf16.mxu0 %v9492_v56  ;;  %8669 = vmatprep.subr.bf16.mxu1 %v9493_v53 }
 0x52b   :  { %8642 = vmatpush3.bf16.msra.mxu0 %v9494_v50  ;;  %8670 = vmatpush3.bf16.msra.mxu1 %v9495_v58 }
 0x52c   :  { %8643 = vmatprep.subr.bf16.mxu0 %v9496_v21  ;;  %8671 = vmatprep.subr.bf16.mxu1 %v9497_v59 }
 0x52d   :  { %3166 = vmatmul.mubr.bf16.gmra.mrb[36].mxu0 %v10659_v39  ;;  %3272 = vmatmul.mubr.bf16.gmra.mrb[44].mxu1 %v10659_v39  ;;  %v9510_v39 = vld [vmem:[#allocation12 + $0x128] sm:$0xff]  }
 0x52f   :  { %8644 = vmatpush3.bf16.msra.mxu0 %v9498_v62  ;;  %8672 = vmatpush3.bf16.msra.mxu1 %v9499_v63 }
 0x530   :  { %8645 = vmatprep.subr.bf16.mxu0 %v9500_v1  ;;  %8673 = vmatprep.subr.bf16.mxu1 %v9501_v61 }
 0x533   :  { %8646 = vmatpush3.bf16.msra.mxu0 %v9502_v57  ;;  %8674 = vmatpush3.bf16.msra.mxu1 %v9503_v2 }
 0x534   :  { %8647 = vmatprep.subr.bf16.mxu0 %v9504_v3  ;;  %8675 = vmatprep.subr.bf16.mxu1 %v9505_v4  ;;  %v9520_v3 = vld [vmem:[#allocation6 + $0x200] ss:$16 sps:$4 sm:$0xff]   ;;  %v9523_v4 = vld [vmem:[#allocation6 + $0x208] ss:$16 sps:$4 sm:$0xff]  }
 0x537   :  { %8648 = vmatpush3.bf16.msra.mxu0 %v9506_v5  ;;  %8676 = vmatpush3.bf16.msra.mxu1 %v9507_v6 }
 0x538   :  { %8649 = vmatprep.subr.bf16.mxu0 %v9508_v7  ;;  %8677 = vmatprep.subr.bf16.mxu1 %v9509_v8 }
 0x53b   :  { %8650 = vmatpush3.bf16.msra.mxu0 %v9510_v39  ;;  %8678 = vmatpush3.bf16.msra.mxu1 %v9511_v9  ;;  %v9528_v39 = vld [vmem:[#allocation6 + $0x224] ss:$16 sps:$4 sm:$0xff]   ;;  %v9531_v9 = vld [vmem:[#allocation6 + $0x22c] ss:$16 sps:$4 sm:$0xff]  }
 0x53c   :  { %8651 = vmatprep.subr.bf16.mxu0 %v9512_v10  ;;  %8679 = vmatprep.subr.bf16.mxu1 %v9513_v11 }
 0x53f   :  { %8652 = vmatpush3.bf16.msra.mxu0 %v9514_v13  ;;  %8680 = vmatpush3.bf16.msra.mxu1 %v9515_v14 }
 0x540   :  { %8653 = vmatprep.subr.bf16.mxu0 %v9516_v15  ;;  %8681 = vmatprep.subr.bf16.mxu1 %v9517_v16 }
 0x543   :  { %8654 = vmatpush3.bf16.msra.mxu0 %v9518_v17  ;;  %8682 = vmatpush3.bf16.msra.mxu1 %v9519_v22 }
 0x544   :  { %3895 = vmatprep.subr.bf16.mxu0 %v9522_v23  ;;  %3948 = vmatprep.subr.bf16.mxu1 %v9525_v24 }
 0x5f8   :  { %v3157_v32 = vpop.f32.mrb[32].mxu0  ;;  %v3263_v33 = vpop.f32.mrb[40].mxu1 }
 0x5f9   :  { %v8863_v34 = vadd.f32 %v3157_v32, %v2413_v18  ;;  %v8871_v35 = vadd.f32 %v3263_v33, %v2421_v29  ;;  %v3159_v26 = vpop.f32.mrb[33].mxu0  ;;  %v3265_v27 = vpop.f32.mrb[41].mxu1  ;;  %v9529_v32 = vld [vmem:[#allocation6 + $0x228] ss:$16 sps:$4 sm:$0xff]   ;;  %v9534_v33 = vld [vmem:[#allocation6 + $0x244] ss:$16 sps:$4 sm:$0xff]  }
 0x5fa   :  { %v8864_v36 = vadd.f32 %v3159_v26, %v2417_v30  ;;  %v8872_v37 = vadd.f32 %v3265_v27, %v2425_v31  ;;  %v3161_v38 = vpop.f32.mrb[34].mxu0  ;;  %v3267_v28 = vpop.f32.mrb[42].mxu1 }
 0x5fb   :  { %v8865_v40 = vadd.f32 %v3161_v38, %v2413_v18  ;;  %v8873_v43 = vadd.f32 %v3267_v28, %v2421_v29  ;;  %v3163_v48 = vpop.f32.mrb[35].mxu0  ;;  %v3269_v12 = vpop.f32.mrb[43].mxu1  ;;  %v3282_v49 = vmax.f32 %v8863_v34, 0.0  ;;  %v3284_v55 = vmax.f32 %v8871_v35, 0.0 }
 0x5fc   :  { %v8866_v51 = vadd.f32 %v3163_v48, %v2417_v30  ;;  %v8874_v54 = vadd.f32 %v3269_v12, %v2425_v31  ;;  %v3283_v50 = vmax.f32 %v8864_v36, 0.0  ;;  %v3285_v58 = vmax.f32 %v8872_v37, 0.0  ;;  %v9537_v36 = vld [vmem:[#allocation6 + $0x24c] ss:$16 sps:$4 sm:$0xff]   ;;  %v9535_v48 = vld [vmem:[#allocation6 + $0x248] ss:$16 sps:$4 sm:$0xff]  }
 0x5fd   :  { %v3286_v56 = vmax.f32 %v8865_v40, 0.0  ;;  %v3288_v53 = vmax.f32 %v8873_v43, 0.0  ;;  %v9532_v43 = vld [vmem:[#allocation6 + $0x240] ss:$16 sps:$4 sm:$0xff]   ;;  %v9540_v12 = vld [vmem:[#allocation6 + $0x264] ss:$16 sps:$4 sm:$0xff]  }
 0x5fe   :  { %v3287_v21 = vmax.f32 %v8866_v51, 0.0  ;;  %v3289_v59 = vmax.f32 %v8874_v54, 0.0  ;;  %v9543_v51 = vld [vmem:[#allocation6 + $0x26c] ss:$16 sps:$4 sm:$0xff]   ;;  %v9538_v54 = vld [vmem:[#allocation6 + $0x260] ss:$16 sps:$4 sm:$0xff]  }
 0x5ff   :  { %v3298_v62 = vpack.c.bf16 %v3286_v56, %v3282_v49  ;;  %v3300_v63 = vpack.c.bf16 %v3288_v53, %v3284_v55  ;;  %v9541_v49 = vld [vmem:[#allocation6 + $0x268] ss:$16 sps:$4 sm:$0xff]   ;;  %v9546_v55 = vld [vmem:[#allocation6 + $0x284] ss:$16 sps:$4 sm:$0xff]   ;;  %v9549_v56 = vld [vmem:[#allocation6 + $0x28c] ss:$16 sps:$4 sm:$0xff]  }
 0x600   :  { %v3299_v1 = vpack.c.bf16 %v3287_v21, %v3283_v50  ;;  %v3301_v61 = vpack.c.bf16 %v3289_v59, %v3285_v58  ;;  %v3167_v57 = vpop.f32.mrb[36].mxu0  ;;  %v3273_v2 = vpop.f32.mrb[44].mxu1  ;;  %v9544_v53 = vld [vmem:[#allocation6 + $0x280] ss:$16 sps:$4 sm:$0xff]   ;;  %v9547_v50 = vld [vmem:[#allocation6 + $0x288] ss:$16 sps:$4 sm:$0xff]  }
 0x601   :  { %v8867_v5 = vadd.f32 %v3167_v57, %v2413_v18  ;;  %v8875_v6 = vadd.f32 %v3273_v2, %v2421_v29  ;;  %v3169_v7 = vpop.f32.mrb[37].mxu0  ;;  %v3275_v8 = vpop.f32.mrb[45].mxu1  ;;  %v9552_v58 = vld [vmem:[#allocation6 + $0x2a4] ss:$16 sps:$4 sm:$0xff]   ;;  %v9555_v21 = vld [vmem:[#allocation6 + $0x2ac] ss:$16 sps:$4 sm:$0xff]  }
 0x602   :  { %v8868_v10 = vadd.f32 %v3169_v7, %v2417_v30  ;;  %v8876_v11 = vadd.f32 %v3275_v8, %v2425_v31  ;;  %v3171_v13 = vpop.f32.mrb[38].mxu0  ;;  %v3277_v14 = vpop.f32.mrb[46].mxu1  ;;  %3595 = vmatprep.mubr.bf16.mxu0 %v3299_v1  ;;  %3644 = vmatprep.mubr.bf16.mxu1 %v3301_v61  ;;  %v9550_v59 = vld [vmem:[#allocation6 + $0x2a0] ss:$16 sps:$4 sm:$0xff]   ;;  %v9561_v1 = vld [vmem:[#allocation6 + $0x2cc] ss:$16 sps:$4 sm:$0xff]  }
 0x603   :  { %v8869_v15 = vadd.f32 %v3171_v13, %v2413_v18  ;;  %v8877_v16 = vadd.f32 %v3277_v14, %v2421_v29  ;;  %v3173_v17 = vpop.f32.mrb[39].mxu0  ;;  %v3279_v22 = vpop.f32.mrb[47].mxu1  ;;  %3596 = vmatmul.mubr.bf16.vlgmr.msra.gmra.mrb[40].mxu0 %v3298_v62  ;;  %3645 = vmatmul.mubr.bf16.vlgmr.msra.gmra.mrb[48].mxu1 %v3300_v63  ;;  %v3290_v34 = vmax.f32 %v8867_v5, 0.0  ;;  %v3292_v35 = vmax.f32 %v8875_v6, 0.0  ;;  %v9553_v62 = vld [vmem:[#allocation6 + $0x2a8] ss:$16 sps:$4 sm:$0xff]  }
 0x604   :  { %v8870_v23 = vadd.f32 %v3173_v17, %v2417_v30  ;;  %v8878_v24 = vadd.f32 %v3279_v22, %v2425_v31  ;;  %3896 = vmatpush1.bf16.msra.mxu0 %v9520_v3  ;;  %3949 = vmatpush1.bf16.msra.mxu1 %v9523_v4  ;;  %v3291_v18 = vmax.f32 %v8868_v10, 0.0  ;;  %v3293_v29 = vmax.f32 %v8876_v11, 0.0  ;;  %v9558_v63 = vld [vmem:[#allocation6 + $0x2c4] ss:$16 sps:$4 sm:$0xff]   ;;  %v9556_v61 = vld [vmem:[#allocation6 + $0x2c0] ss:$16 sps:$4 sm:$0xff]  }
 0x605   :  { %v3294_v26 = vmax.f32 %v8869_v15, 0.0  ;;  %v3296_v27 = vmax.f32 %v8877_v16, 0.0  ;;  %3897 = vmatprep.subr.bf16.mxu0 %v9528_v39  ;;  %3950 = vmatprep.subr.bf16.mxu1 %v9531_v9  ;;  %v9559_v57 = vld [vmem:[#allocation6 + $0x2c8] ss:$16 sps:$4 sm:$0xff]   ;;  %v9564_v2 = vld [vmem:[#allocation6 + $0x2e4] ss:$16 sps:$4 sm:$0xff]  }
 0x606   :  { %v3295_v37 = vmax.f32 %v8870_v23, 0.0  ;;  %v3297_v38 = vmax.f32 %v8878_v24, 0.0  ;;  %v9567_v3 = vld [vmem:[#allocation6 + $0x2ec] ss:$16 sps:$4 sm:$0xff]   ;;  %v9562_v4 = vld [vmem:[#allocation6 + $0x2e0] ss:$16 sps:$4 sm:$0xff]  }
 0x607   :  { %v3302_v28 = vpack.c.bf16 %v3294_v26, %v3290_v34  ;;  %v3304_v40 = vpack.c.bf16 %v3296_v27, %v3292_v35  ;;  %v9565_v5 = vld [vmem:[#allocation6 + $0x2e8] ss:$16 sps:$4 sm:$0xff]   ;;  %v9570_v6 = vld [vmem:[#allocation9 + $0x804] ss:$16 sps:$4 sm:$0xff]  }
 0x608   :  { %v3303_v30 = vpack.c.bf16 %v3295_v37, %v3291_v18  ;;  %v3305_v31 = vpack.c.bf16 %v3297_v38, %v3293_v29  ;;  %3898 = vmatpush1.bf16.msra.mxu0 %v9526_v25  ;;  %3951 = vmatpush1.bf16.msra.mxu1 %v9529_v32  ;;  %v9573_v7 = vld [vmem:[#allocation9 + $0x80c] ss:$16 sps:$4 sm:$0xff]  }
 0x609   :  { %3899 = vmatprep.subr.bf16.mxu0 %v9534_v33  ;;  %3952 = vmatprep.subr.bf16.mxu1 %v9537_v36  ;;  %v8133_v33 = vld [vmem:[#allocation14 + $0x1] ss:$0 sm:$0xff] }
 0x60a   :  { %3603 = vmatprep.mubr.bf16.mxu0 %v3303_v30  ;;  %3652 = vmatprep.mubr.bf16.mxu1 %v3305_v31 }
 0x60b   :  { %3604 = vmatmul.mubr.bf16.gmra.mrb[44].mxu0 %v3302_v28  ;;  %3653 = vmatmul.mubr.bf16.gmra.mrb[52].mxu1 %v3304_v40 }
 0x60c   :  { %3900 = vmatpush1.bf16.msra.mxu0 %v9532_v43  ;;  %3953 = vmatpush1.bf16.msra.mxu1 %v9535_v48 }
 0x60d   :  { %3901 = vmatprep.subr.bf16.mxu0 %v9540_v12  ;;  %3954 = vmatprep.subr.bf16.mxu1 %v9543_v51  ;;  %v9568_v12 = vld [vmem:[#allocation9 + $0x800] ss:$16 sps:$4 sm:$0xff]   ;;  %v9571_v51 = vld [vmem:[#allocation9 + $0x808] ss:$16 sps:$4 sm:$0xff]  }
 0x60e   :  { %3927 = vmatprep.mubr.bf16.mxu0 %v10352_v0  ;;  %3980 = vmatprep.mubr.bf16.mxu1 %v10352_v0 }
 0x610   :  { %3902 = vmatpush1.bf16.msra.mxu0 %v9538_v54  ;;  %3955 = vmatpush1.bf16.msra.mxu1 %v9541_v49  ;;  %v9576_v54 = vld [vmem:[#allocation9 + $0x824] ss:$16 sps:$4 sm:$0xff]   ;;  %v9579_v49 = vld [vmem:[#allocation9 + $0x82c] ss:$16 sps:$4 sm:$0xff]  }
 0x611   :  { %3903 = vmatprep.subr.bf16.mxu0 %v9546_v55  ;;  %3956 = vmatprep.subr.bf16.mxu1 %v9549_v56 }
 0x614   :  { %3904 = vmatpush1.bf16.msra.mxu0 %v9544_v53  ;;  %3957 = vmatpush1.bf16.msra.mxu1 %v9547_v50  ;;  %v9574_v50 = vld [vmem:[#allocation9 + $0x820] ss:$16 sps:$4 sm:$0xff]  }
 0x615   :  { %3905 = vmatprep.subr.bf16.mxu0 %v9552_v58  ;;  %3958 = vmatprep.subr.bf16.mxu1 %v9555_v21  ;;  %v9577_v58 = vld [vmem:[#allocation9 + $0x828] ss:$16 sps:$4 sm:$0xff]   ;;  %v9582_v21 = vld [vmem:[#allocation9 + $0x844] ss:$16 sps:$4 sm:$0xff]  }
 0x618   :  { %3906 = vmatpush1.bf16.msra.mxu0 %v9550_v59  ;;  %3959 = vmatpush1.bf16.msra.mxu1 %v9553_v62  ;;  %v9585_v59 = vld [vmem:[#allocation9 + $0x84c] ss:$16 sps:$4 sm:$0xff]  }
 0x619   :  { %3907 = vmatprep.subr.bf16.mxu0 %v9558_v63  ;;  %3960 = vmatprep.subr.bf16.mxu1 %v9561_v1  ;;  %v9580_v1 = vld [vmem:[#allocation9 + $0x840] ss:$16 sps:$4 sm:$0xff]  }
 0x61c   :  { %3908 = vmatpush1.bf16.msra.mxu0 %v9556_v61  ;;  %3961 = vmatpush1.bf16.msra.mxu1 %v9559_v57  ;;  %v9583_v61 = vld [vmem:[#allocation9 + $0x848] ss:$16 sps:$4 sm:$0xff]   ;;  %v9591_v57 = vld [vmem:[#allocation9 + $0x86c] ss:$16 sps:$4 sm:$0xff]  }
 0x61d   :  { %3909 = vmatprep.subr.bf16.mxu0 %v9564_v2  ;;  %3962 = vmatprep.subr.bf16.mxu1 %v9567_v3  ;;  %v9586_v2 = vld [vmem:[#allocation9 + $0x860] ss:$16 sps:$4 sm:$0xff]   ;;  %v9589_v3 = vld [vmem:[#allocation9 + $0x868] ss:$16 sps:$4 sm:$0xff]  }
 0x620   :  { %3910 = vmatpush1.bf16.msra.mxu0 %v9562_v4  ;;  %3963 = vmatpush1.bf16.msra.mxu1 %v9565_v5  ;;  %v9594_v4 = vld [vmem:[#allocation9 + $0x884] ss:$16 sps:$4 sm:$0xff]   ;;  %v9597_v5 = vld [vmem:[#allocation9 + $0x88c] ss:$16 sps:$4 sm:$0xff]  }
 0x621   :  { %4817 = vmatprep.subr.bf16.mxu0 %v9570_v6  ;;  %4923 = vmatprep.subr.bf16.mxu1 %v9573_v7  ;;  %v9592_v6 = vld [vmem:[#allocation9 + $0x880] ss:$16 sps:$4 sm:$0xff]   ;;  %v9595_v7 = vld [vmem:[#allocation9 + $0x888] ss:$16 sps:$4 sm:$0xff]  }
 0x6d6   :  { %v8655_v8 = vpop.f32.mrb[40].mxu0  ;;  %v8683_v39 = vpop.f32.mrb[48].mxu1 }
 0x6d7   :  { %v8656_v9 = vpop.f32.mrb[41].mxu0  ;;  %v8684_v10 = vpop.f32.mrb[49].mxu1 }
 0x6d8   :  { %v8657_v11 = vadd.f32 %v8656_v9, %v8655_v8  ;;  %v8685_v13 = vadd.f32 %v8684_v10, %v8683_v39  ;;  %v8658_v14 = vpop.f32.mrb[42].mxu0  ;;  %v8686_v15 = vpop.f32.mrb[50].mxu1  ;;  %v9600_v8 = vld [vmem:[#allocation9 + $0x8a4] ss:$16 sps:$4 sm:$0xff]   ;;  %v9603_v39 = vld [vmem:[#allocation9 + $0x8ac] ss:$16 sps:$4 sm:$0xff]  }
 0x6d9   :  { %v8659_v16 = vpop.f32.mrb[43].mxu0  ;;  %v8687_v17 = vpop.f32.mrb[51].mxu1  ;;  %v9598_v9 = vld [vmem:[#allocation9 + $0x8a0] ss:$16 sps:$4 sm:$0xff]   ;;  %v9601_v10 = vld [vmem:[#allocation9 + $0x8a8] ss:$16 sps:$4 sm:$0xff]  }
 0x6da   :  { %v3647_v22 = vadd.f32 %v8685_v13, %v8657_v11  ;;  %v8660_v23 = vadd.f32 %v8659_v16, %v8658_v14  ;;  %v8688_v24 = vadd.f32 %v8687_v17, %v8686_v15  ;;  %v9606_v11 = vld [vmem:[#allocation9 + $0x8c4] ss:$16 sps:$4 sm:$0xff]   ;;  %v9609_v13 = vld [vmem:[#allocation9 + $0x8cc] ss:$16 sps:$4 sm:$0xff]   ;;  %v9604_v14 = vld [vmem:[#allocation9 + $0x8c0] ss:$16 sps:$4 sm:$0xff]  }
 0x6db   :  { %v9607_v15 = vld [vmem:[#allocation9 + $0x8c8] ss:$16 sps:$4 sm:$0xff]   ;;  %v9612_v16 = vld [vmem:[#allocation9 + $0x8e4] ss:$16 sps:$4 sm:$0xff]   ;;  %v9615_v17 = vld [vmem:[#allocation9 + $0x8ec] ss:$16 sps:$4 sm:$0xff]  }
 0x6dc   :  { %v3661_v25 = vadd.f32 %v3647_v22, %v10639_v52  ;;  %v3650_v32 = vadd.f32 %v8688_v24, %v8660_v23  ;;  %v9610_v22 = vld [vmem:[#allocation9 + $0x8e0] ss:$16 sps:$4 sm:$0xff]   ;;  %v9613_v23 = vld [vmem:[#allocation9 + $0x8e8] ss:$16 sps:$4 sm:$0xff]   ;;  %v9618_v24 = vld [vmem:[#allocation9 + $0x904] ss:$16 sps:$4 sm:$0xff]  }
 0x6de   :  { %v3662_v34 = vadd.f32 %v3650_v32, %v10641_v60  ;;  %v8661_v35 = vpop.f32.mrb[44].mxu0  ;;  %v8689_v26 = vpop.f32.mrb[52].mxu1  ;;  %v10677_v18 = vadd.f32 %v8133_v33, %v3661_v25  ;;  %v9621_v25 = vld [vmem:[#allocation9 + $0x90c] ss:$16 sps:$4 sm:$0xff]   ;;  %v9616_v32 = vld [vmem:[#allocation9 + $0x900] ss:$16 sps:$4 sm:$0xff]  }
 0x6df   :  { %v8662_v27 = vpop.f32.mrb[45].mxu0  ;;  %v8690_v36 = vpop.f32.mrb[53].mxu1 }
 0x6e0   :  { %v10679_v29 = vadd.f32 %v8133_v33, %v3662_v34  ;;  %v8663_v37 = vadd.f32 %v8662_v27, %v8661_v35  ;;  %v8691_v38 = vadd.f32 %v8690_v36, %v8689_v26  ;;  %v8664_v28 = vpop.f32.mrb[46].mxu0  ;;  %v8692_v40 = vpop.f32.mrb[54].mxu1  ;;  %v9624_v34 = vld [vmem:[#allocation9 + $0x924] ss:$16 sps:$4 sm:$0xff]   ;;  %v9627_v35 = vld [vmem:[#allocation9 + $0x92c] ss:$16 sps:$4 sm:$0xff]  }
 0x6e1   :  { %v8665_v30 = vpop.f32.mrb[47].mxu0  ;;  %v8693_v31 = vpop.f32.mrb[55].mxu1  ;;  %v9622_v26 = vld [vmem:[#allocation9 + $0x920] ss:$16 sps:$4 sm:$0xff]   ;;  %v9625_v27 = vld [vmem:[#allocation9 + $0x928] ss:$16 sps:$4 sm:$0xff]  }
 0x6e2   :  { %v3677_v52 = vpack.c.bf16 %v10679_v29, %v10677_v18  ;;  %v3655_v43 = vadd.f32 %v8691_v38, %v8663_v37  ;;  %v8666_v48 = vadd.f32 %v8665_v30, %v8664_v28  ;;  %v8694_v60 = vadd.f32 %v8693_v31, %v8692_v40  ;;  %v9630_v36 = vld [vmem:[#allocation9 + $0x944] ss:$16 sps:$4 sm:$0xff]   ;;  %v9633_v37 = vld [vmem:[#allocation9 + $0x94c] ss:$16 sps:$4 sm:$0xff]   ;;  %v9628_v38 = vld [vmem:[#allocation9 + $0x940] ss:$16 sps:$4 sm:$0xff]  }
 0x6e3   :  { %v9631_v28 = vld [vmem:[#allocation9 + $0x948] ss:$16 sps:$4 sm:$0xff]   ;;  %v9636_v40 = vld [vmem:[#allocation9 + $0x964] ss:$16 sps:$4 sm:$0xff]   ;;  %v9639_v30 = vld [vmem:[#allocation9 + $0x96c] ss:$16 sps:$4 sm:$0xff]  }
 0x6e4   :  { %v3663_v55 = vadd.f32 %v3655_v43, %v10647_v19  ;;  %v3658_v56 = vadd.f32 %v8694_v60, %v8666_v48  ;;  %3928 = vmatmul.mubr.bf16.vlgmr.msra.gmra.mrb[48].mxu0 %v3677_v52  ;;  %3981 = vmatmul.mubr.bf16.vlgmr.msra.gmra.mrb[56].mxu1 %v3677_v52  ;;  %v9634_v31 = vld [vmem:[#allocation9 + $0x960] ss:$16 sps:$4 sm:$0xff]   ;;  %v9637_v52 = vld [vmem:[#allocation9 + $0x968] ss:$16 sps:$4 sm:$0xff]   ;;  %v9642_v43 = vld [vmem:[#allocation9 + $0x984] ss:$16 sps:$4 sm:$0xff]  }
 0x6e5   :  { %3937 = vmatprep.mubr.bf16.mxu0 %v10352_v0  ;;  %3990 = vmatprep.mubr.bf16.mxu1 %v10352_v0  ;;  %v9645_v48 = vld [vmem:[#allocation9 + $0x98c] ss:$16 sps:$4 sm:$0xff]   ;;  %v9640_v60 = vld [vmem:[#allocation9 + $0x980] ss:$16 sps:$4 sm:$0xff]  }
 0x6e6   :  { %v3664_v53 = vadd.f32 %v3658_v56, %v10649_v20  ;;  %4818 = vmatpush1.bf16.msra.mxu0 %v9568_v12  ;;  %4924 = vmatpush1.bf16.msra.mxu1 %v9571_v51  ;;  %v10687_v62 = vadd.f32 %v8133_v33, %v3663_v55  ;;  %v9588_v20 = vld [vmem:[#allocation9 + $0x864] ss:$16 sps:$4 sm:$0xff]   ;;  %v9643_v12 = vld [vmem:[#allocation9 + $0x988] ss:$16 sps:$4 sm:$0xff]  }
 0x6e7   :  { %4819 = vmatprep.subr.bf16.mxu0 %v9576_v54  ;;  %4925 = vmatprep.subr.bf16.mxu1 %v9579_v49  ;;  %v9648_v51 = vld [vmem:[#allocation9 + $0x9a4] ss:$16 sps:$4 sm:$0xff]   ;;  %v9651_v54 = vld [vmem:[#allocation9 + $0x9ac] ss:$16 sps:$4 sm:$0xff]   ;;  %v9646_v49 = vld [vmem:[#allocation9 + $0x9a0] ss:$16 sps:$4 sm:$0xff]  }
 0x6e8   :  { %v10689_v19 = vadd.f32 %v8133_v33, %v3664_v53  ;;  %v9619_v33 = vld [vmem:[#allocation9 + $0x908] ss:$16 sps:$4 sm:$0xff]   ;;  %v9654_v56 = vld [vmem:[#allocation9 + $0x9c4] ss:$16 sps:$4 sm:$0xff]   ;;  %v9657_v53 = vld [vmem:[#allocation9 + $0x9cc] ss:$16 sps:$4 sm:$0xff]  }
 0x6e9   :  { %v9649_v55 = vld [vmem:[#allocation9 + $0x9a8] ss:$16 sps:$4 sm:$0xff]  }
 0x6ea   :  { %v3678_v63 = vpack.c.bf16 %v10689_v19, %v10687_v62  ;;  %4820 = vmatpush1.bf16.msra.mxu0 %v9574_v50  ;;  %4926 = vmatpush1.bf16.msra.mxu1 %v9577_v58  ;;  %v9652_v50 = vld [vmem:[#allocation9 + $0x9c0] ss:$16 sps:$4 sm:$0xff]   ;;  %v9655_v58 = vld [vmem:[#allocation9 + $0x9c8] ss:$16 sps:$4 sm:$0xff]  }
 0x6eb   :  { %4821 = vmatprep.subr.bf16.mxu0 %v9582_v21  ;;  %4927 = vmatprep.subr.bf16.mxu1 %v9585_v59  ;;  %v9660_v21 = vld [vmem:[#allocation9 + $0x9e4] ss:$16 sps:$4 sm:$0xff]   ;;  %v9663_v59 = vld [vmem:[#allocation9 + $0x9ec] ss:$16 sps:$4 sm:$0xff]  }
 0x6ec   :  { %3938 = vmatmul.mubr.bf16.gmra.mrb[52].mxu0 %v3678_v63  ;;  %3991 = vmatmul.mubr.bf16.gmra.mrb[60].mxu1 %v3678_v63  ;;  %v9658_v63 = vld [vmem:[#allocation9 + $0x9e0] ss:$16 sps:$4 sm:$0xff]  }
 0x6ee   :  { %4822 = vmatpush1.bf16.msra.mxu0 %v9580_v1  ;;  %4928 = vmatpush1.bf16.msra.mxu1 %v9583_v61  ;;  %v9661_v1 = vld [vmem:[#allocation9 + $0x9e8] ss:$16 sps:$4 sm:$0xff]   ;;  %v9666_v61 = vld [vmem:[#allocation9 + $0xa04] ss:$16 sps:$4 sm:$0xff]  }
 0x6ef   :  { %4823 = vmatprep.subr.bf16.mxu0 %v9588_v20  ;;  %4929 = vmatprep.subr.bf16.mxu1 %v9591_v57  ;;  %v9669_v20 = vld [vmem:[#allocation9 + $0xa0c] ss:$16 sps:$4 sm:$0xff]  }
 0x6f0   :  { %v3713_v57 = vld [vmem:[#allocation8 + $0x8] sm:$0xf] }
 0x6f2   :  { %4824 = vmatpush1.bf16.msra.mxu0 %v9586_v2  ;;  %4930 = vmatpush1.bf16.msra.mxu1 %v9589_v3  ;;  %v3718_v2 = vrot.slane %v3713_v57, %v10584_v44  ;;  %v3726_v3 = vrot.slane %v3713_v57, %v10590_v46 }
 0x6f3   :  { %4825 = vmatprep.subr.bf16.mxu0 %v9594_v4  ;;  %4931 = vmatprep.subr.bf16.mxu1 %v9597_v5  ;;  %v3722_v4 = vrot.slane %v3713_v57, %v10587_v45  ;;  %v3730_v5 = vrot.slane %v3713_v57, %v10593_v47  ;;  %v9670_v57 = vld [vmem:[#allocation9 + $0xa20] ss:$16 sps:$4 sm:$0xff]  }
 0x6f6   :  { %4826 = vmatpush1.bf16.msra.mxu0 %v9592_v6  ;;  %4932 = vmatpush1.bf16.msra.mxu1 %v9595_v7 }
 0x6f7   :  { %4827 = vmatprep.subr.bf16.mxu0 %v9600_v8  ;;  %4933 = vmatprep.subr.bf16.mxu1 %v9603_v39 }
 0x6fa   :  { %4828 = vmatpush1.bf16.msra.mxu0 %v9598_v9  ;;  %4934 = vmatpush1.bf16.msra.mxu1 %v9601_v10 }
 0x6fb   :  { %4829 = vmatprep.subr.bf16.mxu0 %v9606_v11  ;;  %4935 = vmatprep.subr.bf16.mxu1 %v9609_v13 }
 0x6fe   :  { %4830 = vmatpush1.bf16.msra.mxu0 %v9604_v14  ;;  %4936 = vmatpush1.bf16.msra.mxu1 %v9607_v15 }
 0x6ff   :  { %4831 = vmatprep.subr.bf16.mxu0 %v9612_v16  ;;  %4937 = vmatprep.subr.bf16.mxu1 %v9615_v17 }
 0x702   :  { %4832 = vmatpush1.bf16.msra.mxu0 %v9610_v22  ;;  %4938 = vmatpush1.bf16.msra.mxu1 %v9613_v23 }
 0x703   :  { %4833 = vmatprep.subr.bf16.mxu0 %v9618_v24  ;;  %4939 = vmatprep.subr.bf16.mxu1 %v9621_v25 }
 0x706   :  { %4834 = vmatpush1.bf16.msra.mxu0 %v9616_v32  ;;  %4940 = vmatpush1.bf16.msra.mxu1 %v9619_v33 }
 0x707   :  { %4835 = vmatprep.subr.bf16.mxu0 %v9624_v34  ;;  %4941 = vmatprep.subr.bf16.mxu1 %v9627_v35 }
 0x70a   :  { %4836 = vmatpush1.bf16.msra.mxu0 %v9622_v26  ;;  %4942 = vmatpush1.bf16.msra.mxu1 %v9625_v27 }
 0x70b   :  { %4837 = vmatprep.subr.bf16.mxu0 %v9630_v36  ;;  %4943 = vmatprep.subr.bf16.mxu1 %v9633_v37 }
 0x70e   :  { %4838 = vmatpush1.bf16.msra.mxu0 %v9628_v38  ;;  %4944 = vmatpush1.bf16.msra.mxu1 %v9631_v28 }
 0x70f   :  { %4839 = vmatprep.subr.bf16.mxu0 %v9636_v40  ;;  %4945 = vmatprep.subr.bf16.mxu1 %v9639_v30 }
 0x712   :  { %4840 = vmatpush1.bf16.msra.mxu0 %v9634_v31  ;;  %4946 = vmatpush1.bf16.msra.mxu1 %v9637_v52 }
 0x713   :  { %4841 = vmatprep.subr.bf16.mxu0 %v9642_v43  ;;  %4947 = vmatprep.subr.bf16.mxu1 %v9645_v48  ;;  %v9664_v43 = vld [vmem:[#allocation9 + $0xa00] ss:$16 sps:$4 sm:$0xff]   ;;  %v9667_v48 = vld [vmem:[#allocation9 + $0xa08] ss:$16 sps:$4 sm:$0xff]  }
 0x716   :  { %4842 = vmatpush1.bf16.msra.mxu0 %v9640_v60  ;;  %4948 = vmatpush1.bf16.msra.mxu1 %v9643_v12 }
 0x717   :  { %4843 = vmatprep.subr.bf16.mxu0 %v9648_v51  ;;  %4949 = vmatprep.subr.bf16.mxu1 %v9651_v54 }
 0x71a   :  { %4844 = vmatpush1.bf16.msra.mxu0 %v9646_v49  ;;  %4950 = vmatpush1.bf16.msra.mxu1 %v9649_v55  ;;  %v9672_v49 = vld [vmem:[#allocation9 + $0xa24] ss:$16 sps:$4 sm:$0xff]   ;;  %v9675_v55 = vld [vmem:[#allocation9 + $0xa2c] ss:$16 sps:$4 sm:$0xff]  }
 0x71b   :  { %4845 = vmatprep.subr.bf16.mxu0 %v9654_v56  ;;  %4951 = vmatprep.subr.bf16.mxu1 %v9657_v53 }
 0x71e   :  { %4846 = vmatpush1.bf16.msra.mxu0 %v9652_v50  ;;  %4952 = vmatpush1.bf16.msra.mxu1 %v9655_v58 }
 0x71f   :  { %4847 = vmatprep.subr.bf16.mxu0 %v9660_v21  ;;  %4953 = vmatprep.subr.bf16.mxu1 %v9663_v59 }
 0x722   :  { %4848 = vmatpush1.bf16.msra.mxu0 %v9658_v63  ;;  %4954 = vmatpush1.bf16.msra.mxu1 %v9661_v1 }
 0x723   :  { %4870 = vmatprep.subr.bf16.mxu0 %v9666_v61  ;;  %4976 = vmatprep.subr.bf16.mxu1 %v9669_v20 }
 0x7b7   :  { %v3929_v6 = vpop.f32.mrb[48].mxu0  ;;  %v3982_v7 = vpop.f32.mrb[56].mxu1 }
 0x7b8   :  { %v3930_v8 = vadd.f32 %v3929_v6, %v3718_v2  ;;  %v3983_v39 = vadd.f32 %v3982_v7, %v3726_v3  ;;  %v3931_v9 = vpop.f32.mrb[49].mxu0  ;;  %v3984_v10 = vpop.f32.mrb[57].mxu1  ;;  %v9673_v6 = vld [vmem:[#allocation9 + $0xa28] ss:$16 sps:$4 sm:$0xff]   ;;  %v9678_v7 = vld [vmem:[#allocation9 + $0xa44] ss:$16 sps:$4 sm:$0xff]  }
 0x7b9   :  { %v3932_v11 = vadd.f32 %v3931_v9, %v3722_v4  ;;  %v3985_v13 = vadd.f32 %v3984_v10, %v3730_v5  ;;  %v3933_v14 = vpop.f32.mrb[50].mxu0  ;;  %v3986_v15 = vpop.f32.mrb[58].mxu1 }
 0x7ba   :  { %v3934_v16 = vadd.f32 %v3933_v14, %v3718_v2  ;;  %v3987_v17 = vadd.f32 %v3986_v15, %v3726_v3  ;;  %v3935_v22 = vpop.f32.mrb[51].mxu0  ;;  %v3988_v23 = vpop.f32.mrb[59].mxu1  ;;  %v4001_v32 = vmax.f32 %v3930_v8, 0.0  ;;  %v4003_v33 = vmax.f32 %v3983_v39, 0.0 }
 0x7bb   :  { %v3936_v24 = vadd.f32 %v3935_v22, %v3722_v4  ;;  %v3989_v25 = vadd.f32 %v3988_v23, %v3730_v5  ;;  %v4002_v26 = vmax.f32 %v3932_v11, 0.0  ;;  %v4004_v27 = vmax.f32 %v3985_v13, 0.0  ;;  %v9681_v11 = vld [vmem:[#allocation9 + $0xa4c] ss:$16 sps:$4 sm:$0xff]   ;;  %v9679_v22 = vld [vmem:[#allocation9 + $0xa48] ss:$16 sps:$4 sm:$0xff]  }
 0x7bc   :  { %v4005_v34 = vmax.f32 %v3934_v16, 0.0  ;;  %v4007_v35 = vmax.f32 %v3987_v17, 0.0  ;;  %v9676_v17 = vld [vmem:[#allocation9 + $0xa40] ss:$16 sps:$4 sm:$0xff]   ;;  %v9684_v23 = vld [vmem:[#allocation9 + $0xa64] ss:$16 sps:$4 sm:$0xff]  }
 0x7bd   :  { %v4006_v36 = vmax.f32 %v3936_v24, 0.0  ;;  %v4008_v37 = vmax.f32 %v3989_v25, 0.0  ;;  %v9687_v24 = vld [vmem:[#allocation9 + $0xa6c] ss:$16 sps:$4 sm:$0xff]   ;;  %v9682_v25 = vld [vmem:[#allocation9 + $0xa60] ss:$16 sps:$4 sm:$0xff]  }
 0x7be   :  { %v4017_v38 = vpack.c.bf16 %v4005_v34, %v4001_v32  ;;  %v10697_v28 = vpack.c.bf16 %v4007_v35, %v4003_v33  ;;  %v9685_v32 = vld [vmem:[#allocation9 + $0xa68] ss:$16 sps:$4 sm:$0xff]   ;;  %v9690_v33 = vld [vmem:[#allocation9 + $0xa84] ss:$16 sps:$4 sm:$0xff]   ;;  %v9693_v34 = vld [vmem:[#allocation9 + $0xa8c] ss:$16 sps:$4 sm:$0xff]  }
 0x7bf   :  { %v4018_v40 = vpack.c.bf16 %v4006_v36, %v4002_v26  ;;  %v4020_v30 = vpack.c.bf16 %v4008_v37, %v4004_v27  ;;  %v3939_v31 = vpop.f32.mrb[52].mxu0  ;;  %v3992_v52 = vpop.f32.mrb[60].mxu1  ;;  %v9688_v35 = vld [vmem:[#allocation9 + $0xa80] ss:$16 sps:$4 sm:$0xff]   ;;  %v9691_v26 = vld [vmem:[#allocation9 + $0xa88] ss:$16 sps:$4 sm:$0xff]  }
 0x7c0   :  { %v3940_v60 = vadd.f32 %v3939_v31, %v3718_v2  ;;  %v3993_v12 = vadd.f32 %v3992_v52, %v3726_v3  ;;  %v3941_v51 = vpop.f32.mrb[53].mxu0  ;;  %v3994_v54 = vpop.f32.mrb[61].mxu1  ;;  %v9696_v27 = vld [vmem:[#allocation9 + $0xaa4] ss:$16 sps:$4 sm:$0xff]   ;;  %v9699_v36 = vld [vmem:[#allocation9 + $0xaac] ss:$16 sps:$4 sm:$0xff]  }
 0x7c1   :  { %v3942_v56 = vadd.f32 %v3941_v51, %v3722_v4  ;;  %v3995_v53 = vadd.f32 %v3994_v54, %v3730_v5  ;;  %v3943_v50 = vpop.f32.mrb[54].mxu0  ;;  %v3996_v58 = vpop.f32.mrb[62].mxu1  ;;  %4849 = vmatprep.mubr.bf16.mxu0 %v4018_v40  ;;  %4955 = vmatprep.mubr.bf16.mxu1 %v4018_v40  ;;  %v9694_v37 = vld [vmem:[#allocation9 + $0xaa0] ss:$16 sps:$4 sm:$0xff]   ;;  %v9702_v40 = vld [vmem:[#allocation9 + $0xac4] ss:$16 sps:$4 sm:$0xff]  }
 0x7c2   :  { %v3944_v21 = vadd.f32 %v3943_v50, %v3718_v2  ;;  %v3997_v59 = vadd.f32 %v3996_v58, %v3726_v3  ;;  %v3945_v63 = vpop.f32.mrb[55].mxu0  ;;  %v3998_v1 = vpop.f32.mrb[63].mxu1  ;;  %4850 = vmatmul.mubr.bf16.vlgmr.msra.gmra.mrb[56].mxu0 %v4017_v38  ;;  %4956 = vmatmul.mubr.bf16.vlgmr.msra.gmra.mrb[64].mxu1 %v4017_v38  ;;  %v4009_v8 = vmax.f32 %v3940_v60, 0.0  ;;  %v4011_v39 = vmax.f32 %v3993_v12, 0.0  ;;  %v9697_v38 = vld [vmem:[#allocation9 + $0xaa8] ss:$16 sps:$4 sm:$0xff]  }
 0x7c3   :  { %v3946_v61 = vadd.f32 %v3945_v63, %v3722_v4  ;;  %v3999_v20 = vadd.f32 %v3998_v1, %v3730_v5  ;;  %4871 = vmatpush1.bf16.msra.mxu0 %v9664_v43  ;;  %4977 = vmatpush1.bf16.msra.mxu1 %v9667_v48  ;;  %v4010_v2 = vmax.f32 %v3942_v56, 0.0  ;;  %v4012_v3 = vmax.f32 %v3995_v53, 0.0  ;;  %v9700_v31 = vld [vmem:[#allocation9 + $0xac0] ss:$16 sps:$4 sm:$0xff]   ;;  %v9703_v52 = vld [vmem:[#allocation9 + $0xac8] ss:$16 sps:$4 sm:$0xff]  }
 0x7c4   :  { %v4013_v9 = vmax.f32 %v3944_v21, 0.0  ;;  %v4015_v10 = vmax.f32 %v3997_v59, 0.0  ;;  %4872 = vmatprep.subr.bf16.mxu0 %v9672_v49  ;;  %4978 = vmatprep.subr.bf16.mxu1 %v9675_v55  ;;  %v9708_v43 = vld [vmem:[#allocation9 + $0xae4] ss:$16 sps:$4 sm:$0xff]   ;;  %v9711_v48 = vld [vmem:[#allocation9 + $0xaec] ss:$16 sps:$4 sm:$0xff]  }
 0x7c5   :  { %v4014_v13 = vmax.f32 %v3946_v61, 0.0  ;;  %v4016_v14 = vmax.f32 %v3999_v20, 0.0  ;;  %v9706_v60 = vld [vmem:[#allocation9 + $0xae0] ss:$16 sps:$4 sm:$0xff]   ;;  %v9709_v12 = vld [vmem:[#allocation9 + $0xae8] ss:$16 sps:$4 sm:$0xff]  }
 0x7c6   :  { %v4021_v15 = vpack.c.bf16 %v4013_v9, %v4009_v8  ;;  %v10699_v16 = vpack.c.bf16 %v4015_v10, %v4011_v39  ;;  %v9714_v51 = vld [vmem:[#allocation9 + $0xb04] ss:$16 sps:$4 sm:$0xff]   ;;  %v9717_v54 = vld [vmem:[#allocation9 + $0xb0c] ss:$16 sps:$4 sm:$0xff]   ;;  %v9712_v49 = vld [vmem:[#allocation9 + $0xb00] ss:$16 sps:$4 sm:$0xff]  }
 0x7c7   :  { %v4022_v4 = vpack.c.bf16 %v4014_v13, %v4010_v2  ;;  %v10701_v5 = vpack.c.bf16 %v4016_v14, %v4012_v3  ;;  %4873 = vmatpush1.bf16.msra.mxu0 %v9670_v57  ;;  %4979 = vmatpush1.bf16.msra.mxu1 %v9673_v6  ;;  %v9715_v55 = vld [vmem:[#allocation9 + $0xb08] ss:$16 sps:$4 sm:$0xff]   ;;  %v9720_v56 = vld [vmem:[#allocation9 + $0xb24] ss:$16 sps:$4 sm:$0xff]   ;;  %v9723_v53 = vld [vmem:[#allocation9 + $0xb2c] ss:$16 sps:$4 sm:$0xff]  }
 0x7c8   :  { %4874 = vmatprep.subr.bf16.mxu0 %v9678_v7  ;;  %4980 = vmatprep.subr.bf16.mxu1 %v9681_v11  ;;  %v9718_v50 = vld [vmem:[#allocation9 + $0xb20] ss:$16 sps:$4 sm:$0xff]   ;;  %v9721_v58 = vld [vmem:[#allocation9 + $0xb28] ss:$16 sps:$4 sm:$0xff]   ;;  %v9726_v21 = vld [vmem:[#allocation9 + $0xb44] ss:$16 sps:$4 sm:$0xff]  }
 0x7c9   :  { %4859 = vmatprep.mubr.bf16.mxu0 %v4022_v4  ;;  %4965 = vmatprep.mubr.bf16.mxu1 %v4022_v4  ;;  %v9729_v59 = vld [vmem:[#allocation9 + $0xb4c] ss:$16 sps:$4 sm:$0xff]   ;;  %v9724_v63 = vld [vmem:[#allocation9 + $0xb40] ss:$16 sps:$4 sm:$0xff]   ;;  %v9727_v1 = vld [vmem:[#allocation9 + $0xb48] ss:$16 sps:$4 sm:$0xff]  }
 0x7ca   :  { %4860 = vmatmul.mubr.bf16.gmra.mrb[60].mxu0 %v4021_v15  ;;  %4966 = vmatmul.mubr.bf16.gmra.mrb[68].mxu1 %v4021_v15  ;;  %v9732_v61 = vld [vmem:[#allocation9 + $0xb64] ss:$16 sps:$4 sm:$0xff]   ;;  %v9735_v20 = vld [vmem:[#allocation9 + $0xb6c] ss:$16 sps:$4 sm:$0xff]   ;;  %v9730_v57 = vld [vmem:[#allocation9 + $0xb60] ss:$16 sps:$4 sm:$0xff]  }
 0x7cb   :  { %4875 = vmatpush1.bf16.msra.mxu0 %v9676_v17  ;;  %4981 = vmatpush1.bf16.msra.mxu1 %v9679_v22  ;;  %v9733_v6 = vld [vmem:[#allocation9 + $0xb68] ss:$16 sps:$4 sm:$0xff]   ;;  %v9738_v7 = vld [vmem:[#allocation9 + $0xb84] ss:$16 sps:$4 sm:$0xff]   ;;  %v9741_v8 = vld [vmem:[#allocation9 + $0xb8c] ss:$16 sps:$4 sm:$0xff]  }
 0x7cc   :  { %4902 = vmatprep.mubr.bf16.mxu0 %v4020_v30  ;;  %5008 = vmatprep.mubr.bf16.mxu1 %v4020_v30  ;;  %v9705_v30 = vld [vmem:[#allocation9 + $0xacc] ss:$16 sps:$4 sm:$0xff]   ;;  %v9736_v39 = vld [vmem:[#allocation9 + $0xb80] ss:$16 sps:$4 sm:$0xff]   ;;  %v9739_v9 = vld [vmem:[#allocation9 + $0xb88] ss:$16 sps:$4 sm:$0xff]  }
 0x7cd   :  { %4876 = vmatprep.subr.bf16.mxu0 %v9684_v23  ;;  %4982 = vmatprep.subr.bf16.mxu1 %v9687_v24  ;;  %v9744_v10 = vld [vmem:[#allocation9 + $0xba4] ss:$16 sps:$4 sm:$0xff]   ;;  %v9747_v11 = vld [vmem:[#allocation9 + $0xbac] ss:$16 sps:$4 sm:$0xff]   ;;  %v9742_v2 = vld [vmem:[#allocation9 + $0xba0] ss:$16 sps:$4 sm:$0xff]  }
 0x7ce   :  { %v9745_v3 = vld [vmem:[#allocation9 + $0xba8] ss:$16 sps:$4 sm:$0xff]   ;;  %v9750_v13 = vld [vmem:[#allocation9 + $0xbc4] ss:$16 sps:$4 sm:$0xff]   ;;  %v9753_v14 = vld [vmem:[#allocation9 + $0xbcc] ss:$16 sps:$4 sm:$0xff]  }
 0x7cf   :  { %4877 = vmatpush1.bf16.msra.mxu0 %v9682_v25  ;;  %4983 = vmatpush1.bf16.msra.mxu1 %v9685_v32  ;;  %v9748_v15 = vld [vmem:[#allocation9 + $0xbc0] ss:$16 sps:$4 sm:$0xff]   ;;  %v9751_v4 = vld [vmem:[#allocation9 + $0xbc8] ss:$16 sps:$4 sm:$0xff]   ;;  %v9756_v17 = vld [vmem:[#allocation9 + $0xbe4] ss:$16 sps:$4 sm:$0xff]  }
 0x7d0   :  { %4878 = vmatprep.subr.bf16.mxu0 %v9690_v33  ;;  %4984 = vmatprep.subr.bf16.mxu1 %v9693_v34  ;;  %v9759_v22 = vld [vmem:[#allocation9 + $0xbec] ss:$16 sps:$4 sm:$0xff]   ;;  %v9754_v23 = vld [vmem:[#allocation9 + $0xbe0] ss:$16 sps:$4 sm:$0xff]   ;;  %v9757_v24 = vld [vmem:[#allocation9 + $0xbe8] ss:$16 sps:$4 sm:$0xff]  }
 0x7d1   :  { %v9760_v25 = vld [vmem:[#allocation12 + $0x240] sm:$0xff]  }
 0x7d2   :  { %v9761_v32 = vld [vmem:[#allocation12 + $0x2c0] sm:$0xff]  }
 0x7d3   :  { %4879 = vmatpush1.bf16.msra.mxu0 %v9688_v35  ;;  %4985 = vmatpush1.bf16.msra.mxu1 %v9691_v26  ;;  %v9762_v33 = vld [vmem:[#allocation12 + $0x200] sm:$0xff]   ;;  %v9764_v35 = vld [vmem:[#allocation12 + $0x248] sm:$0xff]  }
 0x7d4   :  { %4880 = vmatprep.subr.bf16.mxu0 %v9696_v27  ;;  %4986 = vmatprep.subr.bf16.mxu1 %v9699_v36  ;;  %v9763_v34 = vld [vmem:[#allocation12 + $0x280] sm:$0xff]   ;;  %v9765_v26 = vld [vmem:[#allocation12 + $0x2c8] sm:$0xff]  }
 0x7d5   :  { %v9766_v27 = vld [vmem:[#allocation12 + $0x208] sm:$0xff]  }
 0x7d6   :  { %v9767_v36 = vld [vmem:[#allocation12 + $0x288] sm:$0xff]  }
 0x7d7   :  { %4881 = vmatpush1.bf16.msra.mxu0 %v9694_v37  ;;  %4987 = vmatpush1.bf16.msra.mxu1 %v9697_v38  ;;  %v9768_v37 = vld [vmem:[#allocation12 + $0x250] sm:$0xff]  }
 0x7d8   :  { %4882 = vmatprep.subr.bf16.mxu0 %v9702_v40  ;;  %4988 = vmatprep.subr.bf16.mxu1 %v9705_v30  ;;  %v9769_v38 = vld [vmem:[#allocation12 + $0x2d0] sm:$0xff]  }
 0x7d9   :  { %v9770_v40 = vld [vmem:[#allocation12 + $0x210] sm:$0xff]  }
 0x7da   :  { %v9771_v30 = vld [vmem:[#allocation12 + $0x290] sm:$0xff]  }
 0x7db   :  { %4883 = vmatpush1.bf16.msra.mxu0 %v9700_v31  ;;  %4989 = vmatpush1.bf16.msra.mxu1 %v9703_v52  ;;  %v9772_v31 = vld [vmem:[#allocation12 + $0x258] sm:$0xff]  }
 0x7dc   :  { %4884 = vmatprep.subr.bf16.mxu0 %v9708_v43  ;;  %4990 = vmatprep.subr.bf16.mxu1 %v9711_v48  ;;  %v9775_v52 = vld [vmem:[#allocation12 + $0x298] sm:$0xff]   ;;  %v9776_v43 = vld [vmem:[#allocation12 + $0x260] sm:$0xff]  }
 0x7dd   :  { %v9777_v48 = vld [vmem:[#allocation12 + $0x2e0] sm:$0xff]  }
 0x7df   :  { %4885 = vmatpush1.bf16.msra.mxu0 %v9706_v60  ;;  %4991 = vmatpush1.bf16.msra.mxu1 %v9709_v12  ;;  %v9778_v60 = vld [vmem:[#allocation12 + $0x220] sm:$0xff]  }
 0x7e0   :  { %4886 = vmatprep.subr.bf16.mxu0 %v9714_v51  ;;  %4992 = vmatprep.subr.bf16.mxu1 %v9717_v54  ;;  %v9779_v12 = vld [vmem:[#allocation12 + $0x2a0] sm:$0xff]   ;;  %v9780_v51 = vld [vmem:[#allocation12 + $0x268] sm:$0xff]  }
 0x7e1   :  { %v9781_v54 = vld [vmem:[#allocation12 + $0x2e8] sm:$0xff]  }
 0x7e3   :  { %4887 = vmatpush1.bf16.msra.mxu0 %v9712_v49  ;;  %4993 = vmatpush1.bf16.msra.mxu1 %v9715_v55  ;;  %v9783_v49 = vld [vmem:[#allocation12 + $0x2a8] sm:$0xff]   ;;  %v9784_v55 = vld [vmem:[#allocation12 + $0x270] sm:$0xff]  }
 0x7e4   :  { %4888 = vmatprep.subr.bf16.mxu0 %v9720_v56  ;;  %4994 = vmatprep.subr.bf16.mxu1 %v9723_v53  ;;  %v9785_v56 = vld [vmem:[#allocation12 + $0x2f0] sm:$0xff]  }
 0x7e5   :  { %v9786_v53 = vld [vmem:[#allocation12 + $0x230] sm:$0xff]  }
 0x7e7   :  { %4889 = vmatpush1.bf16.msra.mxu0 %v9718_v50  ;;  %4995 = vmatpush1.bf16.msra.mxu1 %v9721_v58  ;;  %v9787_v50 = vld [vmem:[#allocation12 + $0x2b0] sm:$0xff]   ;;  %v9788_v58 = vld [vmem:[#allocation12 + $0x278] sm:$0xff]  }
 0x7e8   :  { %4890 = vmatprep.subr.bf16.mxu0 %v9726_v21  ;;  %4996 = vmatprep.subr.bf16.mxu1 %v9729_v59  ;;  %v9789_v21 = vld [vmem:[#allocation12 + $0x2f8] sm:$0xff]  }
 0x7e9   :  { %v9790_v59 = vld [vmem:[#allocation12 + $0x238] sm:$0xff]  }
 0x7eb   :  { %4891 = vmatpush1.bf16.msra.mxu0 %v9724_v63  ;;  %4997 = vmatpush1.bf16.msra.mxu1 %v9727_v1  ;;  %v9791_v63 = vld [vmem:[#allocation12 + $0x2b8] sm:$0xff]  }
 0x7ec   :  { %4892 = vmatprep.subr.bf16.mxu0 %v9732_v61  ;;  %4998 = vmatprep.subr.bf16.mxu1 %v9735_v20  ;;  %v4155_v1 = vld [vmem:[#allocation11 + $0x8] sm:$0xf] }
 0x7ed   :  { %v4160_v61 = vrot.slane %v4155_v1, %v10584_v44  ;;  %v4168_v20 = vrot.slane %v4155_v1, %v10590_v46 }
 0x7ef   :  { %4893 = vmatpush1.bf16.msra.mxu0 %v9730_v57  ;;  %4999 = vmatpush1.bf16.msra.mxu1 %v9733_v6  ;;  %v4164_v57 = vrot.slane %v4155_v1, %v10587_v45  ;;  %v4172_v6 = vrot.slane %v4155_v1, %v10593_v47 }
 0x7f0   :  { %4894 = vmatprep.subr.bf16.mxu0 %v9738_v7  ;;  %5000 = vmatprep.subr.bf16.mxu1 %v9741_v8 }
 0x7f3   :  { %4895 = vmatpush1.bf16.msra.mxu0 %v9736_v39  ;;  %5001 = vmatpush1.bf16.msra.mxu1 %v9739_v9 }
 0x7f4   :  { %4896 = vmatprep.subr.bf16.mxu0 %v9744_v10  ;;  %5002 = vmatprep.subr.bf16.mxu1 %v9747_v11 }
 0x7f7   :  { %4897 = vmatpush1.bf16.msra.mxu0 %v9742_v2  ;;  %5003 = vmatpush1.bf16.msra.mxu1 %v9745_v3 }
 0x7f8   :  { %4898 = vmatprep.subr.bf16.mxu0 %v9750_v13  ;;  %5004 = vmatprep.subr.bf16.mxu1 %v9753_v14 }
 0x7fb   :  { %4899 = vmatpush1.bf16.msra.mxu0 %v9748_v15  ;;  %5005 = vmatpush1.bf16.msra.mxu1 %v9751_v4 }
 0x7fc   :  { %4900 = vmatprep.subr.bf16.mxu0 %v9756_v17  ;;  %5006 = vmatprep.subr.bf16.mxu1 %v9759_v22 }
 0x7ff   :  { %4901 = vmatpush1.bf16.msra.mxu0 %v9754_v23  ;;  %5007 = vmatpush1.bf16.msra.mxu1 %v9757_v24 }
 0x800   :  { %8695 = vmatprep.subr.bf16.mxu0 %v9760_v25  ;;  %8723 = vmatprep.subr.bf16.mxu1 %v9761_v32 }
 0x802   :  { %4903 = vmatmul.mubr.bf16.vlgmr.msra.gmra.mrb[56].mxu0 %v10697_v28  ;;  %5009 = vmatmul.mubr.bf16.vlgmr.msra.gmra.mrb[64].mxu1 %v10697_v28  ;;  %v9773_v28 = vld [vmem:[#allocation12 + $0x2d8] sm:$0xff]  }
 0x803   :  { %4912 = vmatprep.mubr.bf16.mxu0 %v10701_v5  ;;  %5018 = vmatprep.mubr.bf16.mxu1 %v10701_v5  ;;  %v9774_v5 = vld [vmem:[#allocation12 + $0x218] sm:$0xff]  }
 0x804   :  { %8696 = vmatpush3.bf16.msra.mxu0 %v9762_v33  ;;  %8724 = vmatpush3.bf16.msra.mxu1 %v9763_v34 }
 0x805   :  { %8697 = vmatprep.subr.bf16.mxu0 %v9764_v35  ;;  %8725 = vmatprep.subr.bf16.mxu1 %v9765_v26 }
 0x808   :  { %8698 = vmatpush3.bf16.msra.mxu0 %v9766_v27  ;;  %8726 = vmatpush3.bf16.msra.mxu1 %v9767_v36 }
 0x809   :  { %8699 = vmatprep.subr.bf16.mxu0 %v9768_v37  ;;  %8727 = vmatprep.subr.bf16.mxu1 %v9769_v38 }
 0x80a   :  { %4913 = vmatmul.mubr.bf16.gmra.mrb[60].mxu0 %v10699_v16  ;;  %5019 = vmatmul.mubr.bf16.gmra.mrb[68].mxu1 %v10699_v16  ;;  %v9782_v16 = vld [vmem:[#allocation12 + $0x228] sm:$0xff]  }
 0x80c   :  { %8700 = vmatpush3.bf16.msra.mxu0 %v9770_v40  ;;  %8728 = vmatpush3.bf16.msra.mxu1 %v9771_v30 }
 0x80d   :  { %8701 = vmatprep.subr.bf16.mxu0 %v9772_v31  ;;  %8729 = vmatprep.subr.bf16.mxu1 %v9773_v28 }
 0x810   :  { %8702 = vmatpush3.bf16.msra.mxu0 %v9774_v5  ;;  %8730 = vmatpush3.bf16.msra.mxu1 %v9775_v52 }
 0x811   :  { %8703 = vmatprep.subr.bf16.mxu0 %v9776_v43  ;;  %8731 = vmatprep.subr.bf16.mxu1 %v9777_v48 }
 0x814   :  { %8704 = vmatpush3.bf16.msra.mxu0 %v9778_v60  ;;  %8732 = vmatpush3.bf16.msra.mxu1 %v9779_v12 }
 0x815   :  { %8705 = vmatprep.subr.bf16.mxu0 %v9780_v51  ;;  %8733 = vmatprep.subr.bf16.mxu1 %v9781_v54 }
 0x818   :  { %8706 = vmatpush3.bf16.msra.mxu0 %v9782_v16  ;;  %8734 = vmatpush3.bf16.msra.mxu1 %v9783_v49 }
 0x819   :  { %8707 = vmatprep.subr.bf16.mxu0 %v9784_v55  ;;  %8735 = vmatprep.subr.bf16.mxu1 %v9785_v56 }
 0x81c   :  { %8708 = vmatpush3.bf16.msra.mxu0 %v9786_v53  ;;  %8736 = vmatpush3.bf16.msra.mxu1 %v9787_v50 }
 0x81d   :  { %8709 = vmatprep.subr.bf16.mxu0 %v9788_v58  ;;  %8737 = vmatprep.subr.bf16.mxu1 %v9789_v21 }
 0x820   :  { %8710 = vmatpush3.bf16.msra.mxu0 %v9790_v59  ;;  %8738 = vmatpush3.bf16.msra.mxu1 %v9791_v63 }
 0x8d5   :  { %v4904_v7 = vpop.f32.mrb[56].mxu0  ;;  %v5010_v8 = vpop.f32.mrb[64].mxu1 }
 0x8d6   :  { %v8879_v39 = vadd.f32 %v4904_v7, %v4160_v61  ;;  %v8887_v9 = vadd.f32 %v5010_v8, %v4168_v20  ;;  %v4906_v10 = vpop.f32.mrb[57].mxu0  ;;  %v5012_v11 = vpop.f32.mrb[65].mxu1 }
 0x8d7   :  { %v8880_v2 = vadd.f32 %v4906_v10, %v4164_v57  ;;  %v8888_v3 = vadd.f32 %v5012_v11, %v4172_v6  ;;  %v4908_v13 = vpop.f32.mrb[58].mxu0  ;;  %v5014_v14 = vpop.f32.mrb[66].mxu1 }
 0x8d8   :  { %v8881_v15 = vadd.f32 %v4908_v13, %v4160_v61  ;;  %v8889_v4 = vadd.f32 %v5014_v14, %v4168_v20  ;;  %v4910_v17 = vpop.f32.mrb[59].mxu0  ;;  %v5016_v22 = vpop.f32.mrb[67].mxu1  ;;  %v5029_v25 = vmax.f32 %v8879_v39, 0.0  ;;  %v5031_v32 = vmax.f32 %v8887_v9, 0.0 }
 0x8d9   :  { %v8882_v23 = vadd.f32 %v4910_v17, %v4164_v57  ;;  %v8890_v24 = vadd.f32 %v5016_v22, %v4172_v6  ;;  %v5030_v35 = vmax.f32 %v8880_v2, 0.0  ;;  %v5032_v26 = vmax.f32 %v8888_v3, 0.0  ;;  %v5462_v3 = vld [vmem:[#allocation15 + $0x28] sm:$0xff]  ;;  %v5469_v17 = vld [vmem:[#allocation15 + $0x60] sm:$0xff] }
 0x8da   :  { %v5033_v33 = vmax.f32 %v8881_v15, 0.0  ;;  %v5035_v34 = vmax.f32 %v8889_v4, 0.0  ;;  %v5465_v4 = vld [vmem:[#allocation15 + $0x40] sm:$0xff]  ;;  %v5466_v22 = vld [vmem:[#allocation15 + $0x48] sm:$0xff] }
 0x8db   :  { %v5034_v27 = vmax.f32 %v8882_v23, 0.0  ;;  %v5036_v36 = vmax.f32 %v8890_v24, 0.0  ;;  %v8336_v23 = vcombine.high %v5465_v4, %v5469_v17  ;;  %v5470_v24 = vld [vmem:[#allocation15 + $0x68] sm:$0xff] }
 0x8dc   :  { %v5045_v37 = vpack.c.bf16 %v5033_v33, %v5029_v25  ;;  %v5047_v38 = vpack.c.bf16 %v5035_v34, %v5031_v32  ;;  %v8335_v25 = vcombine.low %v5465_v4, %v5469_v17  ;;  %v8337_v32 = vcombine.low %v5466_v22, %v5470_v24  ;;  %v5473_v34 = vld [vmem:[#allocation15 + $0x80] sm:$0xff]  ;;  %v10715_v4 = vld [vmem:[#allocation15 + $0x10] sm:$0xff] }
 0x8dd   :  { %v5046_v40 = vpack.c.bf16 %v5034_v27, %v5030_v35  ;;  %v5048_v30 = vpack.c.bf16 %v5036_v36, %v5032_v26  ;;  %v4914_v31 = vpop.f32.mrb[60].mxu0  ;;  %v5020_v28 = vpop.f32.mrb[68].mxu1  ;;  %v8338_v33 = vcombine.high %v5466_v22, %v5470_v24  ;;  %v5477_v35 = vld [vmem:[#allocation15 + $0xa0] sm:$0xff]  ;;  %v5474_v26 = vld [vmem:[#allocation15 + $0x88] sm:$0xff]  ;;  %v10717_v22 = vld [vmem:[#allocation15 + $0x30] sm:$0xff] }
 0x8de   :  { %v8883_v5 = vadd.f32 %v4914_v31, %v4160_v61  ;;  %v8891_v52 = vadd.f32 %v5020_v28, %v4168_v20  ;;  %v4916_v43 = vpop.f32.mrb[61].mxu0  ;;  %v5022_v48 = vpop.f32.mrb[69].mxu1  ;;  %v8344_v27 = vcombine.high %v5473_v34, %v5477_v35  ;;  %v5478_v36 = vld [vmem:[#allocation15 + $0xa8] sm:$0xff]  ;;  %v5485_v31 = vld [vmem:[#allocation15 + $0xe0] sm:$0xff]  ;;  %v10721_v24 = vld [vmem:[#allocation15 + $0x38] sm:$0xff] }
 0x8df   :  { %v8884_v60 = vadd.f32 %v4916_v43, %v4164_v57  ;;  %v8892_v12 = vadd.f32 %v5022_v48, %v4172_v6  ;;  %v4918_v51 = vpop.f32.mrb[62].mxu0  ;;  %v5024_v54 = vpop.f32.mrb[70].mxu1  ;;  %5342 = vmatprep.mubr.bf16.mxu0 %v5046_v40  ;;  %5391 = vmatprep.mubr.bf16.mxu1 %v5048_v30  ;;  %v8346_v40 = vcombine.high %v5474_v26, %v5478_v36  ;;  %v5481_v30 = vld [vmem:[#allocation15 + $0xc0] sm:$0xff]  ;;  %v5482_v28 = vld [vmem:[#allocation15 + $0xc8] sm:$0xff] }
 0x8e0   :  { %v8885_v16 = vadd.f32 %v4918_v51, %v4160_v61  ;;  %v8893_v49 = vadd.f32 %v5024_v54, %v4168_v20  ;;  %v4920_v55 = vpop.f32.mrb[63].mxu0  ;;  %v5026_v56 = vpop.f32.mrb[71].mxu1  ;;  %5343 = vmatmul.mubr.bf16.vlgmr.msra.gmra.mrb[64].mxu0 %v5045_v37  ;;  %5392 = vmatmul.mubr.bf16.vlgmr.msra.gmra.mrb[72].mxu1 %v5047_v38  ;;  %v5037_v58 = vmax.f32 %v8883_v5, 0.0  ;;  %v5039_v21 = vmax.f32 %v8891_v52, 0.0  ;;  %v5457_v61 = vld [vmem:[#allocation15] sm:$0xff]  ;;  %v5486_v52 = vld [vmem:[#allocation15 + $0xe8] sm:$0xff] }
 0x8e1   :  { %v8886_v53 = vadd.f32 %v4920_v55, %v4164_v57  ;;  %v8894_v50 = vadd.f32 %v5026_v56, %v4172_v6  ;;  %v5038_v1 = vmax.f32 %v8884_v60, 0.0  ;;  %v5040_v7 = vmax.f32 %v8892_v12, 0.0  ;;  %v5461_v20 = vld [vmem:[#allocation15 + $0x20] sm:$0xff]  ;;  %v5458_v57 = vld [vmem:[#allocation15 + $0x8] sm:$0xff] }
 0x8e2   :  { %v5041_v59 = vmax.f32 %v8885_v16, 0.0  ;;  %v5043_v63 = vmax.f32 %v8893_v49, 0.0  ;;  %v8328_v6 = vcombine.high %v5457_v61, %v5461_v20  ;;  %v8327_v13 = vcombine.low %v5457_v61, %v5461_v20  ;;  %v5489_v12 = vld [vmem:[#allocation15 + $0x100] sm:$0xff]  ;;  %v5490_v54 = vld [vmem:[#allocation15 + $0x108] sm:$0xff] }
 0x8e3   :  { %v5042_v8 = vmax.f32 %v8886_v53, 0.0  ;;  %v5044_v39 = vmax.f32 %v8894_v50, 0.0  ;;  %v8329_v14 = vcombine.low %v5458_v57, %v5462_v3  ;;  %v8330_v15 = vcombine.high %v5458_v57, %v5462_v3  ;;  %v5493_v51 = vld [vmem:[#allocation15 + $0x120] sm:$0xff]  ;;  %v5494_v49 = vld [vmem:[#allocation15 + $0x128] sm:$0xff] }
 0x8e4   :  { %v5049_v9 = vpack.c.bf16 %v5041_v59, %v5037_v58  ;;  %v5051_v10 = vpack.c.bf16 %v5043_v63, %v5039_v21  ;;  %5883 = vmatprep.subr.bf16.mxu0 %v8328_v6  ;;  %v8343_v37 = vcombine.low %v5473_v34, %v5477_v35  ;;  %v8345_v38 = vcombine.low %v5474_v26, %v5478_v36  ;;  %v5497_v50 = vld [vmem:[#allocation15 + $0x140] sm:$0xff]  ;;  %v5498_v21 = vld [vmem:[#allocation15 + $0x148] sm:$0xff] }
 0x8e5   :  { %v5050_v11 = vpack.c.bf16 %v5042_v8, %v5038_v1  ;;  %v5052_v2 = vpack.c.bf16 %v5044_v39, %v5040_v7  ;;  %5924 = vmatprep.subr.bf16.mxu1 %v8330_v15  ;;  %5884 = vmatpush1.bf16.msra.mxu0 %v8327_v13  ;;  %v8352_v5 = vcombine.high %v5481_v30, %v5485_v31  ;;  %v5501_v58 = vld [vmem:[#allocation15 + $0x160] sm:$0xff]  ;;  %v5502_v63 = vld [vmem:[#allocation15 + $0x168] sm:$0xff] }
 0x8e6   :  { %5925 = vmatpush1.bf16.msra.mxu1 %v8329_v14  ;;  %5885 = vmatprep.subr.bf16.mxu0 %v8336_v23  ;;  %v8351_v43 = vcombine.low %v5481_v30, %v5485_v31  ;;  %v8353_v48 = vcombine.low %v5482_v28, %v5486_v52  ;;  %v8354_v60 = vcombine.high %v5482_v28, %v5486_v52  ;;  %v5505_v39 = vld [vmem:[#allocation15 + $0x180] sm:$0xff]  ;;  %v5510_v61 = vld [vmem:[#allocation15 + $0x1a8] sm:$0xff]  ;;  %v10719_v23 = vld [vmem:[#allocation15 + $0x18] sm:$0xff] }
 0x8e7   :  { %5350 = vmatprep.mubr.bf16.mxu0 %v5050_v11  ;;  %5399 = vmatprep.mubr.bf16.mxu1 %v5052_v2  ;;  %v8360_v16 = vcombine.high %v5489_v12, %v5493_v51  ;;  %v8359_v55 = vcombine.low %v5489_v12, %v5493_v51  ;;  %v8361_v56 = vcombine.low %v5490_v54, %v5494_v49  ;;  %v5513_v20 = vld [vmem:[#allocation15 + $0x1c0] sm:$0xff]  ;;  %v5514_v14 = vld [vmem:[#allocation15 + $0x1c8] sm:$0xff] }
 0x8e8   :  { %5351 = vmatmul.mubr.bf16.gmra.mrb[68].mxu0 %v5049_v9  ;;  %5400 = vmatmul.mubr.bf16.gmra.mrb[76].mxu1 %v5051_v10  ;;  %v8362_v53 = vcombine.high %v5490_v54, %v5494_v49  ;;  %v8368_v59 = vcombine.high %v5497_v50, %v5501_v58  ;;  %v8367_v1 = vcombine.low %v5497_v50, %v5501_v58  ;;  %v5509_v9 = vld [vmem:[#allocation15 + $0x1a0] sm:$0xff]  ;;  %v5506_v10 = vld [vmem:[#allocation15 + $0x188] sm:$0xff]  ;;  %v8326_v54 = vld [vmem:[#allocation14 + $0x2] ss:$0 sm:$0xff] }
 0x8e9   :  { %5915 = vmatprep.mubr.bf16.mxu0 %v10352_v0  ;;  %5956 = vmatprep.mubr.bf16.mxu1 %v10352_v0  ;;  %v8369_v7 = vcombine.low %v5498_v21, %v5502_v63  ;;  %v8370_v8 = vcombine.high %v5498_v21, %v5502_v63  ;;  %v8375_v11 = vcombine.low %v5505_v39, %v5509_v9  ;;  %v5517_v57 = vld [vmem:[#allocation15 + $0x1e0] sm:$0xff]  ;;  %v5518_v15 = vld [vmem:[#allocation15 + $0x1e8] sm:$0xff] }
 0x8ea   :  { %5926 = vmatprep.subr.bf16.mxu1 %v8338_v33  ;;  %5886 = vmatpush1.bf16.msra.mxu0 %v8335_v25  ;;  %v8376_v2 = vcombine.high %v5505_v39, %v5509_v9  ;;  %v8377_v6 = vcombine.low %v5506_v10, %v5510_v61  ;;  %v8378_v3 = vcombine.high %v5506_v10, %v5510_v61 }
 0x8eb   :  { %5927 = vmatpush1.bf16.msra.mxu1 %v8337_v32  ;;  %5887 = vmatprep.subr.bf16.mxu0 %v8344_v27  ;;  %v8384_v13 = vcombine.high %v5513_v20, %v5517_v57  ;;  %v8386_v17 = vcombine.high %v5514_v14, %v5518_v15  ;;  %v8383_v25 = vcombine.low %v5513_v20, %v5517_v57 }
 0x8ec   :  { %5928 = vmatprep.subr.bf16.mxu1 %v8346_v40  ;;  %v8331_v32 = vcombine.low %v10715_v4, %v10717_v22  ;;  %v8333_v33 = vcombine.low %v10719_v23, %v10721_v24  ;;  %v8385_v34 = vcombine.low %v5514_v14, %v5518_v15  ;;  %v8332_v35 = vcombine.high %v10715_v4, %v10717_v22 }
 0x8ed   :  { %v8334_v26 = vcombine.high %v10719_v23, %v10721_v24 }
 0x8ee   :  { %5888 = vmatpush1.bf16.msra.mxu0 %v8343_v37 }
 0x8ef   :  { %5929 = vmatpush1.bf16.msra.mxu1 %v8345_v38  ;;  %5889 = vmatprep.subr.bf16.mxu0 %v8352_v5 }
 0x8f0   :  { %5930 = vmatprep.subr.bf16.mxu1 %v8354_v60 }
 0x8f2   :  { %5890 = vmatpush1.bf16.msra.mxu0 %v8351_v43 }
 0x8f3   :  { %5931 = vmatpush1.bf16.msra.mxu1 %v8353_v48  ;;  %5891 = vmatprep.subr.bf16.mxu0 %v8360_v16 }
 0x8f4   :  { %5932 = vmatprep.subr.bf16.mxu1 %v8362_v53 }
 0x8f6   :  { %5892 = vmatpush1.bf16.msra.mxu0 %v8359_v55 }
 0x8f7   :  { %5933 = vmatpush1.bf16.msra.mxu1 %v8361_v56  ;;  %5893 = vmatprep.subr.bf16.mxu0 %v8368_v59 }
 0x8f8   :  { %5934 = vmatprep.subr.bf16.mxu1 %v8370_v8 }
 0x8fa   :  { %5894 = vmatpush1.bf16.msra.mxu0 %v8367_v1 }
 0x8fb   :  { %5935 = vmatpush1.bf16.msra.mxu1 %v8369_v7  ;;  %5895 = vmatprep.subr.bf16.mxu0 %v8376_v2 }
 0x8fc   :  { %5936 = vmatprep.subr.bf16.mxu1 %v8378_v3 }
 0x8fe   :  { %5896 = vmatpush1.bf16.msra.mxu0 %v8375_v11 }
 0x8ff   :  { %5937 = vmatpush1.bf16.msra.mxu1 %v8377_v6  ;;  %5897 = vmatprep.subr.bf16.mxu0 %v8384_v13 }
 0x900   :  { %5938 = vmatprep.subr.bf16.mxu1 %v8386_v17 }
 0x902   :  { %5898 = vmatpush1.bf16.msra.mxu0 %v8383_v25 }
 0x903   :  { %5939 = vmatpush1.bf16.msra.mxu1 %v8385_v34  ;;  %5965 = vmatprep.subr.bf16.mxu0 %v8332_v35 }
 0x904   :  { %6006 = vmatprep.subr.bf16.mxu1 %v8334_v26 }
 0x9b3   :  { %v8711_v27 = vpop.f32.mrb[64].mxu0  ;;  %v8739_v36 = vpop.f32.mrb[72].mxu1 }
 0x9b4   :  { %v8712_v37 = vpop.f32.mrb[65].mxu0  ;;  %v8740_v38 = vpop.f32.mrb[73].mxu1 }
 0x9b5   :  { %v8713_v40 = vadd.f32 %v8712_v37, %v8711_v27  ;;  %v8741_v30 = vadd.f32 %v8740_v38, %v8739_v36  ;;  %v8714_v31 = vpop.f32.mrb[66].mxu0  ;;  %v8742_v28 = vpop.f32.mrb[74].mxu1  ;;  %v5471_v38 = vld [vmem:[#allocation15 + $0x70] sm:$0xff] }
 0x9b6   :  { %v8715_v5 = vpop.f32.mrb[67].mxu0  ;;  %v8743_v52 = vpop.f32.mrb[75].mxu1 }
 0x9b7   :  { %v5394_v43 = vadd.f32 %v8741_v30, %v8713_v40  ;;  %v8716_v48 = vadd.f32 %v8715_v5, %v8714_v31  ;;  %v8744_v60 = vadd.f32 %v8743_v52, %v8742_v28  ;;  %v5472_v30 = vld [vmem:[#allocation15 + $0x78] sm:$0xff] }
 0x9b9   :  { %v5408_v12 = vadd.f32 %v5394_v43, %v10677_v18  ;;  %v5397_v51 = vadd.f32 %v8744_v60, %v8716_v48  ;;  %v5475_v43 = vld [vmem:[#allocation15 + $0x90] sm:$0xff]  ;;  %v5476_v60 = vld [vmem:[#allocation15 + $0x98] sm:$0xff] }
 0x9ba   :  { %v5479_v48 = vld [vmem:[#allocation15 + $0xb0] sm:$0xff] }
 0x9bb   :  { %v5409_v16 = vadd.f32 %v5397_v51, %v10679_v29  ;;  %v8717_v49 = vpop.f32.mrb[68].mxu0  ;;  %v8745_v55 = vpop.f32.mrb[76].mxu1  ;;  %v5420_v50 = vadd.f32 %v8326_v54, %v5408_v12  ;;  %v5480_v12 = vld [vmem:[#allocation15 + $0xb8] sm:$0xff]  ;;  %v8347_v4 = vcombine.low %v5475_v43, %v5479_v48 }
 0x9bc   :  { %v8718_v56 = vpop.f32.mrb[69].mxu0  ;;  %v8746_v53 = vpop.f32.mrb[77].mxu1  ;;  %v8349_v22 = vcombine.low %v5476_v60, %v5480_v12 }
 0x9bd   :  { %v5421_v58 = vadd.f32 %v8326_v54, %v5409_v16  ;;  %v8719_v21 = vadd.f32 %v8718_v56, %v8717_v49  ;;  %v8747_v59 = vadd.f32 %v8746_v53, %v8745_v55  ;;  %v8720_v63 = vpop.f32.mrb[70].mxu0  ;;  %v8748_v1 = vpop.f32.mrb[78].mxu1  ;;  %v8348_v16 = vcombine.high %v5475_v43, %v5479_v48  ;;  %v5483_v55 = vld [vmem:[#allocation15 + $0xd0] sm:$0xff]  ;;  %v5484_v53 = vld [vmem:[#allocation15 + $0xd8] sm:$0xff] }
 0x9be   :  { %v8721_v7 = vpop.f32.mrb[71].mxu0  ;;  %v8749_v8 = vpop.f32.mrb[79].mxu1  ;;  %v8350_v49 = vcombine.high %v5476_v60, %v5480_v12  ;;  %v5487_v56 = vld [vmem:[#allocation15 + $0xf0] sm:$0xff]  ;;  %v9800_v48 = vld [vmem:[#allocation18 + $0x34] ss:$12 sps:$4 sm:$0xff]  }
 0x9bf   :  { %v5424_v39 = vmax.f32 %v5420_v50, %v5421_v58  ;;  %v5402_v9 = vadd.f32 %v8747_v59, %v8719_v21  ;;  %v8722_v10 = vadd.f32 %v8721_v7, %v8720_v63  ;;  %v8750_v18 = vadd.f32 %v8749_v8, %v8748_v1  ;;  %v5488_v50 = vld [vmem:[#allocation15 + $0xf8] sm:$0xff]  ;;  %v5499_v7 = vld [vmem:[#allocation15 + $0x150] sm:$0xff]  ;;  %v9829_v60 = vld [vmem:[#allocation18 + $0xf8] ss:$12 sps:$4 sm:$0xff]  }
 0x9c0   :  { %v8356_v23 = vcombine.high %v5483_v55, %v5487_v56  ;;  %v8358_v24 = vcombine.high %v5484_v53, %v5488_v50  ;;  %v5492_v58 = vld [vmem:[#allocation15 + $0x118] sm:$0xff]  ;;  %v8355_v59 = vcombine.low %v5483_v55, %v5487_v56  ;;  %v8357_v63 = vcombine.low %v5484_v53, %v5488_v50  ;;  %v5503_v8 = vld [vmem:[#allocation15 + $0x170] sm:$0xff] }
 0x9c1   :  { %v5425_v11 = vrot.slane %v5424_v39, 4  ;;  %v5410_v2 = vadd.f32 %v5402_v9, %v10687_v62  ;;  %v5405_v29 = vadd.f32 %v8750_v18, %v8722_v10  ;;  %v5467_v62 = vld [vmem:[#allocation15 + $0x50] sm:$0xff]  ;;  %v5496_v21 = vld [vmem:[#allocation15 + $0x138] sm:$0xff] }
 0x9c2   :  { %v8340_v5 = vcombine.high %v5467_v62, %v5471_v38  ;;  %v8339_v51 = vcombine.low %v5467_v62, %v5471_v38  ;;  %v5504_v9 = vld [vmem:[#allocation15 + $0x178] sm:$0xff]  ;;  %v8365_v18 = vcombine.low %v5492_v58, %v5496_v21  ;;  %v9825_v43 = vld [vmem:[#allocation18 + $0x20] ss:$12 sps:$4 sm:$0xff]  }
 0x9c3   :  { %v5426_v61 = vmax.f32 %v5424_v39, %v5425_v11  ;;  %v5411_v20 = vadd.f32 %v5405_v29, %v10689_v19  ;;  %v5422_v57 = vadd.f32 %v8326_v54, %v5410_v2  ;;  %v5468_v19 = vld [vmem:[#allocation15 + $0x58] sm:$0xff]  ;;  %v8372_v11 = vcombine.high %v5499_v7, %v5503_v8  ;;  %v5507_v29 = vld [vmem:[#allocation15 + $0x190] sm:$0xff] }
 0x9c4   :  { %v8342_v52 = vcombine.high %v5468_v19, %v5472_v30  ;;  %v5500_v39 = vld [vmem:[#allocation15 + $0x158] sm:$0xff]  ;;  %v9804_v53 = vld [vmem:[#allocation18 + $0x60] ss:$12 sps:$4 sm:$0xff]  }
 0x9c5   :  { %v5423_v6 = vadd.f32 %v8326_v54, %v5411_v20  ;;  %v5427_v3 = vrot.slane %v5426_v61, 2  ;;  %v8341_v54 = vcombine.low %v5468_v19, %v5472_v30  ;;  %v8374_v2 = vcombine.high %v5500_v39, %v5504_v9  ;;  %v5508_v20 = vld [vmem:[#allocation15 + $0x198] sm:$0xff]  ;;  %v9792_v19 = vld [vmem:[#allocation18] ss:$12 sps:$4 sm:$0xff]  }
 0x9c6   :  { %v9794_v38 = vld [vmem:[#allocation18 + $0x4] ss:$12 sps:$4 sm:$0xff]   ;;  %v9820_v30 = vld [vmem:[#allocation18 + $0x8] ss:$12 sps:$4 sm:$0xff]  }
 0x9c7   :  { %v5431_v13 = vmax.f32 %v5422_v57, %v5423_v6  ;;  %v5428_v15 = vmax.f32 %v5426_v61, %v5427_v3  ;;  %v5511_v61 = vld [vmem:[#allocation15 + $0x1b0] sm:$0xff]  ;;  %v5512_v57 = vld [vmem:[#allocation15 + $0x1b8] sm:$0xff]  ;;  %v8371_v6 = vcombine.low %v5499_v7, %v5503_v8  ;;  %v8373_v3 = vcombine.low %v5500_v39, %v5504_v9 }
 0x9c8   :  { %v9798_v12 = vld [vmem:[#allocation18 + $0x30] ss:$12 sps:$4 sm:$0xff]   ;;  %v9839_v56 = vld [vmem:[#allocation18 + $0x128] ss:$12 sps:$4 sm:$0xff]   ;;  %v9833_v39 = vld [vmem:[#allocation18 + $0x10c] ss:$12 sps:$4 sm:$0xff]  }
 0x9c9   :  { %v5432_v14 = vrot.slane %v5431_v13, 4  ;;  %v5429_v34 = vrot.slane %v5428_v15, 1  ;;  %v9806_v55 = vld [vmem:[#allocation18 + $0x64] ss:$12 sps:$4 sm:$0xff]   ;;  %v9840_v50 = vld [vmem:[#allocation18 + $0x68] ss:$12 sps:$4 sm:$0xff]  }
 0x9ca   :  { %v9828_v7 = vld [vmem:[#allocation18 + $0xf4] ss:$12 sps:$4 sm:$0xff]   ;;  %v9826_v8 = vld [vmem:[#allocation18 + $0xf0] ss:$12 sps:$4 sm:$0xff]  }
 0x9cb   :  { %v5433_v17 = vmax.f32 %v5431_v13, %v5432_v14  ;;  %v5430_v27 = vmax.f32 %v5428_v15, %v5429_v34  ;;  %v8380_v13 = vcombine.high %v5507_v29, %v5511_v61  ;;  %v8382_v14 = vcombine.high %v5508_v20, %v5512_v57  ;;  %v5515_v15 = vld [vmem:[#allocation15 + $0x1d0] sm:$0xff]  ;;  %v5520_v34 = vld [vmem:[#allocation15 + $0x1f8] sm:$0xff] }
 0x9cc   :  { %v9831_v9 = vld [vmem:[#allocation18 + $0x108] ss:$12 sps:$4 sm:$0xff]  }
 0x9cd   :  { %v5434_v25 = vrot.slane %v5433_v17, 2 }
 0x9cf   :  { %v5435_v35 = vmax.f32 %v5433_v17, %v5434_v25  ;;  %v5519_v17 = vld [vmem:[#allocation15 + $0x1f0] sm:$0xff]  ;;  %v5516_v25 = vld [vmem:[#allocation15 + $0x1d8] sm:$0xff] }
 0x9d0   :  { %v8389_v62 = vcombine.low %v5516_v25, %v5520_v34 }
 0x9d1   :  { %v5436_v26 = vrot.slane %v5435_v35, 1 }
 0x9d3   :  { %v5437_v36 = vmax.f32 %v5435_v35, %v5436_v26  ;;  %v8379_v35 = vcombine.low %v5507_v29, %v5511_v61  ;;  %v8381_v26 = vcombine.low %v5508_v20, %v5512_v57  ;;  %v9848_v29 = vld [vmem:[#allocation18 + $0x154] ss:$12 sps:$4 sm:$0xff]   ;;  %v9849_v61 = vld [vmem:[#allocation18 + $0x158] ss:$12 sps:$4 sm:$0xff]   ;;  %v9846_v57 = vld [vmem:[#allocation18 + $0x150] ss:$12 sps:$4 sm:$0xff]  }
 0x9d4   :  { %v9850_v20 = vld [vmem:[#allocation18 + $0x98] ss:$12 sps:$4 sm:$0xff]  }
 0x9d5   :  { %v5447_v37 = vsel %vm5446_vm0, %v5437_v36, %v5430_v27  ;;  %v8388_v27 = vcombine.high %v5515_v15, %v5519_v17  ;;  %v8390_v36 = vcombine.high %v5516_v25, %v5520_v34  ;;  %v10749_v25 = vld [vmem:[#allocation17] sm:$0xff] }
 0x9d6   :  { %5450 = vst [vmem:[#allocation2] sm:$0x3] %v5447_v37  ;;  %v8387_v37 = vcombine.low %v5515_v15, %v5519_v17  ;;  %v9858_v15 = vld [vmem:[#allocation18 + $0x184] ss:$12 sps:$4 sm:$0xff]   ;;  %v9859_v17 = vld [vmem:[#allocation18 + $0x248] ss:$12 sps:$4 sm:$0xff]   ;;  %v5526_v34 = vrot.slane %v10749_v25, %v10584_v44 }
 0x9dd   :  { %v5454_v40 = vld [vmem:[#allocation2] sm:$0x3] }
 0x9de   :  { %v5455_v31 = vmax.f32 %v5454_v40, 0.0  ;;  %v9819_v40 = vld [vmem:[#allocation18 + $0xc8] ss:$12 sps:$4 sm:$0xff]  }
 0x9e0   :  { %v10735_v28 = vpack.c.bf16 %v5455_v31, %v5455_v31  ;;  %v9797_v31 = vld [vmem:[#allocation18 + $0x1c] ss:$12 sps:$4 sm:$0xff]  }
 0x9e2   :  { %5916 = vmatmul.mubr.bf16.vlgmr.msra.gmra.mrb[72].mxu0 %v10735_v28  ;;  %5957 = vmatmul.mubr.bf16.vlgmr.msra.gmra.mrb[80].mxu1 %v10735_v28 }
 0x9e3   :  { %5966 = vmatpush1.bf16.msra.mxu0 %v8331_v32  ;;  %6007 = vmatpush1.bf16.msra.mxu1 %v8333_v33  ;;  %v5491_v32 = vld [vmem:[#allocation15 + $0x110] sm:$0xff] }
 0x9e4   :  { %5967 = vmatprep.subr.bf16.mxu0 %v8340_v5  ;;  %6008 = vmatprep.subr.bf16.mxu1 %v8342_v52  ;;  %v5495_v33 = vld [vmem:[#allocation15 + $0x130] sm:$0xff]  ;;  %v9795_v52 = vld [vmem:[#allocation18 + $0x18] ss:$12 sps:$4 sm:$0xff]  }
 0x9e5   :  { %5997 = vmatprep.mubr.bf16.mxu0 %v10352_v0  ;;  %6038 = vmatprep.mubr.bf16.mxu1 %v10352_v0  ;;  %v8364_v1 = vcombine.high %v5491_v32, %v5495_v33  ;;  %v8366_v0 = vcombine.high %v5492_v58, %v5496_v21  ;;  %v8363_v10 = vcombine.low %v5491_v32, %v5495_v33  ;;  %v9824_v5 = vld [vmem:[#allocation18 + $0xe0] ss:$12 sps:$4 sm:$0xff]   ;;  %v9810_v33 = vld [vmem:[#allocation18 + $0x90] ss:$12 sps:$4 sm:$0xff]   ;;  %v9813_v21 = vld [vmem:[#allocation18 + $0xa8] ss:$12 sps:$4 sm:$0xff]  }
 0x9e6   :  { %v9812_v32 = vld [vmem:[#allocation18 + $0x94] ss:$12 sps:$4 sm:$0xff]   ;;  %v9815_v58 = vld [vmem:[#allocation18 + $0xac] ss:$12 sps:$4 sm:$0xff]  }
 0x9e7   :  { %5968 = vmatpush1.bf16.msra.mxu0 %v8339_v51  ;;  %6009 = vmatpush1.bf16.msra.mxu1 %v8341_v54  ;;  %v9830_v51 = vld [vmem:[#allocation18 + $0x38] ss:$12 sps:$4 sm:$0xff]  }
 0x9e8   :  { %5969 = vmatprep.subr.bf16.mxu0 %v8348_v16  ;;  %6010 = vmatprep.subr.bf16.mxu1 %v8350_v49  ;;  %v9803_v54 = vld [vmem:[#allocation18 + $0x4c] ss:$12 sps:$4 sm:$0xff]   ;;  %v9834_v16 = vld [vmem:[#allocation18 + $0x110] ss:$12 sps:$4 sm:$0xff]   ;;  %v9801_v49 = vld [vmem:[#allocation18 + $0x48] ss:$12 sps:$4 sm:$0xff]  }
 0x9eb   :  { %5970 = vmatpush1.bf16.msra.mxu0 %v8347_v4  ;;  %6011 = vmatpush1.bf16.msra.mxu1 %v8349_v22  ;;  %v9809_v4 = vld [vmem:[#allocation18 + $0x7c] ss:$12 sps:$4 sm:$0xff]   ;;  %v9844_v22 = vld [vmem:[#allocation18 + $0x140] ss:$12 sps:$4 sm:$0xff]  }
 0x9ec   :  { %5971 = vmatprep.subr.bf16.mxu0 %v8356_v23  ;;  %6012 = vmatprep.subr.bf16.mxu1 %v8358_v24  ;;  %v9807_v23 = vld [vmem:[#allocation18 + $0x78] ss:$12 sps:$4 sm:$0xff]   ;;  %v9845_v24 = vld [vmem:[#allocation18 + $0x80] ss:$12 sps:$4 sm:$0xff]  }
 0x9ef   :  { %5972 = vmatpush1.bf16.msra.mxu0 %v8355_v59  ;;  %6013 = vmatpush1.bf16.msra.mxu1 %v8357_v63  ;;  %v9818_v59 = vld [vmem:[#allocation18 + $0xc4] ss:$12 sps:$4 sm:$0xff]   ;;  %v9816_v63 = vld [vmem:[#allocation18 + $0xc0] ss:$12 sps:$4 sm:$0xff]  }
 0x9f0   :  { %5973 = vmatprep.subr.bf16.mxu0 %v8364_v1  ;;  %6014 = vmatprep.subr.bf16.mxu1 %v8366_v0  ;;  %v9823_v1 = vld [vmem:[#allocation18 + $0xdc] ss:$12 sps:$4 sm:$0xff]   ;;  %v9821_v0 = vld [vmem:[#allocation18 + $0xd8] ss:$12 sps:$4 sm:$0xff]  }
 0x9f3   :  { %5974 = vmatpush1.bf16.msra.mxu0 %v8363_v10  ;;  %6015 = vmatpush1.bf16.msra.mxu1 %v8365_v18  ;;  %v9838_v10 = vld [vmem:[#allocation18 + $0x124] ss:$12 sps:$4 sm:$0xff]   ;;  %v9836_v18 = vld [vmem:[#allocation18 + $0x120] ss:$12 sps:$4 sm:$0xff]  }
 0x9f4   :  { %5975 = vmatprep.subr.bf16.mxu0 %v8372_v11  ;;  %6016 = vmatprep.subr.bf16.mxu1 %v8374_v2  ;;  %v9843_v11 = vld [vmem:[#allocation18 + $0x13c] ss:$12 sps:$4 sm:$0xff]   ;;  %v9841_v2 = vld [vmem:[#allocation18 + $0x138] ss:$12 sps:$4 sm:$0xff]  }
 0x9f7   :  { %5976 = vmatpush1.bf16.msra.mxu0 %v8371_v6  ;;  %6017 = vmatpush1.bf16.msra.mxu1 %v8373_v3  ;;  %v9853_v6 = vld [vmem:[#allocation18 + $0x16c] ss:$12 sps:$4 sm:$0xff]   ;;  %v9854_v3 = vld [vmem:[#allocation18 + $0x170] ss:$12 sps:$4 sm:$0xff]  }
 0x9f8   :  { %5977 = vmatprep.subr.bf16.mxu0 %v8380_v13  ;;  %6018 = vmatprep.subr.bf16.mxu1 %v8382_v14  ;;  %v9855_v13 = vld [vmem:[#allocation18 + $0xb0] ss:$12 sps:$4 sm:$0xff]   ;;  %v9851_v14 = vld [vmem:[#allocation18 + $0x168] ss:$12 sps:$4 sm:$0xff]  }
 0x9fb   :  { %5978 = vmatpush1.bf16.msra.mxu0 %v8379_v35  ;;  %6019 = vmatpush1.bf16.msra.mxu1 %v8381_v26  ;;  %v5530_v35 = vrot.slane %v10749_v25, %v10587_v45  ;;  %v5538_v26 = vrot.slane %v10749_v25, %v10593_v47  ;;  %v9863_v47 = vld [vmem:[#allocation18 + $0x19c] ss:$12 sps:$4 sm:$0xff]  }
 0x9fc   :  { %5979 = vmatprep.subr.bf16.mxu0 %v8388_v27  ;;  %6020 = vmatprep.subr.bf16.mxu1 %v8390_v36 }
 0x9ff   :  { %5980 = vmatpush1.bf16.msra.mxu0 %v8387_v37  ;;  %6021 = vmatpush1.bf16.msra.mxu1 %v8389_v62 }
 0xa00   :  { %7360 = vmatprep.subr.bf16.mxu0 %v9794_v38  ;;  %8751 = vmatprep.subr.bf16.mxu1 %v9819_v40 }
 0xa02   :  { %5998 = vmatmul.mubr.bf16.vlgmr.msra.gmra.mrb[76].mxu0 %v10735_v28  ;;  %6039 = vmatmul.mubr.bf16.vlgmr.msra.gmra.mrb[84].mxu1 %v10735_v28  ;;  %v9835_v28 = vld [vmem:[#allocation18 + $0x50] ss:$12 sps:$4 sm:$0xff]  }
 0xa03   :  { %7361 = vmatpush1.bf16.msra.mxu0 %v9792_v19  ;;  %8752 = vmatpush3.bf16.msra.mxu1 %v9820_v30 }
 0xa04   :  { %7362 = vmatprep.subr.bf16.mxu0 %v9797_v31  ;;  %8753 = vmatprep.subr.bf16.mxu1 %v9824_v5 }
 0xa07   :  { %7363 = vmatpush1.bf16.msra.mxu0 %v9795_v52  ;;  %8754 = vmatpush3.bf16.msra.mxu1 %v9825_v43 }
 0xa08   :  { %7364 = vmatprep.subr.bf16.mxu0 %v9800_v48  ;;  %8755 = vmatprep.subr.bf16.mxu1 %v9829_v60 }
 0xa0b   :  { %7365 = vmatpush1.bf16.msra.mxu0 %v9798_v12  ;;  %8756 = vmatpush3.bf16.msra.mxu1 %v9830_v51  ;;  %v9856_v51 = vld [vmem:[#allocation18 + $0x180] ss:$12 sps:$4 sm:$0xff]  }
 0xa0c   :  { %7366 = vmatprep.subr.bf16.mxu0 %v9803_v54  ;;  %8757 = vmatprep.subr.bf16.mxu1 %v9834_v16  ;;  %v9860_v54 = vld [vmem:[#allocation18 + $0x188] ss:$12 sps:$4 sm:$0xff]  }
 0xa0f   :  { %7367 = vmatpush1.bf16.msra.mxu0 %v9801_v49  ;;  %8758 = vmatpush3.bf16.msra.mxu1 %v9835_v28  ;;  %v9864_v49 = vld [vmem:[#allocation18 + $0x260] ss:$12 sps:$4 sm:$0xff]  }
 0xa10   :  { %7368 = vmatprep.subr.bf16.mxu0 %v9806_v55  ;;  %8759 = vmatprep.subr.bf16.mxu1 %v9839_v56  ;;  %v9861_v55 = vld [vmem:[#allocation18 + $0x198] ss:$12 sps:$4 sm:$0xff]   ;;  %v9865_v56 = vld [vmem:[#allocation18 + $0x1a0] ss:$12 sps:$4 sm:$0xff]  }
 0xa13   :  { %7369 = vmatpush1.bf16.msra.mxu0 %v9804_v53  ;;  %8760 = vmatpush3.bf16.msra.mxu1 %v9840_v50  ;;  %v9868_v53 = vld [vmem:[#allocation18 + $0x1b4] ss:$12 sps:$4 sm:$0xff]   ;;  %v9869_v50 = vld [vmem:[#allocation18 + $0x278] ss:$12 sps:$4 sm:$0xff]  }
 0xa14   :  { %7370 = vmatprep.subr.bf16.mxu0 %v9809_v4  ;;  %8761 = vmatprep.subr.bf16.mxu1 %v9844_v22  ;;  %v9866_v4 = vld [vmem:[#allocation18 + $0x1b0] ss:$12 sps:$4 sm:$0xff]   ;;  %v9870_v22 = vld [vmem:[#allocation18 + $0x1b8] ss:$12 sps:$4 sm:$0xff]  }
 0xa17   :  { %7371 = vmatpush1.bf16.msra.mxu0 %v9807_v23  ;;  %8762 = vmatpush3.bf16.msra.mxu1 %v9845_v24  ;;  %v9873_v23 = vld [vmem:[#allocation18 + $0x1cc] ss:$12 sps:$4 sm:$0xff]   ;;  %v9874_v24 = vld [vmem:[#allocation18 + $0x290] ss:$12 sps:$4 sm:$0xff]  }
 0xa18   :  { %7372 = vmatprep.subr.bf16.mxu0 %v9812_v32  ;;  %8763 = vmatprep.subr.bf16.mxu1 %v9849_v61  ;;  %v9871_v32 = vld [vmem:[#allocation18 + $0x1c8] ss:$12 sps:$4 sm:$0xff]  }
 0xa1b   :  { %7373 = vmatpush1.bf16.msra.mxu0 %v9810_v33  ;;  %8764 = vmatpush3.bf16.msra.mxu1 %v9850_v20  ;;  %v9875_v33 = vld [vmem:[#allocation18 + $0x1d0] ss:$12 sps:$4 sm:$0xff]   ;;  %v9893_v20 = vld [vmem:[#allocation18 + $0x22c] ss:$12 sps:$4 sm:$0xff]  }
 0xa1c   :  { %7374 = vmatprep.subr.bf16.mxu0 %v9815_v58  ;;  %8765 = vmatprep.subr.bf16.mxu1 %v9854_v3  ;;  %v9878_v58 = vld [vmem:[#allocation18 + $0x1e4] ss:$12 sps:$4 sm:$0xff]  }
 0xa1f   :  { %7375 = vmatpush1.bf16.msra.mxu0 %v9813_v21  ;;  %8766 = vmatpush3.bf16.msra.mxu1 %v9855_v13  ;;  %v9879_v21 = vld [vmem:[#allocation18 + $0x2a8] ss:$12 sps:$4 sm:$0xff]  }
 0xa20   :  { %7376 = vmatprep.subr.bf16.mxu0 %v9818_v59  ;;  %8773 = vmatprep.subr.bf16.mxu1 %v9859_v17  ;;  %v9876_v59 = vld [vmem:[#allocation18 + $0x1e0] ss:$12 sps:$4 sm:$0xff]  }
 0xa23   :  { %7377 = vmatpush1.bf16.msra.mxu0 %v9816_v63  ;;  %v9880_v63 = vld [vmem:[#allocation18 + $0x1e8] ss:$12 sps:$4 sm:$0xff]  }
 0xa24   :  { %7378 = vmatprep.subr.bf16.mxu0 %v9823_v1  ;;  %v9883_v1 = vld [vmem:[#allocation18 + $0x1fc] ss:$12 sps:$4 sm:$0xff]  }
 0xa27   :  { %7379 = vmatpush1.bf16.msra.mxu0 %v9821_v0  ;;  %v9884_v0 = vld [vmem:[#allocation18 + $0x2c0] ss:$12 sps:$4 sm:$0xff]  }
 0xa28   :  { %7380 = vmatprep.subr.bf16.mxu0 %v9828_v7  ;;  %v9881_v7 = vld [vmem:[#allocation18 + $0x1f8] ss:$12 sps:$4 sm:$0xff]  }
 0xa2b   :  { %7381 = vmatpush1.bf16.msra.mxu0 %v9826_v8  ;;  %v9885_v8 = vld [vmem:[#allocation18 + $0x200] ss:$12 sps:$4 sm:$0xff]  }
 0xa2c   :  { %7382 = vmatprep.subr.bf16.mxu0 %v9833_v39  ;;  %v5545_v39 = vsub.s32 5, %v10581_v42 }
 0xa2f   :  { %7383 = vmatpush1.bf16.msra.mxu0 %v9831_v9  ;;  %v5534_v9 = vrot.slane %v10749_v25, %v10590_v46 }
 0xa30   :  { %7384 = vmatprep.subr.bf16.mxu0 %v9838_v10  ;;  %v9888_v10 = vld [vmem:[#allocation18 + $0x214] ss:$12 sps:$4 sm:$0xff]  }
 0xa33   :  { %7385 = vmatpush1.bf16.msra.mxu0 %v9836_v18  ;;  %v9889_v18 = vld [vmem:[#allocation18 + $0x2d8] ss:$12 sps:$4 sm:$0xff]  }
 0xa34   :  { %7386 = vmatprep.subr.bf16.mxu0 %v9843_v11  ;;  %v5546_v11 = vrot.slane %v10749_v25, %v5545_v39  ;;  %v9933_v39 = vld [vmem:[#allocation18 + $0x2ec] ss:$12 sps:$4 sm:$0xff]  }
 0xa37   :  { %7387 = vmatpush1.bf16.msra.mxu0 %v9841_v2  ;;  %v9886_v2 = vld [vmem:[#allocation18 + $0x210] ss:$12 sps:$4 sm:$0xff]  }
 0xa38   :  { %7388 = vmatprep.subr.bf16.mxu0 %v9848_v29  ;;  %v9890_v29 = vld [vmem:[#allocation18 + $0x218] ss:$12 sps:$4 sm:$0xff]  }
 0xa3b   :  { %7389 = vmatpush1.bf16.msra.mxu0 %v9846_v57  ;;  %v9894_v57 = vld [vmem:[#allocation18 + $0x2f0] ss:$12 sps:$4 sm:$0xff]  }
 0xa3c   :  { %7390 = vmatprep.subr.bf16.mxu0 %v9853_v6 }
 0xa3f   :  { %7391 = vmatpush1.bf16.msra.mxu0 %v9851_v14 }
 0xa40   :  { %7401 = vmatprep.subr.bf16.mxu0 %v9858_v15  ;;  %v9891_v15 = vld [vmem:[#allocation18 + $0x228] ss:$12 sps:$4 sm:$0xff]  }
 0xab5   :  { %v5917_v27 = vpop.f32.mrb[72].mxu0  ;;  %v10757_v36 = vpop.f32.mrb[80].mxu1 }
 0xab6   :  { %v5918_v37 = vadd.f32 %v5917_v27, %v5526_v34  ;;  %v5919_v62 = vpop.f32.mrb[73].mxu0  ;;  %v5960_v38 = vpop.f32.mrb[81].mxu1  ;;  %v5959_v61 = vadd.f32 %v10757_v36, %v5534_v9  ;;  %v9898_v27 = vld [vmem:[#allocation18 + $0x244] ss:$12 sps:$4 sm:$0xff]  }
 0xab7   :  { %v5920_v40 = vadd.f32 %v5919_v62, %v5530_v35  ;;  %v5961_v19 = vadd.f32 %v5960_v38, %v5538_v26  ;;  %v5921_v30 = vpop.f32.mrb[74].mxu0  ;;  %v5962_v31 = vpop.f32.mrb[82].mxu1  ;;  %v9895_v26 = vld [vmem:[#allocation18 + $0x230] ss:$12 sps:$4 sm:$0xff]   ;;  %v9899_v38 = vld [vmem:[#allocation18 + $0x3c8] ss:$12 sps:$4 sm:$0xff]  }
 0xab8   :  { %v6047_v5 = vmax.f32 %v5918_v37, 0.0  ;;  %v5922_v52 = vpop.f32.mrb[75].mxu0  ;;  %v5963_v43 = vpop.f32.mrb[83].mxu1  ;;  %v6049_v36 = vmax.f32 %v5959_v61, 0.0  ;;  %v9900_v30 = vld [vmem:[#allocation18 + $0x308] ss:$12 sps:$4 sm:$0xff]  }
 0xab9   :  { %v6048_v48 = vmax.f32 %v5920_v40, 0.0  ;;  %v6050_v60 = vmax.f32 %v5961_v19, 0.0  ;;  %v9896_v19 = vld [vmem:[#allocation18 + $0x240] ss:$12 sps:$4 sm:$0xff]   ;;  %v9934_v9 = vld [vmem:[#allocation18 + $0x470] ss:$12 sps:$4 sm:$0xff]  }
 0xaba   :  { %v6055_v16 = vpack.c.bf16 %v6047_v5, %v6047_v5  ;;  %v10770_v31 = vpack.c.bf16 %v6049_v36, %v6049_v36  ;;  %v9903_v5 = vld [vmem:[#allocation18 + $0x25c] ss:$12 sps:$4 sm:$0xff]   ;;  %v9904_v52 = vld [vmem:[#allocation18 + $0x3e0] ss:$12 sps:$4 sm:$0xff]  }
 0xabb   :  { %v6056_v12 = vpack.c.bf16 %v6048_v48, %v6048_v48  ;;  %v6058_v28 = vpack.c.bf16 %v6050_v60, %v6050_v60  ;;  %v9901_v48 = vld [vmem:[#allocation18 + $0x258] ss:$12 sps:$4 sm:$0xff]   ;;  %v9905_v60 = vld [vmem:[#allocation18 + $0x320] ss:$12 sps:$4 sm:$0xff]   ;;  %v9939_v61 = vld [vmem:[#allocation18 + $0x548] ss:$12 sps:$4 sm:$0xff]  }
 0xabc   :  { %v9946_v36 = vld [vmem:[#allocation18 + $0x330] ss:$12 sps:$4 sm:$0xff]  }
 0xabd   :  { %7392 = vmatprep.mubr.bf16.mxu0 %v6056_v12  ;;  %7556 = vmatprep.mubr.bf16.mxu1 %v6056_v12  ;;  %v9908_v12 = vld [vmem:[#allocation18 + $0x274] ss:$12 sps:$4 sm:$0xff]  }
 0xabe   :  { %7393 = vmatmul.mubr.bf16.vlgmr.msra.gmra.mrb[80].mxu0 %v6055_v16  ;;  %7557 = vmatmul.mubr.bf16.vlgmr.msra.gmra.mrb[88].mxu1 %v6055_v16  ;;  %v9910_v16 = vld [vmem:[#allocation18 + $0x338] ss:$12 sps:$4 sm:$0xff]  }
 0xabf   :  { %7402 = vmatpush1.bf16.msra.mxu0 %v9856_v51  ;;  %8774 = vmatpush3.bf16.msra.mxu1 %v9860_v54  ;;  %v9909_v51 = vld [vmem:[#allocation18 + $0x3f8] ss:$12 sps:$4 sm:$0xff]   ;;  %v9906_v54 = vld [vmem:[#allocation18 + $0x270] ss:$12 sps:$4 sm:$0xff]  }
 0xac0   :  { %7433 = vmatprep.mubr.bf16.mxu0 %v6058_v28  ;;  %7596 = vmatprep.mubr.bf16.mxu1 %v6058_v28  ;;  %v9911_v28 = vld [vmem:[#allocation18 + $0x288] ss:$12 sps:$4 sm:$0xff]  }
 0xac1   :  { %7403 = vmatprep.subr.bf16.mxu0 %v9863_v47  ;;  %8775 = vmatprep.subr.bf16.mxu1 %v9864_v49  ;;  %v9913_v47 = vld [vmem:[#allocation18 + $0x28c] ss:$12 sps:$4 sm:$0xff]   ;;  %v9914_v49 = vld [vmem:[#allocation18 + $0x410] ss:$12 sps:$4 sm:$0xff]  }
 0xac3   :  { %7404 = vmatpush1.bf16.msra.mxu0 %v9861_v55  ;;  %8776 = vmatpush3.bf16.msra.mxu1 %v9865_v56  ;;  %v9915_v55 = vld [vmem:[#allocation18 + $0x350] ss:$12 sps:$4 sm:$0xff]  }
 0xac4   :  { %7405 = vmatprep.subr.bf16.mxu0 %v9868_v53  ;;  %8777 = vmatprep.subr.bf16.mxu1 %v9869_v50  ;;  %v9918_v56 = vld [vmem:[#allocation18 + $0x2a4] ss:$12 sps:$4 sm:$0xff]   ;;  %v9919_v53 = vld [vmem:[#allocation18 + $0x428] ss:$12 sps:$4 sm:$0xff]   ;;  %v9916_v50 = vld [vmem:[#allocation18 + $0x2a0] ss:$12 sps:$4 sm:$0xff]  }
 0xac7   :  { %7406 = vmatpush1.bf16.msra.mxu0 %v9866_v4  ;;  %8778 = vmatpush3.bf16.msra.mxu1 %v9870_v22  ;;  %v9920_v4 = vld [vmem:[#allocation18 + $0x368] ss:$12 sps:$4 sm:$0xff]   ;;  %v5541_v22 = vsub.s32 4, %v10581_v42 }
 0xac8   :  { %7407 = vmatprep.subr.bf16.mxu0 %v9873_v23  ;;  %8779 = vmatprep.subr.bf16.mxu1 %v9874_v24  ;;  %v9923_v23 = vld [vmem:[#allocation18 + $0x2bc] ss:$12 sps:$4 sm:$0xff]   ;;  %v9924_v24 = vld [vmem:[#allocation18 + $0x440] ss:$12 sps:$4 sm:$0xff]  }
 0xacb   :  { %7408 = vmatpush1.bf16.msra.mxu0 %v9871_v32  ;;  %8780 = vmatpush3.bf16.msra.mxu1 %v9875_v33  ;;  %v5553_v32 = vsub.s32 7, %v10581_v42  ;;  %v9921_v33 = vld [vmem:[#allocation18 + $0x2b8] ss:$12 sps:$4 sm:$0xff]  }
 0xacc   :  { %7409 = vmatprep.subr.bf16.mxu0 %v9878_v58  ;;  %8781 = vmatprep.subr.bf16.mxu1 %v9879_v21  ;;  %v9925_v58 = vld [vmem:[#allocation18 + $0x380] ss:$12 sps:$4 sm:$0xff]   ;;  %v5542_v21 = vrot.slane %v10749_v25, %v5541_v22  ;;  %v9978_v22 = vld [vmem:[#allocation18 + $0x3c4] ss:$12 sps:$4 sm:$0xff]  }
 0xacf   :  { %7410 = vmatpush1.bf16.msra.mxu0 %v9876_v59  ;;  %8782 = vmatpush3.bf16.msra.mxu1 %v9880_v63  ;;  %v9928_v59 = vld [vmem:[#allocation18 + $0x2d4] ss:$12 sps:$4 sm:$0xff]   ;;  %v9929_v63 = vld [vmem:[#allocation18 + $0x458] ss:$12 sps:$4 sm:$0xff]  }
 0xad0   :  { %7411 = vmatprep.subr.bf16.mxu0 %v9883_v1  ;;  %8783 = vmatprep.subr.bf16.mxu1 %v9884_v0  ;;  %v5554_v1 = vrot.slane %v10749_v25, %v5553_v32  ;;  %v9926_v0 = vld [vmem:[#allocation18 + $0x2d0] ss:$12 sps:$4 sm:$0xff]  }
 0xad3   :  { %7412 = vmatpush1.bf16.msra.mxu0 %v9881_v7  ;;  %8784 = vmatpush3.bf16.msra.mxu1 %v9885_v8  ;;  %v9930_v7 = vld [vmem:[#allocation18 + $0x398] ss:$12 sps:$4 sm:$0xff]  }
 0xad4   :  { %7413 = vmatprep.subr.bf16.mxu0 %v9888_v10  ;;  %8785 = vmatprep.subr.bf16.mxu1 %v9889_v18  ;;  %v9931_v18 = vld [vmem:[#allocation18 + $0x2e8] ss:$12 sps:$4 sm:$0xff]  }
 0xad5   :  { %v10764_v6 = vpop.f32.mrb[76].mxu0  ;;  %v10766_v3 = vpop.f32.mrb[84].mxu1 }
 0xad6   :  { %v6001_v13 = vpop.f32.mrb[77].mxu0  ;;  %v10768_v14 = vpop.f32.mrb[85].mxu1  ;;  %v6000_v8 = vadd.f32 %v10764_v6, %v5542_v21  ;;  %v9987_v21 = vld [vmem:[#allocation18 + $0x40c] ss:$12 sps:$4 sm:$0xff]  }
 0xad7   :  { %v6002_v17 = vadd.f32 %v6001_v13, %v5546_v11  ;;  %v6003_v34 = vpop.f32.mrb[78].mxu0  ;;  %v6044_v35 = vpop.f32.mrb[86].mxu1  ;;  %7414 = vmatpush1.bf16.msra.mxu0 %v9886_v2  ;;  %8786 = vmatpush3.bf16.msra.mxu1 %v9890_v29  ;;  %v6043_v10 = vadd.f32 %v10768_v14, %v5554_v1  ;;  %v9935_v11 = vld [vmem:[#allocation18 + $0x3b0] ss:$12 sps:$4 sm:$0xff]   ;;  %v9940_v13 = vld [vmem:[#allocation18 + $0x488] ss:$12 sps:$4 sm:$0xff]  }
 0xad8   :  { %v6004_v37 = vpop.f32.mrb[79].mxu0  ;;  %v6045_v62 = vpop.f32.mrb[87].mxu1  ;;  %7415 = vmatprep.subr.bf16.mxu0 %v9893_v20  ;;  %8787 = vmatprep.subr.bf16.mxu1 %v9894_v57  ;;  %v6051_v2 = vmax.f32 %v6000_v8, 0.0  ;;  %v9938_v29 = vld [vmem:[#allocation18 + $0x304] ss:$12 sps:$4 sm:$0xff]  }
 0xad9   :  { %v6052_v40 = vmax.f32 %v6002_v17, 0.0  ;;  %v6054_v20 = vmax.f32 %v6043_v10, 0.0  ;;  %v9936_v57 = vld [vmem:[#allocation18 + $0x300] ss:$12 sps:$4 sm:$0xff]   ;;  %v9941_v34 = vld [vmem:[#allocation18 + $0x318] ss:$12 sps:$4 sm:$0xff]  }
 0xada   :  { %v10782_v6 = vpack.c.bf16 %v6051_v2, %v6051_v2  ;;  %v9944_v14 = vld [vmem:[#allocation18 + $0x560] ss:$12 sps:$4 sm:$0xff]   ;;  %v9950_v37 = vld [vmem:[#allocation18 + $0x4b8] ss:$12 sps:$4 sm:$0xff]   ;;  %v9997_v10 = vld [vmem:[#allocation18 + $0x468] ss:$12 sps:$4 sm:$0xff]  }
 0xadb   :  { %7416 = vmatpush1.bf16.msra.mxu0 %v9891_v15  ;;  %8788 = vmatpush3.bf16.msra.mxu1 %v9895_v26  ;;  %v10772_v43 = vpack.c.bf16 %v6052_v40, %v6052_v40  ;;  %v9943_v15 = vld [vmem:[#allocation18 + $0x31c] ss:$12 sps:$4 sm:$0xff]   ;;  %v10784_v17 = vpack.c.bf16 %v6054_v20, %v6054_v20  ;;  %v9945_v35 = vld [vmem:[#allocation18 + $0x4a0] ss:$12 sps:$4 sm:$0xff]  }
 0xadc   :  { %7417 = vmatprep.subr.bf16.mxu0 %v9898_v27  ;;  %8795 = vmatprep.subr.bf16.mxu1 %v9899_v38  ;;  %v9948_v26 = vld [vmem:[#allocation18 + $0x334] ss:$12 sps:$4 sm:$0xff]   ;;  %v9949_v27 = vld [vmem:[#allocation18 + $0x578] ss:$12 sps:$4 sm:$0xff]   ;;  %v9954_v38 = vld [vmem:[#allocation18 + $0x590] ss:$12 sps:$4 sm:$0xff]  }
 0xadd   :  { %v9953_v62 = vld [vmem:[#allocation18 + $0x34c] ss:$12 sps:$4 sm:$0xff]   ;;  %v9951_v40 = vld [vmem:[#allocation18 + $0x348] ss:$12 sps:$4 sm:$0xff]   ;;  %v10006_v20 = vld [vmem:[#allocation18 + $0x4b0] ss:$12 sps:$4 sm:$0xff]  }
 0xade   :  { %7597 = vmatmul.mubr.bf16.vlgmr.msra.gmra.mrb[92].mxu1 %v10770_v31  ;;  %v9988_v1 = vld [vmem:[#allocation18 + $0x420] ss:$12 sps:$4 sm:$0xff]   ;;  %v10005_v2 = vld [vmem:[#allocation18 + $0x49c] ss:$12 sps:$4 sm:$0xff]  }
 0xadf   :  { %7418 = vmatpush1.bf16.msra.mxu0 %v9896_v19  ;;  %8796 = vmatpush3.bf16.msra.mxu1 %v9900_v30  ;;  %v9955_v19 = vld [vmem:[#allocation18 + $0x4d0] ss:$12 sps:$4 sm:$0xff]   ;;  %v9996_v8 = vld [vmem:[#allocation18 + $0x454] ss:$12 sps:$4 sm:$0xff]  }
 0xae0   :  { %7636 = vmatprep.mubr.bf16.mxu1 %v10772_v43  ;;  %7419 = vmatprep.subr.bf16.mxu0 %v9903_v5  ;;  %v9958_v30 = vld [vmem:[#allocation18 + $0x364] ss:$12 sps:$4 sm:$0xff]   ;;  %v9956_v5 = vld [vmem:[#allocation18 + $0x360] ss:$12 sps:$4 sm:$0xff]  }
 0xae1   :  { %8797 = vmatprep.subr.bf16.mxu1 %v9904_v52  ;;  %v9960_v52 = vld [vmem:[#allocation18 + $0x4e8] ss:$12 sps:$4 sm:$0xff]  }
 0xae3   :  { %7420 = vmatpush1.bf16.msra.mxu0 %v9901_v48  ;;  %8798 = vmatpush3.bf16.msra.mxu1 %v9905_v60  ;;  %v5549_v48 = vsub.s32 6, %v10581_v42  ;;  %v9964_v60 = vld [vmem:[#allocation18 + $0x5c0] ss:$12 sps:$4 sm:$0xff]  }
 0xae4   :  { %7421 = vmatprep.subr.bf16.mxu0 %v9908_v12  ;;  %8799 = vmatprep.subr.bf16.mxu1 %v9909_v51  ;;  %v9961_v12 = vld [vmem:[#allocation18 + $0x378] ss:$12 sps:$4 sm:$0xff]   ;;  %v9965_v51 = vld [vmem:[#allocation18 + $0x500] ss:$12 sps:$4 sm:$0xff]  }
 0xae7   :  { %7422 = vmatpush1.bf16.msra.mxu0 %v9906_v54  ;;  %8800 = vmatpush3.bf16.msra.mxu1 %v9910_v16  ;;  %v9968_v54 = vld [vmem:[#allocation18 + $0x394] ss:$12 sps:$4 sm:$0xff]   ;;  %v5550_v16 = vrot.slane %v10749_v25, %v5549_v48  ;;  %v10039_v48 = vld [vmem:[#allocation18 + $0x5b8] ss:$12 sps:$4 sm:$0xff]  }
 0xae8   :  { %7423 = vmatprep.subr.bf16.mxu0 %v9913_v47  ;;  %8801 = vmatprep.subr.bf16.mxu1 %v9914_v49  ;;  %v9969_v47 = vld [vmem:[#allocation18 + $0x5d8] ss:$12 sps:$4 sm:$0xff]   ;;  %v9966_v49 = vld [vmem:[#allocation18 + $0x390] ss:$12 sps:$4 sm:$0xff]   ;;  %v9976_v25 = vld [vmem:[#allocation18 + $0x3c0] ss:$12 sps:$4 sm:$0xff]  }
 0xaeb   :  { %7424 = vmatpush1.bf16.msra.mxu0 %v9911_v28  ;;  %8802 = vmatpush3.bf16.msra.mxu1 %v9915_v55  ;;  %v9970_v28 = vld [vmem:[#allocation18 + $0x518] ss:$12 sps:$4 sm:$0xff]  }
 0xaec   :  { %7425 = vmatprep.subr.bf16.mxu0 %v9918_v56  ;;  %8803 = vmatprep.subr.bf16.mxu1 %v9919_v53  ;;  %v9973_v55 = vld [vmem:[#allocation18 + $0x3ac] ss:$12 sps:$4 sm:$0xff]   ;;  %v6041_v56 = vadd.f32 %v10766_v3, %v5550_v16  ;;  %v9974_v53 = vld [vmem:[#allocation18 + $0x5f0] ss:$12 sps:$4 sm:$0xff]  }
 0xaed   :  { %v9979_v3 = vld [vmem:[#allocation18 + $0x3d8] ss:$12 sps:$4 sm:$0xff]  }
 0xaef   :  { %7426 = vmatpush1.bf16.msra.mxu0 %v9916_v50  ;;  %8804 = vmatpush3.bf16.msra.mxu1 %v9920_v4  ;;  %v9971_v50 = vld [vmem:[#allocation18 + $0x3a8] ss:$12 sps:$4 sm:$0xff]   ;;  %v9975_v4 = vld [vmem:[#allocation18 + $0x530] ss:$12 sps:$4 sm:$0xff]  }
 0xaf0   :  { %7427 = vmatprep.subr.bf16.mxu0 %v9923_v23  ;;  %8805 = vmatprep.subr.bf16.mxu1 %v9924_v24  ;;  %v6053_v23 = vmax.f32 %v6041_v56, 0.0  ;;  %v9981_v24 = vld [vmem:[#allocation18 + $0x3dc] ss:$12 sps:$4 sm:$0xff]   ;;  %v6319_v56 = vld [vmem:[#allocation20] sm:$0x7] }
 0xaf2   :  { %v10793_v32 = vpack.c.bf16 %v6053_v23, %v6053_v23 }
 0xaf3   :  { %7428 = vmatpush1.bf16.msra.mxu0 %v9921_v33  ;;  %8806 = vmatpush3.bf16.msra.mxu1 %v9925_v58  ;;  %v9984_v33 = vld [vmem:[#allocation18 + $0x3f4] ss:$12 sps:$4 sm:$0xff]   ;;  %v9982_v58 = vld [vmem:[#allocation18 + $0x3f0] ss:$12 sps:$4 sm:$0xff]  }
 0xaf4   :  { %7429 = vmatprep.subr.bf16.mxu0 %v9928_v59  ;;  %8807 = vmatprep.subr.bf16.mxu1 %v9929_v63  ;;  %v9985_v59 = vld [vmem:[#allocation18 + $0x408] ss:$12 sps:$4 sm:$0xff]   ;;  %v9990_v63 = vld [vmem:[#allocation18 + $0x424] ss:$12 sps:$4 sm:$0xff]  }
 0xaf7   :  { %7430 = vmatpush1.bf16.msra.mxu0 %v9926_v0  ;;  %8808 = vmatpush3.bf16.msra.mxu1 %v9930_v7  ;;  %v9993_v0 = vld [vmem:[#allocation18 + $0x43c] ss:$12 sps:$4 sm:$0xff]   ;;  %v9991_v7 = vld [vmem:[#allocation18 + $0x438] ss:$12 sps:$4 sm:$0xff]  }
 0xaf8   :  { %7431 = vmatprep.subr.bf16.mxu0 %v9933_v39  ;;  %8809 = vmatprep.subr.bf16.mxu1 %v9934_v9  ;;  %v9994_v39 = vld [vmem:[#allocation18 + $0x450] ss:$12 sps:$4 sm:$0xff]   ;;  %v9999_v9 = vld [vmem:[#allocation18 + $0x46c] ss:$12 sps:$4 sm:$0xff]  }
 0xafb   :  { %7432 = vmatpush1.bf16.msra.mxu0 %v9931_v18  ;;  %8810 = vmatpush3.bf16.msra.mxu1 %v9935_v11  ;;  %v10002_v18 = vld [vmem:[#allocation18 + $0x484] ss:$12 sps:$4 sm:$0xff]   ;;  %v10000_v11 = vld [vmem:[#allocation18 + $0x480] ss:$12 sps:$4 sm:$0xff]  }
 0xafc   :  { %7442 = vmatprep.subr.bf16.mxu0 %v9938_v29  ;;  %8817 = vmatprep.subr.bf16.mxu1 %v9939_v61  ;;  %v10003_v29 = vld [vmem:[#allocation18 + $0x498] ss:$12 sps:$4 sm:$0xff]   ;;  %v10008_v61 = vld [vmem:[#allocation18 + $0x4b4] ss:$12 sps:$4 sm:$0xff]  }
 0xafe   :  { %7434 = vmatmul.mubr.bf16.vlgmr.msra.gmra.mrb[80].mxu0 %v10770_v31  ;;  %7637 = vmatmul.mubr.bf16.vlgmr.msra.gmra.mrb[96].mxu1 %v10782_v6  ;;  %v9959_v31 = vld [vmem:[#allocation18 + $0x5a8] ss:$12 sps:$4 sm:$0xff]  }
 0xaff   :  { %7443 = vmatpush1.bf16.msra.mxu0 %v9936_v57  ;;  %7474 = vmatprep.mubr.bf16.mxu0 %v10772_v43  ;;  %v9963_v43 = vld [vmem:[#allocation18 + $0x37c] ss:$12 sps:$4 sm:$0xff]   ;;  %v10011_v57 = vld [vmem:[#allocation18 + $0x4cc] ss:$12 sps:$4 sm:$0xff]  }
 0xb00   :  { %8818 = vmatpush3.bf16.msra.mxu1 %v9940_v13  ;;  %7676 = vmatprep.mubr.bf16.mxu1 %v10784_v17  ;;  %v10009_v13 = vld [vmem:[#allocation18 + $0x4c8] ss:$12 sps:$4 sm:$0xff]  }
 0xb01   :  { %7444 = vmatprep.subr.bf16.mxu0 %v9943_v15  ;;  %8819 = vmatprep.subr.bf16.mxu1 %v9944_v14  ;;  %v10014_v15 = vld [vmem:[#allocation18 + $0x4e4] ss:$12 sps:$4 sm:$0xff]   ;;  %v10012_v14 = vld [vmem:[#allocation18 + $0x4e0] ss:$12 sps:$4 sm:$0xff]  }
 0xb03   :  { %7445 = vmatpush1.bf16.msra.mxu0 %v9941_v34  ;;  %v10017_v34 = vld [vmem:[#allocation18 + $0x4fc] ss:$12 sps:$4 sm:$0xff]  }
 0xb04   :  { %8820 = vmatpush3.bf16.msra.mxu1 %v9945_v35  ;;  %7446 = vmatprep.subr.bf16.mxu0 %v9948_v26  ;;  %v10020_v35 = vld [vmem:[#allocation18 + $0x514] ss:$12 sps:$4 sm:$0xff]   ;;  %v10023_v26 = vld [vmem:[#allocation18 + $0x52c] ss:$12 sps:$4 sm:$0xff]  }
 0xb05   :  { %8821 = vmatprep.subr.bf16.mxu1 %v9949_v27  ;;  %v10021_v27 = vld [vmem:[#allocation18 + $0x528] ss:$12 sps:$4 sm:$0xff]  }
 0xb07   :  { %7447 = vmatpush1.bf16.msra.mxu0 %v9946_v36  ;;  %v10026_v36 = vld [vmem:[#allocation18 + $0x544] ss:$12 sps:$4 sm:$0xff]  }
 0xb08   :  { %8822 = vmatpush3.bf16.msra.mxu1 %v9950_v37  ;;  %7448 = vmatprep.subr.bf16.mxu0 %v9953_v62  ;;  %v10024_v37 = vld [vmem:[#allocation18 + $0x540] ss:$12 sps:$4 sm:$0xff]   ;;  %v10029_v62 = vld [vmem:[#allocation18 + $0x55c] ss:$12 sps:$4 sm:$0xff]  }
 0xb09   :  { %8823 = vmatprep.subr.bf16.mxu1 %v9954_v38  ;;  %v10027_v38 = vld [vmem:[#allocation18 + $0x558] ss:$12 sps:$4 sm:$0xff]  }
 0xb0b   :  { %7449 = vmatpush1.bf16.msra.mxu0 %v9951_v40  ;;  %v10032_v40 = vld [vmem:[#allocation18 + $0x574] ss:$12 sps:$4 sm:$0xff]  }
 0xb0c   :  { %8824 = vmatpush3.bf16.msra.mxu1 %v9955_v19  ;;  %7450 = vmatprep.subr.bf16.mxu0 %v9958_v30  ;;  %v10030_v19 = vld [vmem:[#allocation18 + $0x570] ss:$12 sps:$4 sm:$0xff]   ;;  %v10035_v30 = vld [vmem:[#allocation18 + $0x58c] ss:$12 sps:$4 sm:$0xff]  }
 0xb0d   :  { %8825 = vmatprep.subr.bf16.mxu1 %v9959_v31  ;;  %v10033_v31 = vld [vmem:[#allocation18 + $0x588] ss:$12 sps:$4 sm:$0xff]  }
 0xb0f   :  { %7451 = vmatpush1.bf16.msra.mxu0 %v9956_v5  ;;  %v10038_v5 = vld [vmem:[#allocation18 + $0x5a4] ss:$12 sps:$4 sm:$0xff]  }
 0xb10   :  { %8826 = vmatpush3.bf16.msra.mxu1 %v9960_v52  ;;  %7452 = vmatprep.subr.bf16.mxu0 %v9963_v43  ;;  %v10036_v52 = vld [vmem:[#allocation18 + $0x5a0] ss:$12 sps:$4 sm:$0xff]   ;;  %v10041_v43 = vld [vmem:[#allocation18 + $0x5bc] ss:$12 sps:$4 sm:$0xff]  }
 0xb11   :  { %8827 = vmatprep.subr.bf16.mxu1 %v9964_v60  ;;  %v10044_v60 = vld [vmem:[#allocation18 + $0x5d4] ss:$12 sps:$4 sm:$0xff]  }
 0xb13   :  { %7453 = vmatpush1.bf16.msra.mxu0 %v9961_v12  ;;  %v10042_v12 = vld [vmem:[#allocation18 + $0x5d0] ss:$12 sps:$4 sm:$0xff]  }
 0xb14   :  { %8828 = vmatpush3.bf16.msra.mxu1 %v9965_v51  ;;  %7454 = vmatprep.subr.bf16.mxu0 %v9968_v54  ;;  %v10047_v51 = vld [vmem:[#allocation18 + $0x5ec] ss:$12 sps:$4 sm:$0xff]   ;;  %v10045_v54 = vld [vmem:[#allocation18 + $0x5e8] ss:$12 sps:$4 sm:$0xff]  }
 0xb15   :  { %8829 = vmatprep.subr.bf16.mxu1 %v9969_v47 }
 0xb17   :  { %7455 = vmatpush1.bf16.msra.mxu0 %v9966_v49 }
 0xb18   :  { %8830 = vmatpush3.bf16.msra.mxu1 %v9970_v28  ;;  %7456 = vmatprep.subr.bf16.mxu0 %v9973_v55 }
 0xb19   :  { %8831 = vmatprep.subr.bf16.mxu1 %v9974_v53  ;;  %v6332_v53 = vrot.slane %v6319_v56, %v10590_v46  ;;  %v10353_v46 = vmov 1966171168  }
 0xb1b   :  { %7457 = vmatpush1.bf16.msra.mxu0 %v9971_v50 }
 0xb1c   :  { %8832 = vmatpush3.bf16.msra.mxu1 %v9975_v4  ;;  %7458 = vmatprep.subr.bf16.mxu0 %v9978_v22 }
 0xb1f   :  { %7677 = vmatmul.mubr.bf16.vlgmr.msra.gmra.mrb[100].mxu1 %v10793_v32  ;;  %7459 = vmatpush1.bf16.msra.mxu0 %v9976_v25 }
 0xb20   :  { %7460 = vmatprep.subr.bf16.mxu0 %v9981_v24 }
 0xb23   :  { %7461 = vmatpush1.bf16.msra.mxu0 %v9979_v3 }
 0xb24   :  { %7462 = vmatprep.subr.bf16.mxu0 %v9984_v33 }
 0xb27   :  { %7463 = vmatpush1.bf16.msra.mxu0 %v9982_v58 }
 0xb28   :  { %7464 = vmatprep.subr.bf16.mxu0 %v9987_v21 }
 0xb2b   :  { %7465 = vmatpush1.bf16.msra.mxu0 %v9985_v59 }
 0xb2c   :  { %7466 = vmatprep.subr.bf16.mxu0 %v9990_v63 }
 0xb2f   :  { %7467 = vmatpush1.bf16.msra.mxu0 %v9988_v1 }
 0xb30   :  { %7468 = vmatprep.subr.bf16.mxu0 %v9993_v0 }
 0xb33   :  { %7469 = vmatpush1.bf16.msra.mxu0 %v9991_v7 }
 0xb34   :  { %7470 = vmatprep.subr.bf16.mxu0 %v9996_v8 }
 0xb37   :  { %7471 = vmatpush1.bf16.msra.mxu0 %v9994_v39 }
 0xb38   :  { %7472 = vmatprep.subr.bf16.mxu0 %v9999_v9 }
 0xb3b   :  { %7473 = vmatpush1.bf16.msra.mxu0 %v9997_v10  ;;  %v7689_v10 = vunpack.c.l.s4 %v10353_v46 }
 0xb3c   :  { %7483 = vmatprep.subr.bf16.mxu0 %v10002_v18  ;;  %v6324_v18 = vrot.slane %v6319_v56, %v10584_v44 }
 0xb3e   :  { %7475 = vmatmul.mubr.bf16.vlgmr.msra.gmra.mrb[80].mxu0 %v10782_v6  ;;  %v10015_v6 = vld [vmem:[#allocation18 + $0x4f8] ss:$12 sps:$4 sm:$0xff]  }
 0xb3f   :  { %7484 = vmatpush1.bf16.msra.mxu0 %v10000_v11  ;;  %7515 = vmatprep.mubr.bf16.mxu0 %v10784_v17  ;;  %v10018_v17 = vld [vmem:[#allocation18 + $0x510] ss:$12 sps:$4 sm:$0xff]   ;;  %v7690_v11 = vunpack.c.0.s8 %v7689_v10 }
 0xb40   :  { %7485 = vmatprep.subr.bf16.mxu0 %v10005_v2  ;;  %v6328_v2 = vrot.slane %v6319_v56, %v10587_v45 }
 0xb43   :  { %7486 = vmatpush1.bf16.msra.mxu0 %v10003_v29 }
 0xb44   :  { %7487 = vmatprep.subr.bf16.mxu0 %v10008_v61 }
 0xb47   :  { %7488 = vmatpush1.bf16.msra.mxu0 %v10006_v20 }
 0xb48   :  { %7489 = vmatprep.subr.bf16.mxu0 %v10011_v57  ;;  %v7693_v57 = vsub.s32 %v7690_v11, %v10581_v42 }
 0xb4b   :  { %7490 = vmatpush1.bf16.msra.mxu0 %v10009_v13 }
 0xb4c   :  { %7491 = vmatprep.subr.bf16.mxu0 %v10014_v15 }
 0xb4f   :  { %7492 = vmatpush1.bf16.msra.mxu0 %v10012_v14 }
 0xb50   :  { %7493 = vmatprep.subr.bf16.mxu0 %v10017_v34 }
 0xb53   :  { %7494 = vmatpush1.bf16.msra.mxu0 %v10015_v6 }
 0xb54   :  { %7495 = vmatprep.subr.bf16.mxu0 %v10020_v35 }
 0xb57   :  { %7496 = vmatpush1.bf16.msra.mxu0 %v10018_v17 }
 0xb58   :  { %7497 = vmatprep.subr.bf16.mxu0 %v10023_v26 }
 0xb5b   :  { %7498 = vmatpush1.bf16.msra.mxu0 %v10021_v27 }
 0xb5c   :  { %7499 = vmatprep.subr.bf16.mxu0 %v10026_v36 }
 0xb5f   :  { %7500 = vmatpush1.bf16.msra.mxu0 %v10024_v37 }
 0xb60   :  { %7501 = vmatprep.subr.bf16.mxu0 %v10029_v62 }
 0xb63   :  { %7502 = vmatpush1.bf16.msra.mxu0 %v10027_v38 }
 0xb64   :  { %7503 = vmatprep.subr.bf16.mxu0 %v10032_v40 }
 0xb67   :  { %7504 = vmatpush1.bf16.msra.mxu0 %v10030_v19 }
 0xb68   :  { %7505 = vmatprep.subr.bf16.mxu0 %v10035_v30 }
 0xb6b   :  { %7506 = vmatpush1.bf16.msra.mxu0 %v10033_v31 }
 0xb6c   :  { %7507 = vmatprep.subr.bf16.mxu0 %v10038_v5 }
 0xb6f   :  { %7508 = vmatpush1.bf16.msra.mxu0 %v10036_v52 }
 0xb70   :  { %7509 = vmatprep.subr.bf16.mxu0 %v10041_v43 }
 0xb73   :  { %7510 = vmatpush1.bf16.msra.mxu0 %v10039_v48 }
 0xb74   :  { %7511 = vmatprep.subr.bf16.mxu0 %v10044_v60 }
 0xb77   :  { %7512 = vmatpush1.bf16.msra.mxu0 %v10042_v12 }
 0xb78   :  { %7513 = vmatprep.subr.bf16.mxu0 %v10047_v51 }
 0xb7b   :  { %7514 = vmatpush1.bf16.msra.mxu0 %v10045_v54 }
 0xb7e   :  { %7516 = vmatmul.mubr.bf16.vlgmr.msra.gmra.mrb[80].mxu0 %v10793_v32 }
 0xb91   :  { %v8767_v16 = vpop.f32.mrb[88].mxu1 }
 0xb92   :  { %v8768_v47 = vpop.f32.mrb[89].mxu1 }
 0xb93   :  { %v8769_v49 = vadd.f32 %v8768_v47, %v8767_v16  ;;  %v8770_v28 = vpop.f32.mrb[90].mxu1 }
 0xb94   :  { %v8771_v55 = vpop.f32.mrb[91].mxu1 }
 0xb95   :  { %v7559_v22 = vadd.f32 %v8769_v49, %v6332_v53 }
 0xbb1   :  { %v8789_v50 = vpop.f32.mrb[92].mxu1 }
 0xbb2   :  { %v8790_v4 = vpop.f32.mrb[93].mxu1 }
 0xbb3   :  { %v8791_v23 = vadd.f32 %v8790_v4, %v8789_v50  ;;  %v8792_v25 = vpop.f32.mrb[94].mxu1 }
 0xbb4   :  { %v8793_v24 = vpop.f32.mrb[95].mxu1 }
 0xbb5   :  { %v7599_v3 = vadd.f32 %v8791_v23, %v7559_v22 }
 0xbd1   :  { %v8811_v33 = vpop.f32.mrb[96].mxu1 }
 0xbd2   :  { %v8812_v58 = vpop.f32.mrb[97].mxu1 }
 0xbd3   :  { %v8813_v21 = vadd.f32 %v8812_v58, %v8811_v33  ;;  %v8814_v59 = vpop.f32.mrb[98].mxu1 }
 0xbd4   :  { %v8815_v32 = vpop.f32.mrb[99].mxu1 }
 0xbd5   :  { %v7639_v63 = vadd.f32 %v8813_v21, %v7599_v3 }
 0xbf2   :  { %v8833_v1 = vpop.f32.mrb[100].mxu1 }
 0xbf3   :  { %v8834_v0 = vpop.f32.mrb[101].mxu1 }
 0xbf4   :  { %v8835_v7 = vadd.f32 %v8834_v0, %v8833_v1  ;;  %v8836_v8 = vpop.f32.mrb[102].mxu1 }
 0xbf5   :  { %v8837_v39 = vpop.f32.mrb[103].mxu1 }
 0xbf6   :  { %v7679_v9 = vadd.f32 %v8835_v7, %v7639_v63 }
 0xbf8   :  { %v7701_v6 = vrot.slane %v7679_v9, %v7693_v57 }
 0xc51   :  { %v7517_v29 = vpop.f32.mrb[80].mxu0 }
 0xc52   :  { %v8895_v61 = vadd.f32 %v7517_v29, %v6324_v18  ;;  %v7519_v20 = vpop.f32.mrb[81].mxu0 }
 0xc53   :  { %v8896_v13 = vadd.f32 %v7519_v20, %v6328_v2  ;;  %v7521_v15 = vpop.f32.mrb[82].mxu0 }
 0xc54   :  { %v7522_v14 = vpop.f32.mrb[83].mxu0 }
 0xc55   :  { %v7687_v34 = vcombine.low %v8895_v61, %v8896_v13 }
 0xc57   :  { %v7694_v35 = vrot.slane %v7687_v34, %v7693_v57 }
 0xc59   :  { %v7702_v17 = vcombine.low %v7694_v35, %v7701_v6  ;;  %v7703_v26 = vcombine.high %v7694_v35, %v7701_v6 }
 0xc5b   :  { %v7710_v44 = vrot.slane %v7702_v17, %v7693_v57  ;;  %v7717_v27 = vrot.slane %v7703_v26, %v7693_v57 }
 0xc5d   :  { %7724 = vst.msk [vmem:[#allocation21] sm:$0x7] %vm7722_vm1, %v7710_v44  ;;  %7725 = vst.msk [vmem:[#allocation21 + $0x3] sm:$0x7] %vm7722_vm1, %v7717_v27 }
 0xc5e   :  { %10305 = shalt.err (!%p10302_p8)
}
 0xc5f   :  { %s10306_s7 = scalar_lea.hbm %s10827_s11, 96 }
 0xc60   :  { %p10307_p9 = scmp.ne.s32.totalorder %s10827_s11, %s10306_s7  ;;  %p10310_p10 = scmp.lt.u32.totalorder %s10306_s7, %s10827_s11 }
 0xc62   :  { %p10312_p11 = pnand %p10310_p10, %p10307_p9 }
 0xc64   :  { %10315 = shalt.err (!%p10312_p11)
}
 0xc65   :  { %s10355_s19 = smov 48   ;;  %s10356_s9 = smov 3  }
 0xc66   :  { %7737 = dma.vmem_to_hbm [thread:$0]  %s7732_s30, 96, %s10827_s11, [#allocation5], %s10355_s19, %s10355_s19, %s10356_s9  }
 0xc67   :  { %10328 = dma.done.wait [#allocation5], 96  }
 0xc68   :  { %10329 = vsyncadd [#allocation5], 4294967200 }
 0xc69   :  { %7741 = vsyncpa [#allocation4], 1 }
 0xc6a   :  { %7742 = vsyncpa [#allocation7], 1 }
 0xc6b   :  { %7743 = vsyncpa [#allocation10], 1 }
 0xc6c   :  { %7744 = vsyncpa [#allocation13], 1 }
 0xc6d   :  { %7745 = vsyncpa [#allocation16], 1 }
 0xc6e   :  { %7746 = vsyncpa [#allocation19], 1 }
 0xc6f   :  { %7747 = vsyncpa [#allocation5], 1 }

</bundles_post_ra>
